<compile_context>
chip_gen: v7x
topology: tpu7x:2x2x1
jax: 0.10.0
libtpu: 0.0.40
codegen_flags: <defaults>
</compile_context>

<pallas_src>
import functools

import jax
import jax.numpy as jnp
import numpy as np
from jax.experimental import pallas as pl
from jax.experimental.pallas import tpu as pltpu

BF16 = jnp.bfloat16
F32 = jnp.float32


# ------------------------------ Pallas kernel ------------------------------ #

def _psa_kernel(x_ref,
                cv1_wa_ref, cv1_wb_ref, cv1_ba_ref, cv1_bb_ref,
                wq_ref, wk_ref, wv_ref, qb_ref, kb_ref, vb_ref,
                shift_ref, pe_w_ref, pe_b_ref,
                proj_w_ref, proj_b_ref,
                ffn1_w_ref, ffn1_b_ref, ffn2_w_ref, ffn2_b_ref,
                cv2_wa_ref, cv2_wb_ref, cv2_b_ref,
                o_ref, *, num_heads, scale):
    x16 = x_ref[0].astype(BF16)                                       # (N, C1)

    # ---- cv1 (1x1 conv + SiLU); the two channel halves computed separately
    a = jnp.dot(x16, cv1_wa_ref[...], preferred_element_type=F32) + cv1_ba_ref[...]
    a = a * jax.nn.sigmoid(a)                                         # (N, c)
    bfeat = jnp.dot(x16, cv1_wb_ref[...], preferred_element_type=F32) + cv1_bb_ref[...]
    bfeat = bfeat * jax.nn.sigmoid(bfeat)                             # (N, c)

    # ---- attention(b): qkv + per-head softmax attention (channels-last)
    b16 = bfeat.astype(BF16)
    outs, vs = [], []
    for h in range(num_heads):
        qh = jnp.dot(b16, wq_ref[h], preferred_element_type=F32) + qb_ref[h]
        kh = jnp.dot(b16, wk_ref[h], preferred_element_type=F32) + kb_ref[h]
        vh = jnp.dot(b16, wv_ref[h], preferred_element_type=F32) + vb_ref[h]
        # scores = (q * scale) @ k^T
        s = jax.lax.dot_general(
            (qh * scale).astype(BF16), kh.astype(BF16),
            dimension_numbers=(((1,), (1,)), ((), ())),
            preferred_element_type=F32)                               # (N, N)
        s = s - jnp.max(s, axis=-1, keepdims=True)
        e = jnp.exp(s)
        p = e * pl.reciprocal(jnp.sum(e, axis=-1, keepdims=True), approx=True)
        outs.append(jnp.dot(p.astype(BF16), vh.astype(BF16),
                            preferred_element_type=F32))              # (N, hd)
        vs.append(vh)
    att = outs[0] if num_heads == 1 else jnp.concatenate(outs, axis=-1)   # (N, c)
    v_all = vs[0] if num_heads == 1 else jnp.concatenate(vs, axis=-1)     # (N, c)

    # ---- pe: depthwise 3x3 conv on v via 9 constant (N, N) 0/1 shift matrices
    v16 = v_all.astype(BF16)
    pw = pe_w_ref[...]                                                # (9, c)
    pe = jnp.zeros_like(att)
    for tap in range(9):
        shifted = jnp.dot(shift_ref[tap], v16, preferred_element_type=F32)
        pe = pe + shifted * pw[tap]
    pe = pe + pe_b_ref[...]

    # ---- proj + residual
    xsum = (att + pe).astype(BF16)
    proj = jnp.dot(xsum, proj_w_ref[...], preferred_element_type=F32) + proj_b_ref[...]
    bfeat = bfeat + proj

    # ---- FFN + residual
    h1 = jnp.dot(bfeat.astype(BF16), ffn1_w_ref[...], preferred_element_type=F32)
    h1 = h1 + ffn1_b_ref[...]
    h1 = h1 * jax.nn.sigmoid(h1)
    h2 = jnp.dot(h1.astype(BF16), ffn2_w_ref[...], preferred_element_type=F32)
    h2 = h2 + ffn2_b_ref[...]
    bfeat = bfeat + h2

    # ---- cv2 on concat(a, b) without materializing the concat
    out = (jnp.dot(a.astype(BF16), cv2_wa_ref[...], preferred_element_type=F32)
           + jnp.dot(bfeat.astype(BF16), cv2_wb_ref[...], preferred_element_type=F32)
           + cv2_b_ref[...])
    o_ref[0] = out * jax.nn.sigmoid(out)                              # (N, C1)


# --------------------------- host-side constants ---------------------------- #

@functools.lru_cache(maxsize=None)
def _shift_matrices(H, W):
    """9 (N, N) 0/1 matrices; tap t = ky*3+kx gathers the (ky-1, kx-1) neighbor."""
    N = H * W
    mats = np.zeros((9, N, N), np.float32)
    for ky in range(3):
        for kx in range(3):
            t = ky * 3 + kx
            for y in range(H):
                yy = y + ky - 1
                if not (0 <= yy < H):
                    continue
                for x in range(W):
                    xx = x + kx - 1
                    if 0 <= xx < W:
                        mats[t, y * W + x, yy * W + xx] = 1.0
    return mats


# ------------------------------ PSA forward -------------------------------- #

def psa_forward(x_nchw, p, *, num_heads):
    B, C1, H, W = x_nchw.shape
    N = H * W
    c = C1 // 2                       # self.c = int(c1 * 0.5)
    head_dim = c // num_heads
    key_dim = head_dim // 2           # attn_ratio = 0.5
    scale = key_dim ** -0.5
    step = 2 * key_dim + head_dim

    x = jnp.transpose(x_nchw, (0, 2, 3, 1)).reshape(B, N, C1)     # channels-last

    # ---- weight prep: bf16 matmul operands, per-half / per-head splits -----
    cv1_wa = p["cv1_w"][:, :c].astype(BF16)
    cv1_wb = p["cv1_w"][:, c:].astype(BF16)
    cv1_ba = p["cv1_b"][:c].reshape(1, c)
    cv1_bb = p["cv1_b"][c:].reshape(1, c)

    wq = jnp.stack([p["qkv_w"][:, h * step:h * step + key_dim]
                    for h in range(num_heads)]).astype(BF16)
    wk = jnp.stack([p["qkv_w"][:, h * step + key_dim:h * step + 2 * key_dim]
                    for h in range(num_heads)]).astype(BF16)
    wv = jnp.stack([p["qkv_w"][:, h * step + 2 * key_dim:(h + 1) * step]
                    for h in range(num_heads)]).astype(BF16)
    qb = jnp.stack([p["qkv_b"][h * step:h * step + key_dim]
                    for h in range(num_heads)]).reshape(num_heads, 1, key_dim)
    kb = jnp.stack([p["qkv_b"][h * step + key_dim:h * step + 2 * key_dim]
                    for h in range(num_heads)]).reshape(num_heads, 1, key_dim)
    vb = jnp.stack([p["qkv_b"][h * step + 2 * key_dim:(h + 1) * step]
                    for h in range(num_heads)]).reshape(num_heads, 1, head_dim)

    shift = jnp.asarray(_shift_matrices(H, W), BF16)               # (9, N, N)

    pe_w = p["pe_w"]
    pe_b = p["pe_b"].reshape(1, c)
    proj_w = p["proj_w"].astype(BF16)
    proj_b = p["proj_b"].reshape(1, c)
    ffn1_w = p["ffn1_w"].astype(BF16)
    ffn1_b = p["ffn1_b"].reshape(1, 2 * c)
    ffn2_w = p["ffn2_w"].astype(BF16)
    ffn2_b = p["ffn2_b"].reshape(1, c)
    cv2_wa = p["cv2_w"][:c].astype(BF16)
    cv2_wb = p["cv2_w"][c:].astype(BF16)
    cv2_b = p["cv2_b"].reshape(1, C1)

    def row_map(b):
        return (b, 0, 0)

    def full2(b):
        return (0, 0)

    def full3(b):
        return (0, 0, 0)

    in_specs = [
        pl.BlockSpec((1, N, C1), row_map),                   # x
        pl.BlockSpec((C1, c), full2),                        # cv1_wa
        pl.BlockSpec((C1, c), full2),                        # cv1_wb
        pl.BlockSpec((1, c), full2),                         # cv1_ba
        pl.BlockSpec((1, c), full2),                         # cv1_bb
        pl.BlockSpec((num_heads, c, key_dim), full3),        # wq
        pl.BlockSpec((num_heads, c, key_dim), full3),        # wk
        pl.BlockSpec((num_heads, c, head_dim), full3),       # wv
        pl.BlockSpec((num_heads, 1, key_dim), full3),        # qb
        pl.BlockSpec((num_heads, 1, key_dim), full3),        # kb
        pl.BlockSpec((num_heads, 1, head_dim), full3),       # vb
        pl.BlockSpec((9, N, N), full3),                      # shift
        pl.BlockSpec((9, c), full2),                         # pe_w
        pl.BlockSpec((1, c), full2),                         # pe_b
        pl.BlockSpec((c, c), full2),                         # proj_w
        pl.BlockSpec((1, c), full2),                         # proj_b
        pl.BlockSpec((c, 2 * c), full2),                     # ffn1_w
        pl.BlockSpec((1, 2 * c), full2),                     # ffn1_b
        pl.BlockSpec((2 * c, c), full2),                     # ffn2_w
        pl.BlockSpec((1, c), full2),                         # ffn2_b
        pl.BlockSpec((c, C1), full2),                        # cv2_wa
        pl.BlockSpec((c, C1), full2),                        # cv2_wb
        pl.BlockSpec((1, C1), full2),                        # cv2_b
    ]

    kern = functools.partial(_psa_kernel, num_heads=num_heads, scale=scale)
    out = pl.pallas_call(
        kern,
        out_shape=jax.ShapeDtypeStruct((B, N, C1), jnp.float32),
        grid=(B,),
        in_specs=in_specs,
        out_specs=pl.BlockSpec((1, N, C1), row_map),
        compiler_params=pltpu.CompilerParams(
            dimension_semantics=("parallel",),       # B>=2 -> both TCs on v7x
            vmem_limit_bytes=64 * 1024 * 1024),
    )(x, cv1_wa, cv1_wb, cv1_ba, cv1_bb,
      wq, wk, wv, qb, kb, vb,
      shift, pe_w, pe_b,
      proj_w, proj_b, ffn1_w, ffn1_b, ffn2_w, ffn2_b,
      cv2_wa, cv2_wb, cv2_b)

    return jnp.transpose(out.reshape(B, H, W, C1), (0, 3, 1, 2))      # NCHW


# --------------------------- plain-JAX reference --------------------------- #

def _silu(x):
    return x * jax.nn.sigmoid(x)


def psa_reference(x_nchw, p, *, num_heads):
    B, C1, H, W = x_nchw.shape
    N = H * W
    c = C1 // 2
    head_dim = c // num_heads
    key_dim = head_dim // 2
    scale = key_dim ** -0.5
    hp = jax.lax.Precision.HIGHEST

    def c1x1(t, w, b, act):
        y = jnp.einsum("bnc,cd->bnd", t, w, precision=hp) + b
        return _silu(y) if act else y

    x = jnp.transpose(x_nchw, (0, 2, 3, 1)).reshape(B, N, C1)
    y = c1x1(x, p["cv1_w"], p["cv1_b"], True)
    a, bf = y[..., :c], y[..., c:]

    qkv = c1x1(bf, p["qkv_w"], p["qkv_b"], False)
    qkv = jnp.transpose(qkv, (0, 2, 1)).reshape(B, num_heads, -1, N)
    q = qkv[:, :, :key_dim]
    k = qkv[:, :, key_dim:2 * key_dim]
    v = qkv[:, :, 2 * key_dim:]

    attn = jnp.einsum("bhki,bhkj->bhij", q, k, precision=hp) * scale
    attn = jax.nn.softmax(attn, axis=-1)
    av = jnp.einsum("bhdj,bhij->bhdi", v, attn, precision=hp).reshape(B, c, N)

    v_nhwc = jnp.transpose(v.reshape(B, c, H, W), (0, 2, 3, 1))
    xp = jnp.pad(v_nhwc, ((0, 0), (1, 1), (1, 1), (0, 0)))
    pe = jnp.zeros_like(v_nhwc)
    for dy in range(3):
        for dx in range(3):
            pe = pe + xp[:, dy:dy + H, dx:dx + W, :] * p["pe_w"][dy * 3 + dx]
    pe = pe + p["pe_b"]

    attn_x = jnp.transpose(av, (0, 2, 1)) + pe.reshape(B, N, c)
    attn_x = c1x1(attn_x, p["proj_w"], p["proj_b"], False)
    bf = bf + attn_x

    f = c1x1(bf, p["ffn1_w"], p["ffn1_b"], True)
    f = c1x1(f, p["ffn2_w"], p["ffn2_b"], False)
    bf = bf + f

    out = c1x1(jnp.concatenate([a, bf], -1), p["cv2_w"], p["cv2_b"], True)
    return jnp.transpose(out.reshape(B, H, W, C1), (0, 3, 1, 2))


# ------------------------------- parameters -------------------------------- #

def init_params(key, c1):
    # Conv(+BN folded) weights stored channels-last: 1x1 conv as (Cin, Cout),
    # depthwise 3x3 as (9, C) with tap order (dy*3 + dx).
    c = c1 // 2
    num_heads = c // 64
    head_dim = c // num_heads
    key_dim = head_dim // 2
    h = c + 2 * key_dim * num_heads

    def w(k, shape, scl=0.05):
        return scl * jax.random.normal(k, shape, jnp.float32)

    ks = jax.random.split(key, 14)
    p = {
        "cv1_w": w(ks[0], (c1, 2 * c)),   "cv1_b": w(ks[1], (2 * c,)),
        "qkv_w": w(ks[2], (c, h)),        "qkv_b": w(ks[3], (h,)),
        "pe_w":  w(ks[4], (9, c)),        "pe_b":  w(ks[5], (c,)),
        "proj_w": w(ks[6], (c, c)),       "proj_b": w(ks[7], (c,)),
        "ffn1_w": w(ks[8], (c, 2 * c)),   "ffn1_b": w(ks[9], (2 * c,)),
        "ffn2_w": w(ks[10], (2 * c, c)),  "ffn2_b": w(ks[11], (c,)),
        "cv2_w": w(ks[12], (2 * c, c1)),  "cv2_b": w(ks[13], (c1,)),
    }
    return p, num_heads


if __name__ == "__main__":
    key = jax.random.PRNGKey(0)
    kx, kp = jax.random.split(key)

    # c1 must be >= 128 so that num_heads = (c1 // 2) // 64 >= 1 (as in the module).
    B, C1, H, W = 2, 128, 8, 8
    x = jax.random.normal(kx, (B, C1, H, W), jnp.float32)
    params, num_heads = init_params(kp, C1)

    fwd = jax.jit(functools.partial(psa_forward, num_heads=num_heads))
    out = jax.block_until_ready(fwd(x, params))
    assert out.shape == (B, C1, H, W)

    ref = psa_reference(x, params, num_heads=num_heads)
    np.testing.assert_allclose(np.asarray(out), np.asarray(ref),
                               rtol=1e-2, atol=1e-2)
    print("KERNEL_OK")
</pallas_src>

<mosaic_0001>
module attributes {stable_mosaic.version = 11 : i64} {
  func.func @_psa_kernel(%arg0: i32, %arg1: memref<1x64x128xf32, #tpu.memory_space<vmem>>, %arg2: memref<128x64xbf16, #tpu.memory_space<vmem>>, %arg3: memref<128x64xbf16, #tpu.memory_space<vmem>>, %arg4: memref<1x64xf32, #tpu.memory_space<vmem>>, %arg5: memref<1x64xf32, #tpu.memory_space<vmem>>, %arg6: memref<1x64x32xbf16, #tpu.memory_space<vmem>>, %arg7: memref<1x64x32xbf16, #tpu.memory_space<vmem>>, %arg8: memref<1x64x64xbf16, #tpu.memory_space<vmem>>, %arg9: memref<1x1x32xf32, #tpu.memory_space<vmem>>, %arg10: memref<1x1x32xf32, #tpu.memory_space<vmem>>, %arg11: memref<1x1x64xf32, #tpu.memory_space<vmem>>, %arg12: memref<9x64x64xbf16, #tpu.memory_space<vmem>>, %arg13: memref<9x64xf32, #tpu.memory_space<vmem>>, %arg14: memref<1x64xf32, #tpu.memory_space<vmem>>, %arg15: memref<64x64xbf16, #tpu.memory_space<vmem>>, %arg16: memref<1x64xf32, #tpu.memory_space<vmem>>, %arg17: memref<64x128xbf16, #tpu.memory_space<vmem>>, %arg18: memref<1x128xf32, #tpu.memory_space<vmem>>, %arg19: memref<128x64xbf16, #tpu.memory_space<vmem>>, %arg20: memref<1x64xf32, #tpu.memory_space<vmem>>, %arg21: memref<64x128xbf16, #tpu.memory_space<vmem>>, %arg22: memref<64x128xbf16, #tpu.memory_space<vmem>>, %arg23: memref<1x128xf32, #tpu.memory_space<vmem>>, %arg24: memref<1x64x128xf32, #tpu.memory_space<vmem>>) attributes {dimension_semantics = [#tpu.dimension_semantics<parallel>], iteration_bounds = array<i64: 2>, scalar_prefetch = 0 : i64, scratch_operands = 0 : i64, tpu.core_type = #tpu.core_type<tc>, window_params = [{transform_indices = @transform_0, window_bounds = array<i64: 1, 64, 128>}, {pipeline_mode = #tpu.pipeline_mode<synchronous>, transform_indices = @transform_1, window_bounds = array<i64: 128, 64>}, {pipeline_mode = #tpu.pipeline_mode<synchronous>, transform_indices = @transform_2, window_bounds = array<i64: 128, 64>}, {pipeline_mode = #tpu.pipeline_mode<synchronous>, transform_indices = @transform_3, window_bounds = array<i64: 1, 64>}, {pipeline_mode = #tpu.pipeline_mode<synchronous>, transform_indices = @transform_4, window_bounds = array<i64: 1, 64>}, {pipeline_mode = #tpu.pipeline_mode<synchronous>, transform_indices = @transform_5, window_bounds = array<i64: 1, 64, 32>}, {pipeline_mode = #tpu.pipeline_mode<synchronous>, transform_indices = @transform_6, window_bounds = array<i64: 1, 64, 32>}, {pipeline_mode = #tpu.pipeline_mode<synchronous>, transform_indices = @transform_7, window_bounds = array<i64: 1, 64, 64>}, {pipeline_mode = #tpu.pipeline_mode<synchronous>, transform_indices = @transform_8, window_bounds = array<i64: 1, 1, 32>}, {pipeline_mode = #tpu.pipeline_mode<synchronous>, transform_indices = @transform_9, window_bounds = array<i64: 1, 1, 32>}, {pipeline_mode = #tpu.pipeline_mode<synchronous>, transform_indices = @transform_10, window_bounds = array<i64: 1, 1, 64>}, {pipeline_mode = #tpu.pipeline_mode<synchronous>, transform_indices = @transform_11, window_bounds = array<i64: 9, 64, 64>}, {pipeline_mode = #tpu.pipeline_mode<synchronous>, transform_indices = @transform_12, window_bounds = array<i64: 9, 64>}, {pipeline_mode = #tpu.pipeline_mode<synchronous>, transform_indices = @transform_13, window_bounds = array<i64: 1, 64>}, {pipeline_mode = #tpu.pipeline_mode<synchronous>, transform_indices = @transform_14, window_bounds = array<i64: 64, 64>}, {pipeline_mode = #tpu.pipeline_mode<synchronous>, transform_indices = @transform_15, window_bounds = array<i64: 1, 64>}, {pipeline_mode = #tpu.pipeline_mode<synchronous>, transform_indices = @transform_16, window_bounds = array<i64: 64, 128>}, {pipeline_mode = #tpu.pipeline_mode<synchronous>, transform_indices = @transform_17, window_bounds = array<i64: 1, 128>}, {pipeline_mode = #tpu.pipeline_mode<synchronous>, transform_indices = @transform_18, window_bounds = array<i64: 128, 64>}, {pipeline_mode = #tpu.pipeline_mode<synchronous>, transform_indices = @transform_19, window_bounds = array<i64: 1, 64>}, {pipeline_mode = #tpu.pipeline_mode<synchronous>, transform_indices = @transform_20, window_bounds = array<i64: 64, 128>}, {pipeline_mode = #tpu.pipeline_mode<synchronous>, transform_indices = @transform_21, window_bounds = array<i64: 64, 128>}, {pipeline_mode = #tpu.pipeline_mode<synchronous>, transform_indices = @transform_22, window_bounds = array<i64: 1, 128>}, {transform_indices = @transform_23, window_bounds = array<i64: 1, 64, 128>}]} {
    %c0 = arith.constant 0 : index
    %c0_0 = arith.constant 0 : index
    %c0_1 = arith.constant 0 : index
    %0 = vector.load %arg1[%c0, %c0_0, %c0_1] : memref<1x64x128xf32, #tpu.memory_space<vmem>>, vector<1x64x128xf32>
    %1 = vector.shape_cast %0 : vector<1x64x128xf32> to vector<64x128xf32>
    %2 = arith.truncf %1 : vector<64x128xf32> to vector<64x128xbf16>
    %c0_2 = arith.constant 0 : index
    %c0_3 = arith.constant 0 : index
    %3 = vector.load %arg2[%c0_2, %c0_3] : memref<128x64xbf16, #tpu.memory_space<vmem>>, vector<128x64xbf16>
    %cst = arith.constant dense<0.000000e+00> : vector<64x64xf32>
    %4 = tpu.matmul %2, %3, %cst {dimension_numbers = #tpu.dot_dimension_numbers<[1], [0], [0], [1], [0, 0, 1, 1], [], []>} : vector<64x128xbf16>, vector<128x64xbf16>, vector<64x64xf32> -> vector<64x64xf32>
    %c0_4 = arith.constant 0 : index
    %c0_5 = arith.constant 0 : index
    %5 = vector.load %arg4[%c0_4, %c0_5] : memref<1x64xf32, #tpu.memory_space<vmem>>, vector<1x64xf32>
    %6 = vector.broadcast %5 : vector<1x64xf32> to vector<64x64xf32>
    %7 = arith.addf %4, %6 : vector<64x64xf32>
    %8 = arith.negf %7 : vector<64x64xf32>
    %9 = math.exp %8 : vector<64x64xf32>
    %cst_6 = arith.constant 1.000000e+00 : f32
    %10 = vector.broadcast %cst_6 : f32 to vector<64x64xf32>
    %11 = arith.addf %10, %9 : vector<64x64xf32>
    %12 = arith.divf %10, %11 : vector<64x64xf32>
    %13 = arith.mulf %7, %12 : vector<64x64xf32>
    %c0_7 = arith.constant 0 : index
    %c0_8 = arith.constant 0 : index
    %14 = vector.load %arg3[%c0_7, %c0_8] : memref<128x64xbf16, #tpu.memory_space<vmem>>, vector<128x64xbf16>
    %cst_9 = arith.constant dense<0.000000e+00> : vector<64x64xf32>
    %15 = tpu.matmul %2, %14, %cst_9 {dimension_numbers = #tpu.dot_dimension_numbers<[1], [0], [0], [1], [0, 0, 1, 1], [], []>} : vector<64x128xbf16>, vector<128x64xbf16>, vector<64x64xf32> -> vector<64x64xf32>
    %c0_10 = arith.constant 0 : index
    %c0_11 = arith.constant 0 : index
    %16 = vector.load %arg5[%c0_10, %c0_11] : memref<1x64xf32, #tpu.memory_space<vmem>>, vector<1x64xf32>
    %17 = vector.broadcast %16 : vector<1x64xf32> to vector<64x64xf32>
    %18 = arith.addf %15, %17 : vector<64x64xf32>
    %19 = arith.negf %18 : vector<64x64xf32>
    %20 = math.exp %19 : vector<64x64xf32>
    %cst_12 = arith.constant 1.000000e+00 : f32
    %21 = vector.broadcast %cst_12 : f32 to vector<64x64xf32>
    %22 = arith.addf %21, %20 : vector<64x64xf32>
    %23 = arith.divf %21, %22 : vector<64x64xf32>
    %24 = arith.mulf %18, %23 : vector<64x64xf32>
    %25 = arith.truncf %24 : vector<64x64xf32> to vector<64x64xbf16>
    %c0_13 = arith.constant 0 : index
    %c0_14 = arith.constant 0 : index
    %c0_15 = arith.constant 0 : index
    %26 = vector.load %arg6[%c0_13, %c0_14, %c0_15] : memref<1x64x32xbf16, #tpu.memory_space<vmem>>, vector<1x64x32xbf16>
    %27 = vector.shape_cast %26 : vector<1x64x32xbf16> to vector<64x32xbf16>
    %cst_16 = arith.constant dense<0.000000e+00> : vector<64x32xf32>
    %28 = tpu.matmul %25, %27, %cst_16 {dimension_numbers = #tpu.dot_dimension_numbers<[1], [0], [0], [1], [0, 0, 1, 1], [], []>} : vector<64x64xbf16>, vector<64x32xbf16>, vector<64x32xf32> -> vector<64x32xf32>
    %c0_17 = arith.constant 0 : index
    %c0_18 = arith.constant 0 : index
    %c0_19 = arith.constant 0 : index
    %29 = vector.load %arg9[%c0_17, %c0_18, %c0_19] : memref<1x1x32xf32, #tpu.memory_space<vmem>>, vector<1x1x32xf32>
    %30 = vector.shape_cast %29 : vector<1x1x32xf32> to vector<1x32xf32>
    %31 = vector.broadcast %30 : vector<1x32xf32> to vector<64x32xf32>
    %32 = arith.addf %28, %31 : vector<64x32xf32>
    %c0_20 = arith.constant 0 : index
    %c0_21 = arith.constant 0 : index
    %c0_22 = arith.constant 0 : index
    %33 = vector.load %arg7[%c0_20, %c0_21, %c0_22] : memref<1x64x32xbf16, #tpu.memory_space<vmem>>, vector<1x64x32xbf16>
    %34 = vector.shape_cast %33 : vector<1x64x32xbf16> to vector<64x32xbf16>
    %cst_23 = arith.constant dense<0.000000e+00> : vector<64x32xf32>
    %35 = tpu.matmul %25, %34, %cst_23 {dimension_numbers = #tpu.dot_dimension_numbers<[1], [0], [0], [1], [0, 0, 1, 1], [], []>} : vector<64x64xbf16>, vector<64x32xbf16>, vector<64x32xf32> -> vector<64x32xf32>
    %c0_24 = arith.constant 0 : index
    %c0_25 = arith.constant 0 : index
    %c0_26 = arith.constant 0 : index
    %36 = vector.load %arg10[%c0_24, %c0_25, %c0_26] : memref<1x1x32xf32, #tpu.memory_space<vmem>>, vector<1x1x32xf32>
    %37 = vector.shape_cast %36 : vector<1x1x32xf32> to vector<1x32xf32>
    %38 = vector.broadcast %37 : vector<1x32xf32> to vector<64x32xf32>
    %39 = arith.addf %35, %38 : vector<64x32xf32>
    %c0_27 = arith.constant 0 : index
    %c0_28 = arith.constant 0 : index
    %c0_29 = arith.constant 0 : index
    %40 = vector.load %arg8[%c0_27, %c0_28, %c0_29] : memref<1x64x64xbf16, #tpu.memory_space<vmem>>, vector<1x64x64xbf16>
    %41 = vector.shape_cast %40 : vector<1x64x64xbf16> to vector<64x64xbf16>
    %cst_30 = arith.constant dense<0.000000e+00> : vector<64x64xf32>
    %42 = tpu.matmul %25, %41, %cst_30 {dimension_numbers = #tpu.dot_dimension_numbers<[1], [0], [0], [1], [0, 0, 1, 1], [], []>} : vector<64x64xbf16>, vector<64x64xbf16>, vector<64x64xf32> -> vector<64x64xf32>
    %c0_31 = arith.constant 0 : index
    %c0_32 = arith.constant 0 : index
    %c0_33 = arith.constant 0 : index
    %43 = vector.load %arg11[%c0_31, %c0_32, %c0_33] : memref<1x1x64xf32, #tpu.memory_space<vmem>>, vector<1x1x64xf32>
    %44 = vector.shape_cast %43 : vector<1x1x64xf32> to vector<1x64xf32>
    %45 = vector.broadcast %44 : vector<1x64xf32> to vector<64x64xf32>
    %46 = arith.addf %42, %45 : vector<64x64xf32>
    %cst_34 = arith.constant 0.176776692 : f32
    %47 = vector.broadcast %cst_34 : f32 to vector<64x32xf32>
    %48 = arith.mulf %32, %47 : vector<64x32xf32>
    %49 = arith.truncf %48 : vector<64x32xf32> to vector<64x32xbf16>
    %50 = arith.truncf %39 : vector<64x32xf32> to vector<64x32xbf16>
    %cst_35 = arith.constant dense<0.000000e+00> : vector<64x64xf32>
    %51 = tpu.matmul %49, %50, %cst_35 {dimension_numbers = #tpu.dot_dimension_numbers<[1], [1], [0], [0], [0, 0, 1, 0], [], []>} : vector<64x32xbf16>, vector<64x32xbf16>, vector<64x64xf32> -> vector<64x64xf32>
    %cst_36 = arith.constant dense<0xFF800000> : vector<64xf32>
    %52 = vector.multi_reduction <maximumf>, %51, %cst_36 [1] : vector<64x64xf32> to vector<64xf32>
    %53 = vector.shape_cast %52 : vector<64xf32> to vector<64x1xf32>
    %54 = vector.broadcast %53 : vector<64x1xf32> to vector<64x64xf32>
    %55 = arith.subf %51, %54 : vector<64x64xf32>
    %56 = math.exp %55 : vector<64x64xf32>
    %cst_37 = arith.constant dense<0.000000e+00> : vector<64xf32>
    %57 = vector.multi_reduction <add>, %56, %cst_37 [1] : vector<64x64xf32> to vector<64xf32>
    %58 = vector.shape_cast %57 : vector<64xf32> to vector<64x1xf32>
    %59 = tpu.reciprocal %58 {approx = true} : vector<64x1xf32> -> vector<64x1xf32>
    %60 = vector.broadcast %59 : vector<64x1xf32> to vector<64x64xf32>
    %61 = arith.mulf %56, %60 : vector<64x64xf32>
    %62 = arith.truncf %61 : vector<64x64xf32> to vector<64x64xbf16>
    %63 = arith.truncf %46 : vector<64x64xf32> to vector<64x64xbf16>
    %cst_38 = arith.constant dense<0.000000e+00> : vector<64x64xf32>
    %64 = tpu.matmul %62, %63, %cst_38 {dimension_numbers = #tpu.dot_dimension_numbers<[1], [0], [0], [1], [0, 0, 1, 1], [], []>} : vector<64x64xbf16>, vector<64x64xbf16>, vector<64x64xf32> -> vector<64x64xf32>
    %65 = arith.truncf %46 : vector<64x64xf32> to vector<64x64xbf16>
    %c0_39 = arith.constant 0 : index
    %c0_40 = arith.constant 0 : index
    %66 = vector.load %arg13[%c0_39, %c0_40] : memref<9x64xf32, #tpu.memory_space<vmem>>, vector<9x64xf32>
    %cst_41 = arith.constant 0.000000e+00 : f32
    %67 = vector.broadcast %cst_41 : f32 to vector<64x64xf32>
    %c0_42 = arith.constant 0 : index
    %c0_43 = arith.constant 0 : index
    %c0_44 = arith.constant 0 : index
    %68 = vector.load %arg12[%c0_42, %c0_43, %c0_44] : memref<9x64x64xbf16, #tpu.memory_space<vmem>>, vector<1x64x64xbf16>
    %69 = vector.shape_cast %68 : vector<1x64x64xbf16> to vector<64x64xbf16>
    %cst_45 = arith.constant dense<0.000000e+00> : vector<64x64xf32>
    %70 = tpu.matmul %69, %65, %cst_45 {dimension_numbers = #tpu.dot_dimension_numbers<[1], [0], [0], [1], [0, 0, 1, 1], [], []>} : vector<64x64xbf16>, vector<64x64xbf16>, vector<64x64xf32> -> vector<64x64xf32>
    %71 = vector.extract_strided_slice %66 {offsets = [0, 0], sizes = [1, 64], strides = [1, 1]} : vector<9x64xf32> to vector<1x64xf32>
    %72 = vector.shape_cast %71 : vector<1x64xf32> to vector<64xf32>
    %73 = vector.shape_cast %72 : vector<64xf32> to vector<1x64xf32>
    %74 = vector.broadcast %73 : vector<1x64xf32> to vector<64x64xf32>
    %75 = arith.mulf %70, %74 : vector<64x64xf32>
    %76 = arith.addf %67, %75 : vector<64x64xf32>
    %c1 = arith.constant 1 : index
    %c0_46 = arith.constant 0 : index
    %c0_47 = arith.constant 0 : index
    %77 = vector.load %arg12[%c1, %c0_46, %c0_47] : memref<9x64x64xbf16, #tpu.memory_space<vmem>>, vector<1x64x64xbf16>
    %78 = vector.shape_cast %77 : vector<1x64x64xbf16> to vector<64x64xbf16>
    %cst_48 = arith.constant dense<0.000000e+00> : vector<64x64xf32>
    %79 = tpu.matmul %78, %65, %cst_48 {dimension_numbers = #tpu.dot_dimension_numbers<[1], [0], [0], [1], [0, 0, 1, 1], [], []>} : vector<64x64xbf16>, vector<64x64xbf16>, vector<64x64xf32> -> vector<64x64xf32>
    %80 = vector.extract_strided_slice %66 {offsets = [1, 0], sizes = [1, 64], strides = [1, 1]} : vector<9x64xf32> to vector<1x64xf32>
    %81 = vector.shape_cast %80 : vector<1x64xf32> to vector<64xf32>
    %82 = vector.shape_cast %81 : vector<64xf32> to vector<1x64xf32>
    %83 = vector.broadcast %82 : vector<1x64xf32> to vector<64x64xf32>
    %84 = arith.mulf %79, %83 : vector<64x64xf32>
    %85 = arith.addf %76, %84 : vector<64x64xf32>
    %c2 = arith.constant 2 : index
    %c0_49 = arith.constant 0 : index
    %c0_50 = arith.constant 0 : index
    %86 = vector.load %arg12[%c2, %c0_49, %c0_50] : memref<9x64x64xbf16, #tpu.memory_space<vmem>>, vector<1x64x64xbf16>
    %87 = vector.shape_cast %86 : vector<1x64x64xbf16> to vector<64x64xbf16>
    %cst_51 = arith.constant dense<0.000000e+00> : vector<64x64xf32>
    %88 = tpu.matmul %87, %65, %cst_51 {dimension_numbers = #tpu.dot_dimension_numbers<[1], [0], [0], [1], [0, 0, 1, 1], [], []>} : vector<64x64xbf16>, vector<64x64xbf16>, vector<64x64xf32> -> vector<64x64xf32>
    %89 = vector.extract_strided_slice %66 {offsets = [2, 0], sizes = [1, 64], strides = [1, 1]} : vector<9x64xf32> to vector<1x64xf32>
    %90 = vector.shape_cast %89 : vector<1x64xf32> to vector<64xf32>
    %91 = vector.shape_cast %90 : vector<64xf32> to vector<1x64xf32>
    %92 = vector.broadcast %91 : vector<1x64xf32> to vector<64x64xf32>
    %93 = arith.mulf %88, %92 : vector<64x64xf32>
    %94 = arith.addf %85, %93 : vector<64x64xf32>
    %c3 = arith.constant 3 : index
    %c0_52 = arith.constant 0 : index
    %c0_53 = arith.constant 0 : index
    %95 = vector.load %arg12[%c3, %c0_52, %c0_53] : memref<9x64x64xbf16, #tpu.memory_space<vmem>>, vector<1x64x64xbf16>
    %96 = vector.shape_cast %95 : vector<1x64x64xbf16> to vector<64x64xbf16>
    %cst_54 = arith.constant dense<0.000000e+00> : vector<64x64xf32>
    %97 = tpu.matmul %96, %65, %cst_54 {dimension_numbers = #tpu.dot_dimension_numbers<[1], [0], [0], [1], [0, 0, 1, 1], [], []>} : vector<64x64xbf16>, vector<64x64xbf16>, vector<64x64xf32> -> vector<64x64xf32>
    %98 = vector.extract_strided_slice %66 {offsets = [3, 0], sizes = [1, 64], strides = [1, 1]} : vector<9x64xf32> to vector<1x64xf32>
    %99 = vector.shape_cast %98 : vector<1x64xf32> to vector<64xf32>
    %100 = vector.shape_cast %99 : vector<64xf32> to vector<1x64xf32>
    %101 = vector.broadcast %100 : vector<1x64xf32> to vector<64x64xf32>
    %102 = arith.mulf %97, %101 : vector<64x64xf32>
    %103 = arith.addf %94, %102 : vector<64x64xf32>
    %c4 = arith.constant 4 : index
    %c0_55 = arith.constant 0 : index
    %c0_56 = arith.constant 0 : index
    %104 = vector.load %arg12[%c4, %c0_55, %c0_56] : memref<9x64x64xbf16, #tpu.memory_space<vmem>>, vector<1x64x64xbf16>
    %105 = vector.shape_cast %104 : vector<1x64x64xbf16> to vector<64x64xbf16>
    %cst_57 = arith.constant dense<0.000000e+00> : vector<64x64xf32>
    %106 = tpu.matmul %105, %65, %cst_57 {dimension_numbers = #tpu.dot_dimension_numbers<[1], [0], [0], [1], [0, 0, 1, 1], [], []>} : vector<64x64xbf16>, vector<64x64xbf16>, vector<64x64xf32> -> vector<64x64xf32>
    %107 = vector.extract_strided_slice %66 {offsets = [4, 0], sizes = [1, 64], strides = [1, 1]} : vector<9x64xf32> to vector<1x64xf32>
    %108 = vector.shape_cast %107 : vector<1x64xf32> to vector<64xf32>
    %109 = vector.shape_cast %108 : vector<64xf32> to vector<1x64xf32>
    %110 = vector.broadcast %109 : vector<1x64xf32> to vector<64x64xf32>
    %111 = arith.mulf %106, %110 : vector<64x64xf32>
    %112 = arith.addf %103, %111 : vector<64x64xf32>
    %c5 = arith.constant 5 : index
    %c0_58 = arith.constant 0 : index
    %c0_59 = arith.constant 0 : index
    %113 = vector.load %arg12[%c5, %c0_58, %c0_59] : memref<9x64x64xbf16, #tpu.memory_space<vmem>>, vector<1x64x64xbf16>
    %114 = vector.shape_cast %113 : vector<1x64x64xbf16> to vector<64x64xbf16>
    %cst_60 = arith.constant dense<0.000000e+00> : vector<64x64xf32>
    %115 = tpu.matmul %114, %65, %cst_60 {dimension_numbers = #tpu.dot_dimension_numbers<[1], [0], [0], [1], [0, 0, 1, 1], [], []>} : vector<64x64xbf16>, vector<64x64xbf16>, vector<64x64xf32> -> vector<64x64xf32>
    %116 = vector.extract_strided_slice %66 {offsets = [5, 0], sizes = [1, 64], strides = [1, 1]} : vector<9x64xf32> to vector<1x64xf32>
    %117 = vector.shape_cast %116 : vector<1x64xf32> to vector<64xf32>
    %118 = vector.shape_cast %117 : vector<64xf32> to vector<1x64xf32>
    %119 = vector.broadcast %118 : vector<1x64xf32> to vector<64x64xf32>
    %120 = arith.mulf %115, %119 : vector<64x64xf32>
    %121 = arith.addf %112, %120 : vector<64x64xf32>
    %c6 = arith.constant 6 : index
    %c0_61 = arith.constant 0 : index
    %c0_62 = arith.constant 0 : index
    %122 = vector.load %arg12[%c6, %c0_61, %c0_62] : memref<9x64x64xbf16, #tpu.memory_space<vmem>>, vector<1x64x64xbf16>
    %123 = vector.shape_cast %122 : vector<1x64x64xbf16> to vector<64x64xbf16>
    %cst_63 = arith.constant dense<0.000000e+00> : vector<64x64xf32>
    %124 = tpu.matmul %123, %65, %cst_63 {dimension_numbers = #tpu.dot_dimension_numbers<[1], [0], [0], [1], [0, 0, 1, 1], [], []>} : vector<64x64xbf16>, vector<64x64xbf16>, vector<64x64xf32> -> vector<64x64xf32>
    %125 = vector.extract_strided_slice %66 {offsets = [6, 0], sizes = [1, 64], strides = [1, 1]} : vector<9x64xf32> to vector<1x64xf32>
    %126 = vector.shape_cast %125 : vector<1x64xf32> to vector<64xf32>
    %127 = vector.shape_cast %126 : vector<64xf32> to vector<1x64xf32>
    %128 = vector.broadcast %127 : vector<1x64xf32> to vector<64x64xf32>
    %129 = arith.mulf %124, %128 : vector<64x64xf32>
    %130 = arith.addf %121, %129 : vector<64x64xf32>
    %c7 = arith.constant 7 : index
    %c0_64 = arith.constant 0 : index
    %c0_65 = arith.constant 0 : index
    %131 = vector.load %arg12[%c7, %c0_64, %c0_65] : memref<9x64x64xbf16, #tpu.memory_space<vmem>>, vector<1x64x64xbf16>
    %132 = vector.shape_cast %131 : vector<1x64x64xbf16> to vector<64x64xbf16>
    %cst_66 = arith.constant dense<0.000000e+00> : vector<64x64xf32>
    %133 = tpu.matmul %132, %65, %cst_66 {dimension_numbers = #tpu.dot_dimension_numbers<[1], [0], [0], [1], [0, 0, 1, 1], [], []>} : vector<64x64xbf16>, vector<64x64xbf16>, vector<64x64xf32> -> vector<64x64xf32>
    %134 = vector.extract_strided_slice %66 {offsets = [7, 0], sizes = [1, 64], strides = [1, 1]} : vector<9x64xf32> to vector<1x64xf32>
    %135 = vector.shape_cast %134 : vector<1x64xf32> to vector<64xf32>
    %136 = vector.shape_cast %135 : vector<64xf32> to vector<1x64xf32>
    %137 = vector.broadcast %136 : vector<1x64xf32> to vector<64x64xf32>
    %138 = arith.mulf %133, %137 : vector<64x64xf32>
    %139 = arith.addf %130, %138 : vector<64x64xf32>
    %c8 = arith.constant 8 : index
    %c0_67 = arith.constant 0 : index
    %c0_68 = arith.constant 0 : index
    %140 = vector.load %arg12[%c8, %c0_67, %c0_68] : memref<9x64x64xbf16, #tpu.memory_space<vmem>>, vector<1x64x64xbf16>
    %141 = vector.shape_cast %140 : vector<1x64x64xbf16> to vector<64x64xbf16>
    %cst_69 = arith.constant dense<0.000000e+00> : vector<64x64xf32>
    %142 = tpu.matmul %141, %65, %cst_69 {dimension_numbers = #tpu.dot_dimension_numbers<[1], [0], [0], [1], [0, 0, 1, 1], [], []>} : vector<64x64xbf16>, vector<64x64xbf16>, vector<64x64xf32> -> vector<64x64xf32>
    %143 = vector.extract_strided_slice %66 {offsets = [8, 0], sizes = [1, 64], strides = [1, 1]} : vector<9x64xf32> to vector<1x64xf32>
    %144 = vector.shape_cast %143 : vector<1x64xf32> to vector<64xf32>
    %145 = vector.shape_cast %144 : vector<64xf32> to vector<1x64xf32>
    %146 = vector.broadcast %145 : vector<1x64xf32> to vector<64x64xf32>
    %147 = arith.mulf %142, %146 : vector<64x64xf32>
    %148 = arith.addf %139, %147 : vector<64x64xf32>
    %c0_70 = arith.constant 0 : index
    %c0_71 = arith.constant 0 : index
    %149 = vector.load %arg14[%c0_70, %c0_71] : memref<1x64xf32, #tpu.memory_space<vmem>>, vector<1x64xf32>
    %150 = vector.broadcast %149 : vector<1x64xf32> to vector<64x64xf32>
    %151 = arith.addf %148, %150 : vector<64x64xf32>
    %152 = arith.addf %64, %151 : vector<64x64xf32>
    %153 = arith.truncf %152 : vector<64x64xf32> to vector<64x64xbf16>
    %c0_72 = arith.constant 0 : index
    %c0_73 = arith.constant 0 : index
    %154 = vector.load %arg15[%c0_72, %c0_73] : memref<64x64xbf16, #tpu.memory_space<vmem>>, vector<64x64xbf16>
    %cst_74 = arith.constant dense<0.000000e+00> : vector<64x64xf32>
    %155 = tpu.matmul %153, %154, %cst_74 {dimension_numbers = #tpu.dot_dimension_numbers<[1], [0], [0], [1], [0, 0, 1, 1], [], []>} : vector<64x64xbf16>, vector<64x64xbf16>, vector<64x64xf32> -> vector<64x64xf32>
    %c0_75 = arith.constant 0 : index
    %c0_76 = arith.constant 0 : index
    %156 = vector.load %arg16[%c0_75, %c0_76] : memref<1x64xf32, #tpu.memory_space<vmem>>, vector<1x64xf32>
    %157 = vector.broadcast %156 : vector<1x64xf32> to vector<64x64xf32>
    %158 = arith.addf %155, %157 : vector<64x64xf32>
    %159 = arith.addf %24, %158 : vector<64x64xf32>
    %160 = arith.truncf %159 : vector<64x64xf32> to vector<64x64xbf16>
    %c0_77 = arith.constant 0 : index
    %c0_78 = arith.constant 0 : index
    %161 = vector.load %arg17[%c0_77, %c0_78] : memref<64x128xbf16, #tpu.memory_space<vmem>>, vector<64x128xbf16>
    %cst_79 = arith.constant dense<0.000000e+00> : vector<64x128xf32>
    %162 = tpu.matmul %160, %161, %cst_79 {dimension_numbers = #tpu.dot_dimension_numbers<[1], [0], [0], [1], [0, 0, 1, 1], [], []>} : vector<64x64xbf16>, vector<64x128xbf16>, vector<64x128xf32> -> vector<64x128xf32>
    %c0_80 = arith.constant 0 : index
    %c0_81 = arith.constant 0 : index
    %163 = vector.load %arg18[%c0_80, %c0_81] : memref<1x128xf32, #tpu.memory_space<vmem>>, vector<1x128xf32>
    %164 = vector.broadcast %163 : vector<1x128xf32> to vector<64x128xf32>
    %165 = arith.addf %162, %164 : vector<64x128xf32>
    %166 = arith.negf %165 : vector<64x128xf32>
    %167 = math.exp %166 : vector<64x128xf32>
    %cst_82 = arith.constant 1.000000e+00 : f32
    %168 = vector.broadcast %cst_82 : f32 to vector<64x128xf32>
    %169 = arith.addf %168, %167 : vector<64x128xf32>
    %170 = arith.divf %168, %169 : vector<64x128xf32>
    %171 = arith.mulf %165, %170 : vector<64x128xf32>
    %172 = arith.truncf %171 : vector<64x128xf32> to vector<64x128xbf16>
    %c0_83 = arith.constant 0 : index
    %c0_84 = arith.constant 0 : index
    %173 = vector.load %arg19[%c0_83, %c0_84] : memref<128x64xbf16, #tpu.memory_space<vmem>>, vector<128x64xbf16>
    %cst_85 = arith.constant dense<0.000000e+00> : vector<64x64xf32>
    %174 = tpu.matmul %172, %173, %cst_85 {dimension_numbers = #tpu.dot_dimension_numbers<[1], [0], [0], [1], [0, 0, 1, 1], [], []>} : vector<64x128xbf16>, vector<128x64xbf16>, vector<64x64xf32> -> vector<64x64xf32>
    %c0_86 = arith.constant 0 : index
    %c0_87 = arith.constant 0 : index
    %175 = vector.load %arg20[%c0_86, %c0_87] : memref<1x64xf32, #tpu.memory_space<vmem>>, vector<1x64xf32>
    %176 = vector.broadcast %175 : vector<1x64xf32> to vector<64x64xf32>
    %177 = arith.addf %174, %176 : vector<64x64xf32>
    %178 = arith.addf %159, %177 : vector<64x64xf32>
    %179 = arith.truncf %13 : vector<64x64xf32> to vector<64x64xbf16>
    %c0_88 = arith.constant 0 : index
    %c0_89 = arith.constant 0 : index
    %180 = vector.load %arg21[%c0_88, %c0_89] : memref<64x128xbf16, #tpu.memory_space<vmem>>, vector<64x128xbf16>
    %cst_90 = arith.constant dense<0.000000e+00> : vector<64x128xf32>
    %181 = tpu.matmul %179, %180, %cst_90 {dimension_numbers = #tpu.dot_dimension_numbers<[1], [0], [0], [1], [0, 0, 1, 1], [], []>} : vector<64x64xbf16>, vector<64x128xbf16>, vector<64x128xf32> -> vector<64x128xf32>
    %182 = arith.truncf %178 : vector<64x64xf32> to vector<64x64xbf16>
    %c0_91 = arith.constant 0 : index
    %c0_92 = arith.constant 0 : index
    %183 = vector.load %arg22[%c0_91, %c0_92] : memref<64x128xbf16, #tpu.memory_space<vmem>>, vector<64x128xbf16>
    %cst_93 = arith.constant dense<0.000000e+00> : vector<64x128xf32>
    %184 = tpu.matmul %182, %183, %cst_93 {dimension_numbers = #tpu.dot_dimension_numbers<[1], [0], [0], [1], [0, 0, 1, 1], [], []>} : vector<64x64xbf16>, vector<64x128xbf16>, vector<64x128xf32> -> vector<64x128xf32>
    %185 = arith.addf %181, %184 : vector<64x128xf32>
    %c0_94 = arith.constant 0 : index
    %c0_95 = arith.constant 0 : index
    %186 = vector.load %arg23[%c0_94, %c0_95] : memref<1x128xf32, #tpu.memory_space<vmem>>, vector<1x128xf32>
    %187 = vector.broadcast %186 : vector<1x128xf32> to vector<64x128xf32>
    %188 = arith.addf %185, %187 : vector<64x128xf32>
    %189 = arith.negf %188 : vector<64x128xf32>
    %190 = math.exp %189 : vector<64x128xf32>
    %cst_96 = arith.constant 1.000000e+00 : f32
    %191 = vector.broadcast %cst_96 : f32 to vector<64x128xf32>
    %192 = arith.addf %191, %190 : vector<64x128xf32>
    %193 = arith.divf %191, %192 : vector<64x128xf32>
    %194 = arith.mulf %188, %193 : vector<64x128xf32>
    %c0_97 = arith.constant 0 : index
    %c0_98 = arith.constant 0 : index
    %c0_99 = arith.constant 0 : index
    %195 = vector.load %arg24[%c0_97, %c0_98, %c0_99] : memref<1x64x128xf32, #tpu.memory_space<vmem>>, vector<1x64x128xf32>
    %196 = vector.shape_cast %195 : vector<1x64x128xf32> to vector<64x128xf32>
    %197 = vector.shape_cast %194 : vector<64x128xf32> to vector<1x64x128xf32>
    tpu.vector_store %arg24[%c0_97, %c0_98, %c0_99], %197 {strides = array<i32>} : memref<1x64x128xf32, #tpu.memory_space<vmem>>, vector<1x64x128xf32>,
    return
  }
  func.func @transform_0(%arg0: i32) -> (i32, i32, i32) {
    %c0_i32 = arith.constant 0 : i32
    %c0_i32_0 = arith.constant 0 : i32
    %c0_i32_1 = arith.constant 0 : i32
    return %arg0, %c0_i32, %c0_i32_0 : i32, i32, i32
  }
  func.func @transform_1(%arg0: i32) -> (i32, i32) {
    %c0_i32 = arith.constant 0 : i32
    %c0_i32_0 = arith.constant 0 : i32
    %c0_i32_1 = arith.constant 0 : i32
    return %c0_i32, %c0_i32_0 : i32, i32
  }
  func.func @transform_2(%arg0: i32) -> (i32, i32) {
    %c0_i32 = arith.constant 0 : i32
    %c0_i32_0 = arith.constant 0 : i32
    %c0_i32_1 = arith.constant 0 : i32
    return %c0_i32, %c0_i32_0 : i32, i32
  }
  func.func @transform_3(%arg0: i32) -> (i32, i32) {
    %c0_i32 = arith.constant 0 : i32
    %c0_i32_0 = arith.constant 0 : i32
    %c0_i32_1 = arith.constant 0 : i32
    return %c0_i32, %c0_i32_0 : i32, i32
  }
  func.func @transform_4(%arg0: i32) -> (i32, i32) {
    %c0_i32 = arith.constant 0 : i32
    %c0_i32_0 = arith.constant 0 : i32
    %c0_i32_1 = arith.constant 0 : i32
    return %c0_i32, %c0_i32_0 : i32, i32
  }
  func.func @transform_5(%arg0: i32) -> (i32, i32, i32) {
    %c0_i32 = arith.constant 0 : i32
    %c0_i32_0 = arith.constant 0 : i32
    %c0_i32_1 = arith.constant 0 : i32
    %c0_i32_2 = arith.constant 0 : i32
    return %c0_i32, %c0_i32_0, %c0_i32_1 : i32, i32, i32
  }
  func.func @transform_6(%arg0: i32) -> (i32, i32, i32) {
    %c0_i32 = arith.constant 0 : i32
    %c0_i32_0 = arith.constant 0 : i32
    %c0_i32_1 = arith.constant 0 : i32
    %c0_i32_2 = arith.constant 0 : i32
    return %c0_i32, %c0_i32_0, %c0_i32_1 : i32, i32, i32
  }
  func.func @transform_7(%arg0: i32) -> (i32, i32, i32) {
    %c0_i32 = arith.constant 0 : i32
    %c0_i32_0 = arith.constant 0 : i32
    %c0_i32_1 = arith.constant 0 : i32
    %c0_i32_2 = arith.constant 0 : i32
    return %c0_i32, %c0_i32_0, %c0_i32_1 : i32, i32, i32
  }
  func.func @transform_8(%arg0: i32) -> (i32, i32, i32) {
    %c0_i32 = arith.constant 0 : i32
    %c0_i32_0 = arith.constant 0 : i32
    %c0_i32_1 = arith.constant 0 : i32
    %c0_i32_2 = arith.constant 0 : i32
    return %c0_i32, %c0_i32_0, %c0_i32_1 : i32, i32, i32
  }
  func.func @transform_9(%arg0: i32) -> (i32, i32, i32) {
    %c0_i32 = arith.constant 0 : i32
    %c0_i32_0 = arith.constant 0 : i32
    %c0_i32_1 = arith.constant 0 : i32
    %c0_i32_2 = arith.constant 0 : i32
    return %c0_i32, %c0_i32_0, %c0_i32_1 : i32, i32, i32
  }
  func.func @transform_10(%arg0: i32) -> (i32, i32, i32) {
    %c0_i32 = arith.constant 0 : i32
    %c0_i32_0 = arith.constant 0 : i32
    %c0_i32_1 = arith.constant 0 : i32
    %c0_i32_2 = arith.constant 0 : i32
    return %c0_i32, %c0_i32_0, %c0_i32_1 : i32, i32, i32
  }
  func.func @transform_11(%arg0: i32) -> (i32, i32, i32) {
    %c0_i32 = arith.constant 0 : i32
    %c0_i32_0 = arith.constant 0 : i32
    %c0_i32_1 = arith.constant 0 : i32
    %c0_i32_2 = arith.constant 0 : i32
    return %c0_i32, %c0_i32_0, %c0_i32_1 : i32, i32, i32
  }
  func.func @transform_12(%arg0: i32) -> (i32, i32) {
    %c0_i32 = arith.constant 0 : i32
    %c0_i32_0 = arith.constant 0 : i32
    %c0_i32_1 = arith.constant 0 : i32
    return %c0_i32, %c0_i32_0 : i32, i32
  }
  func.func @transform_13(%arg0: i32) -> (i32, i32) {
    %c0_i32 = arith.constant 0 : i32
    %c0_i32_0 = arith.constant 0 : i32
    %c0_i32_1 = arith.constant 0 : i32
    return %c0_i32, %c0_i32_0 : i32, i32
  }
  func.func @transform_14(%arg0: i32) -> (i32, i32) {
    %c0_i32 = arith.constant 0 : i32
    %c0_i32_0 = arith.constant 0 : i32
    %c0_i32_1 = arith.constant 0 : i32
    return %c0_i32, %c0_i32_0 : i32, i32
  }
  func.func @transform_15(%arg0: i32) -> (i32, i32) {
    %c0_i32 = arith.constant 0 : i32
    %c0_i32_0 = arith.constant 0 : i32
    %c0_i32_1 = arith.constant 0 : i32
    return %c0_i32, %c0_i32_0 : i32, i32
  }
  func.func @transform_16(%arg0: i32) -> (i32, i32) {
    %c0_i32 = arith.constant 0 : i32
    %c0_i32_0 = arith.constant 0 : i32
    %c0_i32_1 = arith.constant 0 : i32
    return %c0_i32, %c0_i32_0 : i32, i32
  }
  func.func @transform_17(%arg0: i32) -> (i32, i32) {
    %c0_i32 = arith.constant 0 : i32
    %c0_i32_0 = arith.constant 0 : i32
    %c0_i32_1 = arith.constant 0 : i32
    return %c0_i32, %c0_i32_0 : i32, i32
  }
  func.func @transform_18(%arg0: i32) -> (i32, i32) {
    %c0_i32 = arith.constant 0 : i32
    %c0_i32_0 = arith.constant 0 : i32
    %c0_i32_1 = arith.constant 0 : i32
    return %c0_i32, %c0_i32_0 : i32, i32
  }
  func.func @transform_19(%arg0: i32) -> (i32, i32) {
    %c0_i32 = arith.constant 0 : i32
    %c0_i32_0 = arith.constant 0 : i32
    %c0_i32_1 = arith.constant 0 : i32
    return %c0_i32, %c0_i32_0 : i32, i32
  }
  func.func @transform_20(%arg0: i32) -> (i32, i32) {
    %c0_i32 = arith.constant 0 : i32
    %c0_i32_0 = arith.constant 0 : i32
    %c0_i32_1 = arith.constant 0 : i32
    return %c0_i32, %c0_i32_0 : i32, i32
  }
  func.func @transform_21(%arg0: i32) -> (i32, i32) {
    %c0_i32 = arith.constant 0 : i32
    %c0_i32_0 = arith.constant 0 : i32
    %c0_i32_1 = arith.constant 0 : i32
    return %c0_i32, %c0_i32_0 : i32, i32
  }
  func.func @transform_22(%arg0: i32) -> (i32, i32) {
    %c0_i32 = arith.constant 0 : i32
    %c0_i32_0 = arith.constant 0 : i32
    %c0_i32_1 = arith.constant 0 : i32
    return %c0_i32, %c0_i32_0 : i32, i32
  }
  func.func @transform_23(%arg0: i32) -> (i32, i32, i32) {
    %c0_i32 = arith.constant 0 : i32
    %c0_i32_0 = arith.constant 0 : i32
    %c0_i32_1 = arith.constant 0 : i32
    return %arg0, %c0_i32, %c0_i32_0 : i32, i32, i32
  }
}

</mosaic_0001>

<bundles_post_ra>
// kernel: psa_forward.1
= control target key start
LH: loop header
LB: loop body
LE: loop exit
PB: predicated region body
PF: predicated region fallthrough
CT: control target
= control target key end

     0   :  { %s7624_s0 = inlined_call_operand.hbm [shape: f32[2,64,128], index: 0, kind: input, shape index: {}]   ;;  %s7625_s1 = inlined_call_operand.hbm [shape: bf16[128,64], index: 1, kind: input, shape index: {}]   ;;  %s7626_s2 = inlined_call_operand.hbm [shape: bf16[128,64], index: 2, kind: input, shape index: {}]   ;;  %s7627_s3 = inlined_call_operand.hbm [shape: f32[1,64], index: 3, kind: input, shape index: {}]   ;;  %s7628_s4 = inlined_call_operand.hbm [shape: f32[1,64], index: 4, kind: input, shape index: {}]   ;;  %s7629_s5 = inlined_call_operand.hbm [shape: bf16[1,64,32], index: 5, kind: input, shape index: {}]   ;;  %s7630_s6 = inlined_call_operand.hbm [shape: bf16[1,64,32], index: 6, kind: input, shape index: {}]   ;;  %s7631_s7 = inlined_call_operand.hbm [shape: bf16[1,64,64], index: 7, kind: input, shape index: {}]   ;;  %s7632_s8 = inlined_call_operand.hbm [shape: f32[1,1,32], index: 8, kind: input, shape index: {}]   ;;  %s7633_s9 = inlined_call_operand.hbm [shape: f32[1,1,32], index: 9, kind: input, shape index: {}]   ;;  %s7634_s10 = inlined_call_operand.hbm [shape: f32[1,1,64], index: 10, kind: input, shape index: {}]   ;;  %s7635_s11 = inlined_call_operand.hbm [shape: bf16[9,64,64], index: 11, kind: input, shape index: {}]   ;;  %s7636_s12 = inlined_call_operand.hbm [shape: f32[9,64], index: 12, kind: input, shape index: {}]   ;;  %s7637_s13 = inlined_call_operand.hbm [shape: f32[1,64], index: 13, kind: input, shape index: {}]   ;;  %s7638_s14 = inlined_call_operand.hbm [shape: bf16[64,64], index: 14, kind: input, shape index: {}]   ;;  %s7639_s15 = inlined_call_operand.hbm [shape: f32[1,64], index: 15, kind: input, shape index: {}]   ;;  %s7640_s16 = inlined_call_operand.hbm [shape: bf16[64,128], index: 16, kind: input, shape index: {}]   ;;  %s7641_s17 = inlined_call_operand.hbm [shape: f32[1,128], index: 17, kind: input, shape index: {}]   ;;  %s7642_s18 = inlined_call_operand.hbm [shape: bf16[128,64], index: 18, kind: input, shape index: {}]   ;;  %s7643_s19 = inlined_call_operand.hbm [shape: f32[1,64], index: 19, kind: input, shape index: {}]   ;;  %s7644_s20 = inlined_call_operand.hbm [shape: bf16[64,128], index: 20, kind: input, shape index: {}]   ;;  %s7645_s21 = inlined_call_operand.hbm [shape: bf16[64,128], index: 21, kind: input, shape index: {}]   ;;  %s7646_s22 = inlined_call_operand.hbm [shape: f32[1,128], index: 22, kind: input, shape index: {}]   ;;  %s7647_s23 = inlined_call_operand.hbm [shape: f32[2,64,128], index: 23, kind: output, shape index: {}]  }
   0x1   :  { %7697 = sst [smem:[#allocation71_spill]] %s7624_s0 }
   0x2   :  { %7698 = sst [smem:[#allocation72_spill]] %s7625_s1 }
   0x3   :  { %7699 = sst [smem:[#allocation73_spill]] %s7626_s2 }
   0x4   :  { %7700 = sst [smem:[#allocation74_spill]] %s7627_s3 }
   0x5   :  { %7701 = sst [smem:[#allocation75_spill]] %s7628_s4 }
   0x6   :  { %7702 = sst [smem:[#allocation76_spill]] %s7629_s5 }
   0x7   :  { %7703 = sst [smem:[#allocation77_spill]] %s7630_s6 }
   0x8   :  { %7704 = sst [smem:[#allocation78_spill]] %s7631_s7 }
   0x9   :  { %7705 = sst [smem:[#allocation79_spill]] %s7632_s8 }
   0xa   :  { %7706 = sst [smem:[#allocation80_spill]] %s7633_s9 }
   0xb   :  { %7707 = sst [smem:[#allocation81_spill]] %s7634_s10 }
   0xc   :  { %7708 = sst [smem:[#allocation82_spill]] %s7640_s16 }
   0xd   :  { %7709 = sst [smem:[#allocation83_spill]] %s7642_s18 }
   0xe   :  { %7710 = sst [smem:[#allocation84_spill]] %s7644_s20 }
   0xf   :  { %7711 = sst [smem:[#allocation85_spill]] %s7646_s22 }
  0x10   :  { %7712 = sst [smem:[#allocation86_spill]] %s7647_s23 }
  0x11   :  { %28 = vsyncpa [#allocation3], 0 }
  0x12   :  { %30 = vsyncpa [#allocation3 + $0x1], 0 }
  0x13   :  { %31 = vsyncpa [#allocation6], 0 }
  0x14   :  { %32 = vsyncpa [#allocation9], 0 }
  0x15   :  { %33 = vsyncpa [#allocation12], 0 }
  0x16   :  { %34 = vsyncpa [#allocation15], 0 }
  0x17   :  { %35 = vsyncpa [#allocation18], 0 }
  0x18   :  { %36 = vsyncpa [#allocation21], 0 }
  0x19   :  { %37 = vsyncpa [#allocation24], 0 }
  0x1a   :  { %38 = vsyncpa [#allocation27], 0 }
  0x1b   :  { %39 = vsyncpa [#allocation30], 0 }
  0x1c   :  { %40 = vsyncpa [#allocation33], 0 }
  0x1d   :  { %41 = vsyncpa [#allocation36], 0 }
  0x1e   :  { %42 = vsyncpa [#allocation4], 0 }
  0x1f   :  { %44 = vsyncpa [#allocation4 + $0x1], 0  ;;  %s6488_s4 = smov 0   ;;  %s6490_s30 = smov 0  }
  0x20   :  { %s6492_s24 = smov 0   ;;  %s6494_s25 = smov 0  }
  0x21 LB: > { %7713 = sst [smem:[#allocation52_spill]] %s6324_s4  ;;  %s6338_s5 = smov [#allocation5]   ;;  %s6336_s25 = sphi %s6494_s25, %s6989_s25   ;;  %s6332_s24 = sphi %s6492_s24, %s7821_s24   ;;  %s6328_s30 = sphi %s6490_s30, %s7820_s30   ;;  %s6324_s4 = sphi %s6488_s4, %s7819_s4  }
  0x22   : > { %7714 = sst [smem:[#allocation53_spill]] %s6328_s30  ;;  %s581_s1 = sshll.u32 %s6338_s5, 4  ;;  %s6514_s1 = int_to_ptr.vmem [resolvable:$true] %s581_s1 }
  0x23   : > { %7715 = sst [smem:[#allocation54_spill]] %s6332_s24  ;;  %s6509_s26 = sadd.s32 4294967295, %s6336_s25  }
  0x24   : > { %7716 = sst [smem:[#allocation55_spill]] %s6336_s25  ;;  %p4237_p0 = scmp.ge.s32.totalorder %s6336_s25, 1 }
  0x25   : > { %7717 = sst [smem:[#allocation56_spill]] %s6509_s26  ;;  %p7671_p1 = scmp.eq.s32.totalorder %s6509_s26, 0 }
  0x26   : > { %p569_p2 = scmp.lt.s32.totalorder %s6336_s25, 3  ;;  %s6339_s6 = smov [#allocation8]  }
  0x27   : > { %s608_s27 = sshll.u32 %s6339_s6, 4  ;;  %s6340_s28 = smov [#allocation11]   ;;  %s6529_s27 = int_to_ptr.vmem [resolvable:$true] %s608_s27 }
  0x28   : > { %p6516_p3 = pnand %p4237_p0, %p569_p2  ;;  %s629_s29 = sshll.u32 %s6340_s28, 4  ;;  %s6531_s29 = int_to_ptr.vmem [resolvable:$true] %s629_s29 }
  0x29   : > { %s7721_s5 = sld [smem:[#allocation72_spill]] }
  0x2a   : > { %s7718_s2 = scalar_select %p6516_p3, 1, 0 }
  0x2b   : > { %p5151_p5 = pneg %p6516_p3 }
  0x2c   : > { %7719 = sst [smem:[#allocation57_spill]] %s7718_s2 }
  0x2d   : > { %p6525_p6 = pnand %p5151_p5, %p7671_p1 }
  0x2f   : > { %s5580_s23 = scalar_lea.hbm %s7721_s5, 1024  ;;  %p6541_p8 = pneg %p6525_p6 }
  0x30   : > { %p5581_p7 = scmp.ne.s32.totalorder %s7721_s5, %s5580_s23  ;;  %p5587_p11 = scmp.lt.u32.totalorder %s5580_s23, %s7721_s5 }
  0x32   : > { %p5583_p9 = pnand %p6541_p8, %p5581_p7 }
  0x34   : > { %p5584_p10 = pneg %p5583_p9 }
  0x36   : > { %p5589_p12 = pnand %p5587_p11, %p5584_p10 }
  0x38   : > { %5592 = shalt.err (!%p5589_p12)
}
  0x39   : > { %s5593_s4 = scalar_lea.vmem %s6514_s1, 1024  ;;  %p5601_p5 = scmp.lt.s32.totalorder %s6514_s1, %s6514_s1 }
  0x3a   : > { %p5594_p13 = scmp.ne.s32.totalorder %s6514_s1, %s5593_s4  ;;  %p5602_p4 = scmp.lt.s32.totalorder %s5593_s4, %s5593_s4 }
  0x3c   : > { %p5596_p0 = pnand %p5594_p13, %p6541_p8  ;;  %p5603_p7 = por %p5602_p4, %p5601_p5 }
  0x3e   : > { %p5597_p2 = pneg %p5596_p0 }
  0x40   : > { %p5604_p9 = pnand %p5603_p7, %p5597_p2 }
  0x42   : > { %5607 = shalt.err (!%p5604_p9)
}
  0x43   : > { %s7673_s2 = smov 64   ;;  %s7675_s23 = smov 4  }
  0x44   : > { %5154 = dma.hbm_to_vmem [thread:$0]  (!%p6525_p6), %s7721_s5, 1024, %s6514_s1, [#allocation6], %s7673_s2, %s7673_s2, %s7675_s23  }
  0x45   : > { %s7723_s30 = sld [smem:[#allocation74_spill]] }
  0x4b   : > { %s7724_s22 = smov %s7723_s30  ;;  %s5608_s4 = scalar_lea.hbm %s7723_s30, 16 }
  0x4c   : > { %p5609_p4 = scmp.ne.s32.totalorder %s7724_s22, %s5608_s4  ;;  %p5615_p12 = scmp.lt.u32.totalorder %s5608_s4, %s7724_s22 }
  0x4e   : > { %p5611_p10 = pnand %p5609_p4, %p6541_p8 }
  0x50   : > { %p5612_p11 = pneg %p5611_p10 }
  0x52   : > { %p5617_p13 = pnand %p5615_p12, %p5612_p11 }
  0x54   : > { %5620 = shalt.err (!%p5617_p13)
}
  0x55   : > { %s5621_s1 = scalar_lea.vmem %s6529_s27, 16  ;;  %s5628_s30 = scalar_lea.vmem %s6529_s27, 32 }
  0x56   : > { %p5622_p0 = scmp.ne.s32.totalorder %s6529_s27, %s5621_s1  ;;  %p5629_p7 = scmp.lt.s32.totalorder %s6529_s27, %s6529_s27 }
  0x57   : > { %p5630_p9 = scmp.lt.s32.totalorder %s5628_s30, %s5621_s1 }
  0x58   : > { %p5624_p2 = pnand %p5622_p0, %p6541_p8 }
  0x59   : > { %p5631_p4 = por %p5630_p9, %p5629_p7 }
  0x5a   : > { %p5625_p5 = pneg %p5624_p2 }
  0x5c   : > { %p5632_p10 = pnand %p5631_p4, %p5625_p5 }
  0x5e   : > { %5635 = shalt.err (!%p5632_p10)
}
  0x5f   : > { %5160 = dma.hbm_to_vmem [thread:$0]  (!%p6525_p6), %s7724_s22, 16, %s6529_s27, [#allocation9]  }
  0x60   : > { %s7725_s26 = sld [smem:[#allocation76_spill]] }
  0x66   : > { %s5636_s3 = scalar_lea.hbm %s7725_s26, 512 }
  0x67   : > { %p5637_p11 = scmp.ne.s32.totalorder %s7725_s26, %s5636_s3  ;;  %p5643_p0 = scmp.lt.u32.totalorder %s5636_s3, %s7725_s26 }
  0x69   : > { %p5639_p12 = pnand %p5637_p11, %p6541_p8 }
  0x6b   : > { %p5640_p13 = pneg %p5639_p12 }
  0x6d   : > { %p5645_p2 = pnand %p5643_p0, %p5640_p13 }
  0x6f   : > { %5648 = shalt.err (!%p5645_p2)
}
  0x70   : > { %s5649_s27 = scalar_lea.vmem %s6531_s29, 512  ;;  %p5657_p4 = scmp.lt.s32.totalorder %s6531_s29, %s6531_s29 }
  0x71   : > { %p5650_p5 = scmp.ne.s32.totalorder %s6531_s29, %s5649_s27  ;;  %p5658_p10 = scmp.lt.s32.totalorder %s5649_s27, %s5649_s27 }
  0x73   : > { %p5652_p7 = pnand %p5650_p5, %p6541_p8  ;;  %p5659_p11 = por %p5658_p10, %p5657_p4 }
  0x75   : > { %p5653_p9 = pneg %p5652_p7 }
  0x77   : > { %p5660_p12 = pnand %p5659_p11, %p5653_p9 }
  0x79   : > { %5663 = shalt.err (!%p5660_p12)
}
  0x7a   : > { %5166 = dma.hbm_to_vmem [thread:$0]  (!%p6525_p6), %s7725_s26, 512, %s6531_s29, [#allocation12], %s7673_s2, %s7673_s2, %s7675_s23  }
  0x7b   : > { %s6343_s20 = smov [#allocation14]   ;;  %s6344_s25 = smov [#allocation17]  }
  0x7c   : > { %s655_s24 = sshll.u32 %s6343_s20, 4  ;;  %s680_s3 = sshll.u32 %s6344_s25, 4  ;;  %s656_s24 = int_to_ptr.vmem [resolvable:$true] %s655_s24  ;;  %s681_s3 = int_to_ptr.vmem [resolvable:$true] %s680_s3 }
  0x7d   : > { %s7726_s4 = sld [smem:[#allocation78_spill]] }
  0x83   : > { %s7727_s1 = smov %s7726_s4  ;;  %s5664_s27 = scalar_lea.hbm %s7726_s4, 512 }
  0x84   : > { %p5665_p13 = scmp.ne.s32.totalorder %s7727_s1, %s5664_s27  ;;  %p5671_p5 = scmp.lt.u32.totalorder %s5664_s27, %s7727_s1 }
  0x86   : > { %p5667_p0 = pnand %p5665_p13, %p6541_p8 }
  0x88   : > { %p5668_p2 = pneg %p5667_p0 }
  0x8a   : > { %p5673_p7 = pnand %p5671_p5, %p5668_p2 }
  0x8c   : > { %5676 = shalt.err (!%p5673_p7)
}
  0x8d   : > { %s5677_s29 = scalar_lea.vmem %s656_s24, 512  ;;  %p5685_p11 = scmp.lt.s32.totalorder %s656_s24, %s656_s24 }
  0x8e   : > { %p5678_p9 = scmp.ne.s32.totalorder %s656_s24, %s5677_s29  ;;  %p5686_p12 = scmp.lt.s32.totalorder %s5677_s29, %s5677_s29 }
  0x90   : > { %p5680_p4 = pnand %p5678_p9, %p6541_p8  ;;  %p5687_p1 = por %p5686_p12, %p5685_p11 }
  0x92   : > { %p5681_p10 = pneg %p5680_p4 }
  0x94   : > { %p5688_p3 = pnand %p5687_p1, %p5681_p10 }
  0x96   : > { %5691 = shalt.err (!%p5688_p3)
}
  0x97   : > { %5172 = dma.hbm_to_vmem [thread:$0]  (!%p6525_p6), %s7727_s1, 512, %s656_s24, [#allocation15], %s7673_s2, %s7673_s2, %s7675_s23  }
  0x98   : > { %s7728_s9 = sld [smem:[#allocation80_spill]] }
  0x9e   : > { %s5692_s20 = scalar_lea.hbm %s7728_s9, 16 }
  0x9f   : > { %p5693_p1 = scmp.ne.s32.totalorder %s7728_s9, %s5692_s20  ;;  %p5699_p0 = scmp.lt.u32.totalorder %s5692_s20, %s7728_s9 }
  0xa1   : > { %p5695_p3 = pnand %p5693_p1, %p6541_p8 }
  0xa3   : > { %p5696_p13 = pneg %p5695_p3 }
  0xa5   : > { %p5701_p2 = pnand %p5699_p0, %p5696_p13 }
  0xa7   : > { %5704 = shalt.err (!%p5701_p2)
}
  0xa8   : > { %s5705_s27 = scalar_lea.vmem %s681_s3, 16  ;;  %s5712_s24 = scalar_lea.vmem %s681_s3, 32 }
  0xa9   : > { %p5706_p5 = scmp.ne.s32.totalorder %s681_s3, %s5705_s27  ;;  %p5713_p4 = scmp.lt.s32.totalorder %s681_s3, %s681_s3 }
  0xaa   : > { %p5714_p10 = scmp.lt.s32.totalorder %s5712_s24, %s5705_s27 }
  0xab   : > { %p5708_p7 = pnand %p5706_p5, %p6541_p8 }
  0xac   : > { %p5715_p11 = por %p5714_p10, %p5713_p4 }
  0xad   : > { %p5709_p9 = pneg %p5708_p7 }
  0xaf   : > { %p5716_p12 = pnand %p5715_p11, %p5709_p9 }
  0xb1   : > { %5719 = shalt.err (!%p5716_p12)
}
  0xb2   : > { %5178 = dma.hbm_to_vmem [thread:$0]  (!%p6525_p6), %s7728_s9, 16, %s681_s3, [#allocation18]  }
  0xb3   : > { %s6345_s16 = smov [#allocation20]   ;;  %s6346_s5 = smov [#allocation23]  }
  0xb4   : > { %s701_s22 = sshll.u32 %s6345_s16, 4  ;;  %s728_s18 = sshll.u32 %s6346_s5, 4  ;;  %s702_s22 = int_to_ptr.vmem [resolvable:$true] %s701_s22  ;;  %s729_s18 = int_to_ptr.vmem [resolvable:$true] %s728_s18 }
  0xb5   : > { %s5720_s0 = scalar_lea.hbm %s7635_s11, 4608 }
  0xb6   : > { %p5721_p1 = scmp.ne.s32.totalorder %s7635_s11, %s5720_s0  ;;  %p5727_p0 = scmp.lt.u32.totalorder %s5720_s0, %s7635_s11 }
  0xb8   : > { %p5723_p3 = pnand %p5721_p1, %p6541_p8 }
  0xba   : > { %p5724_p13 = pneg %p5723_p3 }
  0xbc   : > { %p5729_p2 = pnand %p5727_p0, %p5724_p13 }
  0xbe   : > { %5732 = shalt.err (!%p5729_p2)
}
  0xbf   : > { %s5733_s3 = scalar_lea.vmem %s702_s22, 4608  ;;  %p5741_p4 = scmp.lt.s32.totalorder %s702_s22, %s702_s22 }
  0xc0   : > { %p5734_p5 = scmp.ne.s32.totalorder %s702_s22, %s5733_s3  ;;  %p5742_p10 = scmp.lt.s32.totalorder %s5733_s3, %s5733_s3 }
  0xc2   : > { %p5736_p7 = pnand %p5734_p5, %p6541_p8  ;;  %p5743_p11 = por %p5742_p10, %p5741_p4 }
  0xc4   : > { %p5737_p9 = pneg %p5736_p7 }
  0xc6   : > { %p5744_p12 = pnand %p5743_p11, %p5737_p9 }
  0xc8   : > { %5747 = shalt.err (!%p5744_p12)
}
  0xc9   : > { %5184 = dma.hbm_to_vmem [thread:$0]  (!%p6525_p6), %s7635_s11, 4608, %s702_s22, [#allocation21], %s7673_s2, %s7673_s2, %s7675_s23  }
  0xca   : > { %s5748_s20 = scalar_lea.hbm %s7637_s13, 16 }
  0xcb   : > { %p5749_p1 = scmp.ne.s32.totalorder %s7637_s13, %s5748_s20  ;;  %p5755_p0 = scmp.lt.u32.totalorder %s5748_s20, %s7637_s13 }
  0xcd   : > { %p5751_p3 = pnand %p5749_p1, %p6541_p8 }
  0xcf   : > { %p5752_p13 = pneg %p5751_p3 }
  0xd1   : > { %p5757_p2 = pnand %p5755_p0, %p5752_p13 }
  0xd3   : > { %5760 = shalt.err (!%p5757_p2)
}
  0xd4   : > { %s5761_s27 = scalar_lea.vmem %s729_s18, 16  ;;  %s5768_s22 = scalar_lea.vmem %s729_s18, 32 }
  0xd5   : > { %p5762_p5 = scmp.ne.s32.totalorder %s729_s18, %s5761_s27  ;;  %p5769_p4 = scmp.lt.s32.totalorder %s729_s18, %s729_s18 }
  0xd6   : > { %p5770_p10 = scmp.lt.s32.totalorder %s5768_s22, %s5761_s27 }
  0xd7   : > { %p5764_p7 = pnand %p5762_p5, %p6541_p8 }
  0xd8   : > { %p5771_p11 = por %p5770_p10, %p5769_p4 }
  0xd9   : > { %p5765_p9 = pneg %p5764_p7 }
  0xdb   : > { %p5772_p12 = pnand %p5771_p11, %p5765_p9 }
  0xdd   : > { %5775 = shalt.err (!%p5772_p12)
}
  0xde   : > { %5190 = dma.hbm_to_vmem [thread:$0]  (!%p6525_p6), %s7637_s13, 16, %s729_s18, [#allocation24]  }
  0xdf   : > { %s6347_s30 = smov [#allocation26]   ;;  %s6348_s16 = smov [#allocation29]  }
  0xe0   : > { %s752_s29 = sshll.u32 %s6347_s30, 4  ;;  %s776_s5 = sshll.u32 %s6348_s16, 4  ;;  %s753_s29 = int_to_ptr.vmem [resolvable:$true] %s752_s29  ;;  %s777_s5 = int_to_ptr.vmem [resolvable:$true] %s776_s5 }
  0xe1   : > { %s5776_s0 = scalar_lea.hbm %s7639_s15, 16 }
  0xe2   : > { %p5777_p1 = scmp.ne.s32.totalorder %s7639_s15, %s5776_s0  ;;  %p5783_p0 = scmp.lt.u32.totalorder %s5776_s0, %s7639_s15 }
  0xe4   : > { %p5779_p3 = pnand %p5777_p1, %p6541_p8 }
  0xe6   : > { %p5780_p13 = pneg %p5779_p3 }
  0xe8   : > { %p5785_p2 = pnand %p5783_p0, %p5780_p13 }
  0xea   : > { %5788 = shalt.err (!%p5785_p2)
}
  0xeb   : > { %s5789_s18 = scalar_lea.vmem %s753_s29, 16  ;;  %s5796_s24 = scalar_lea.vmem %s753_s29, 32 }
  0xec   : > { %p5790_p5 = scmp.ne.s32.totalorder %s753_s29, %s5789_s18  ;;  %p5797_p4 = scmp.lt.s32.totalorder %s753_s29, %s753_s29 }
  0xed   : > { %p5798_p10 = scmp.lt.s32.totalorder %s5796_s24, %s5789_s18 }
  0xee   : > { %p5792_p7 = pnand %p5790_p5, %p6541_p8 }
  0xef   : > { %p5799_p11 = por %p5798_p10, %p5797_p4 }
  0xf0   : > { %p5793_p9 = pneg %p5792_p7 }
  0xf2   : > { %p5800_p12 = pnand %p5799_p11, %p5793_p9 }
  0xf4   : > { %5803 = shalt.err (!%p5800_p12)
}
  0xf5   : > { %5196 = dma.hbm_to_vmem [thread:$0]  (!%p6525_p6), %s7639_s15, 16, %s753_s29, [#allocation27]  }
  0xf6   : > { %s5804_s25 = scalar_lea.hbm %s7641_s17, 16 }
  0xf7   : > { %p5805_p1 = scmp.ne.s32.totalorder %s7641_s17, %s5804_s25  ;;  %p5811_p0 = scmp.lt.u32.totalorder %s5804_s25, %s7641_s17 }
  0xf9   : > { %p5807_p3 = pnand %p5805_p1, %p6541_p8 }
  0xfb   : > { %p5808_p13 = pneg %p5807_p3 }
  0xfd   : > { %p5813_p2 = pnand %p5811_p0, %p5808_p13 }
  0xff   : > { %5816 = shalt.err (!%p5813_p2)
}
 0x100   : > { %s5817_s22 = scalar_lea.vmem %s777_s5, 16  ;;  %s5824_s29 = scalar_lea.vmem %s777_s5, 32 }
 0x101   : > { %p5818_p5 = scmp.ne.s32.totalorder %s777_s5, %s5817_s22  ;;  %p5825_p4 = scmp.lt.s32.totalorder %s777_s5, %s777_s5 }
 0x102   : > { %p5826_p10 = scmp.lt.s32.totalorder %s5824_s29, %s5817_s22 }
 0x103   : > { %p5820_p7 = pnand %p5818_p5, %p6541_p8 }
 0x104   : > { %p5827_p11 = por %p5826_p10, %p5825_p4 }
 0x105   : > { %p5821_p9 = pneg %p5820_p7 }
 0x107   : > { %p5828_p12 = pnand %p5827_p11, %p5821_p9 }
 0x109   : > { %5831 = shalt.err (!%p5828_p12)
}
 0x10a   : > { %5202 = dma.hbm_to_vmem [thread:$0]  (!%p6525_p6), %s7641_s17, 16, %s777_s5, [#allocation30]  }
 0x10b   : > { %s6349_s3 = smov [#allocation32]   ;;  %s6350_s16 = smov [#allocation35]  }
 0x10c   : > { %s800_s30 = sshll.u32 %s6349_s3, 4  ;;  %s823_s20 = sshll.u32 %s6350_s16, 4  ;;  %s801_s30 = int_to_ptr.vmem [resolvable:$true] %s800_s30  ;;  %s824_s20 = int_to_ptr.vmem [resolvable:$true] %s823_s20 }
 0x10d   : > { %s5832_s28 = scalar_lea.hbm %s7643_s19, 16 }
 0x10e   : > { %p5833_p1 = scmp.ne.s32.totalorder %s7643_s19, %s5832_s28  ;;  %p5839_p0 = scmp.lt.u32.totalorder %s5832_s28, %s7643_s19 }
 0x110   : > { %p5835_p3 = pnand %p5833_p1, %p6541_p8 }
 0x112   : > { %p5836_p13 = pneg %p5835_p3 }
 0x114   : > { %p5841_p2 = pnand %p5839_p0, %p5836_p13 }
 0x116   : > { %5844 = shalt.err (!%p5841_p2)
}
 0x117   : > { %s5845_s5 = scalar_lea.vmem %s801_s30, 16  ;;  %s5852_s18 = scalar_lea.vmem %s801_s30, 32 }
 0x118   : > { %p5846_p5 = scmp.ne.s32.totalorder %s801_s30, %s5845_s5  ;;  %p5853_p4 = scmp.lt.s32.totalorder %s801_s30, %s801_s30 }
 0x119   : > { %p5854_p10 = scmp.lt.s32.totalorder %s5852_s18, %s5845_s5 }
 0x11a   : > { %p5848_p7 = pnand %p5846_p5, %p6541_p8 }
 0x11b   : > { %p5855_p11 = por %p5854_p10, %p5853_p4 }
 0x11c   : > { %p5849_p9 = pneg %p5848_p7 }
 0x11e   : > { %p5856_p12 = pnand %p5855_p11, %p5849_p9 }
 0x120   : > { %5859 = shalt.err (!%p5856_p12)
}
 0x121   : > { %5208 = dma.hbm_to_vmem [thread:$0]  (!%p6525_p6), %s7643_s19, 16, %s801_s30, [#allocation33]  }
 0x122   : > { %s5860_s0 = scalar_lea.hbm %s7645_s21, 512 }
 0x123   : > { %p5861_p1 = scmp.ne.s32.totalorder %s7645_s21, %s5860_s0  ;;  %p5867_p0 = scmp.lt.u32.totalorder %s5860_s0, %s7645_s21 }
 0x125   : > { %p5863_p3 = pnand %p5861_p1, %p6541_p8 }
 0x127   : > { %p5864_p13 = pneg %p5863_p3 }
 0x129   : > { %p5869_p2 = pnand %p5867_p0, %p5864_p13 }
 0x12b   : > { %5872 = shalt.err (!%p5869_p2)
}
 0x12c   : > { %s5873_s29 = scalar_lea.vmem %s824_s20, 512  ;;  %p5881_p4 = scmp.lt.s32.totalorder %s824_s20, %s824_s20 }
 0x12d   : > { %p5874_p5 = scmp.ne.s32.totalorder %s824_s20, %s5873_s29  ;;  %p5882_p10 = scmp.lt.s32.totalorder %s5873_s29, %s5873_s29 }
 0x12f   : > { %p5876_p7 = pnand %p5874_p5, %p6541_p8  ;;  %p5883_p11 = por %p5882_p10, %p5881_p4 }
 0x131   : > { %p5877_p9 = pneg %p5876_p7 }
 0x133   : > { %p5884_p12 = pnand %p5883_p11, %p5877_p9 }
 0x135   : > { %5887 = shalt.err (!%p5884_p12)
}
 0x136   : > { %5214 = dma.hbm_to_vmem [thread:$0]  (!%p6525_p6), %s7645_s21, 512, %s824_s20, [#allocation36], %s7673_s2, %s7673_s2, %s7675_s23  }
 0x137   : > { %s6351_s18 = smov [#allocation7]   ;;  %s6352_s3 = smov [#allocation10]  }
 0x138   : > { %s594_s24 = sshll.u32 %s6351_s18, 4  ;;  %s619_s16 = sshll.u32 %s6352_s3, 4  ;;  %s595_s24 = int_to_ptr.vmem [resolvable:$true] %s594_s24  ;;  %s620_s16 = int_to_ptr.vmem [resolvable:$true] %s619_s16 }
 0x139   : > { %s7729_s28 = sld [smem:[#allocation73_spill]] }
 0x13f   : > { %s5888_s4 = scalar_lea.hbm %s7729_s28, 1024 }
 0x140   : > { %p5889_p1 = scmp.ne.s32.totalorder %s7729_s28, %s5888_s4  ;;  %p5895_p0 = scmp.lt.u32.totalorder %s5888_s4, %s7729_s28 }
 0x142   : > { %p5891_p3 = pnand %p5889_p1, %p6541_p8 }
 0x144   : > { %p5892_p13 = pneg %p5891_p3 }
 0x146   : > { %p5897_p2 = pnand %p5895_p0, %p5892_p13 }
 0x148   : > { %5900 = shalt.err (!%p5897_p2)
}
 0x149   : > { %s5901_s20 = scalar_lea.vmem %s595_s24, 1024  ;;  %p5909_p4 = scmp.lt.s32.totalorder %s595_s24, %s595_s24 }
 0x14a   : > { %p5902_p5 = scmp.ne.s32.totalorder %s595_s24, %s5901_s20  ;;  %p5910_p10 = scmp.lt.s32.totalorder %s5901_s20, %s5901_s20 }
 0x14c   : > { %p5904_p7 = pnand %p5902_p5, %p6541_p8  ;;  %p5911_p11 = por %p5910_p10, %p5909_p4 }
 0x14e   : > { %p5905_p9 = pneg %p5904_p7 }
 0x150   : > { %p5912_p12 = pnand %p5911_p11, %p5905_p9 }
 0x152   : > { %5915 = shalt.err (!%p5912_p12)
}
 0x153   : > { %5157 = dma.hbm_to_vmem [thread:$0]  (!%p6525_p6), %s7729_s28, 1024, %s595_s24, [#allocation6], %s7673_s2, %s7673_s2, %s7675_s23  }
 0x154   : > { %s7730_s0 = sld [smem:[#allocation75_spill]] }
 0x15a   : > { %s5916_s4 = scalar_lea.hbm %s7730_s0, 16 }
 0x15b   : > { %p5917_p1 = scmp.ne.s32.totalorder %s7730_s0, %s5916_s4  ;;  %p5923_p0 = scmp.lt.u32.totalorder %s5916_s4, %s7730_s0 }
 0x15d   : > { %p5919_p3 = pnand %p5917_p1, %p6541_p8 }
 0x15f   : > { %p5920_p13 = pneg %p5919_p3 }
 0x161   : > { %p5925_p2 = pnand %p5923_p0, %p5920_p13 }
 0x163   : > { %5928 = shalt.err (!%p5925_p2)
}
 0x164   : > { %s5929_s20 = scalar_lea.vmem %s620_s16, 16  ;;  %s5936_s24 = scalar_lea.vmem %s620_s16, 32 }
 0x165   : > { %p5930_p5 = scmp.ne.s32.totalorder %s620_s16, %s5929_s20  ;;  %p5937_p4 = scmp.lt.s32.totalorder %s620_s16, %s620_s16 }
 0x166   : > { %p5938_p10 = scmp.lt.s32.totalorder %s5936_s24, %s5929_s20 }
 0x167   : > { %p5932_p7 = pnand %p5930_p5, %p6541_p8 }
 0x168   : > { %p5939_p11 = por %p5938_p10, %p5937_p4 }
 0x169   : > { %p5933_p9 = pneg %p5932_p7 }
 0x16b   : > { %p5940_p12 = pnand %p5939_p11, %p5933_p9 }
 0x16d   : > { %5943 = shalt.err (!%p5940_p12)
}
 0x16e   : > { %5163 = dma.hbm_to_vmem [thread:$0]  (!%p6525_p6), %s7730_s0, 16, %s620_s16, [#allocation9]  }
 0x16f   : > { %s6353_s3 = smov [#allocation13]   ;;  %s6354_s4 = smov [#allocation16]  }
 0x170   : > { %s642_s25 = sshll.u32 %s6353_s3, 4  ;;  %s669_s27 = sshll.u32 %s6354_s4, 4  ;;  %s643_s25 = int_to_ptr.vmem [resolvable:$true] %s642_s25  ;;  %s670_s27 = int_to_ptr.vmem [resolvable:$true] %s669_s27 }
 0x171   : > { %s7731_s30 = sld [smem:[#allocation77_spill]] }
 0x177   : > { %s7732_s2 = smov %s7731_s30  ;;  %s5944_s23 = scalar_lea.hbm %s7731_s30, 512 }
 0x178   : > { %p5945_p1 = scmp.ne.s32.totalorder %s7732_s2, %s5944_s23  ;;  %p5951_p0 = scmp.lt.u32.totalorder %s5944_s23, %s7732_s2 }
 0x17a   : > { %p5947_p3 = pnand %p5945_p1, %p6541_p8 }
 0x17c   : > { %p5948_p13 = pneg %p5947_p3 }
 0x17e   : > { %p5953_p2 = pnand %p5951_p0, %p5948_p13 }
 0x180   : > { %5956 = shalt.err (!%p5953_p2)
}
 0x181   : > { %s5957_s16 = scalar_lea.vmem %s643_s25, 512  ;;  %p5965_p4 = scmp.lt.s32.totalorder %s643_s25, %s643_s25 }
 0x182   : > { %p5958_p5 = scmp.ne.s32.totalorder %s643_s25, %s5957_s16  ;;  %p5966_p10 = scmp.lt.s32.totalorder %s5957_s16, %s5957_s16 }
 0x184   : > { %p5960_p7 = pnand %p5958_p5, %p6541_p8  ;;  %p5967_p11 = por %p5966_p10, %p5965_p4 }
 0x186   : > { %p5961_p9 = pneg %p5960_p7 }
 0x188   : > { %p5968_p12 = pnand %p5967_p11, %p5961_p9 }
 0x18a   : > { %5971 = shalt.err (!%p5968_p12)
}
 0x18b   : > { %s7733_s18 = smov 4   ;;  %s7734_s3 = smov 64  }
 0x18c   : > { %5169 = dma.hbm_to_vmem [thread:$0]  (!%p6525_p6), %s7732_s2, 512, %s643_s25, [#allocation12], %s7734_s3, %s7734_s3, %s7733_s18  }
 0x18d   : > { %s7735_s8 = sld [smem:[#allocation79_spill]] }
 0x193   : > { %s5972_s29 = scalar_lea.hbm %s7735_s8, 16 }
 0x194   : > { %p5973_p1 = scmp.ne.s32.totalorder %s7735_s8, %s5972_s29  ;;  %p5979_p0 = scmp.lt.u32.totalorder %s5972_s29, %s7735_s8 }
 0x196   : > { %p5975_p3 = pnand %p5973_p1, %p6541_p8 }
 0x198   : > { %p5976_p13 = pneg %p5975_p3 }
 0x19a   : > { %p5981_p2 = pnand %p5979_p0, %p5976_p13 }
 0x19c   : > { %5984 = shalt.err (!%p5981_p2)
}
 0x19d   : > { %s5985_s16 = scalar_lea.vmem %s670_s27, 16  ;;  %s5992_s25 = scalar_lea.vmem %s670_s27, 32 }
 0x19e   : > { %p5986_p5 = scmp.ne.s32.totalorder %s670_s27, %s5985_s16  ;;  %p5993_p4 = scmp.lt.s32.totalorder %s670_s27, %s670_s27 }
 0x19f   : > { %p5994_p10 = scmp.lt.s32.totalorder %s5992_s25, %s5985_s16 }
 0x1a0   : > { %p5988_p7 = pnand %p5986_p5, %p6541_p8 }
 0x1a1   : > { %p5995_p11 = por %p5994_p10, %p5993_p4 }
 0x1a2   : > { %p5989_p9 = pneg %p5988_p7 }
 0x1a4   : > { %p5996_p12 = pnand %p5995_p11, %p5989_p9 }
 0x1a6   : > { %5999 = shalt.err (!%p5996_p12)
}
 0x1a7   : > { %5175 = dma.hbm_to_vmem [thread:$0]  (!%p6525_p6), %s7735_s8, 16, %s670_s27, [#allocation15]  }
 0x1a8   : > { %s6355_s4 = smov [#allocation19]   ;;  %s6356_s29 = smov [#allocation22]  }
 0x1a9   : > { %s691_s22 = sshll.u32 %s6355_s4, 4  ;;  %s714_s30 = sshll.u32 %s6356_s29, 4  ;;  %s692_s22 = int_to_ptr.vmem [resolvable:$true] %s691_s22  ;;  %s715_s30 = int_to_ptr.vmem [resolvable:$true] %s714_s30 }
 0x1aa   : > { %s7736_s10 = sld [smem:[#allocation81_spill]] }
 0x1b0   : > { %s6000_s5 = scalar_lea.hbm %s7736_s10, 16 }
 0x1b1   : > { %p6001_p1 = scmp.ne.s32.totalorder %s7736_s10, %s6000_s5  ;;  %p6007_p0 = scmp.lt.u32.totalorder %s6000_s5, %s7736_s10 }
 0x1b3   : > { %p6003_p3 = pnand %p6001_p1, %p6541_p8 }
 0x1b5   : > { %p6004_p13 = pneg %p6003_p3 }
 0x1b7   : > { %p6009_p2 = pnand %p6007_p0, %p6004_p13 }
 0x1b9   : > { %6012 = shalt.err (!%p6009_p2)
}
 0x1ba   : > { %s6013_s27 = scalar_lea.vmem %s692_s22, 16  ;;  %s6020_s23 = scalar_lea.vmem %s692_s22, 32 }
 0x1bb   : > { %p6014_p5 = scmp.ne.s32.totalorder %s692_s22, %s6013_s27  ;;  %p6021_p4 = scmp.lt.s32.totalorder %s692_s22, %s692_s22 }
 0x1bc   : > { %p6022_p10 = scmp.lt.s32.totalorder %s6020_s23, %s6013_s27 }
 0x1bd   : > { %p6016_p7 = pnand %p6014_p5, %p6541_p8 }
 0x1be   : > { %p6023_p11 = por %p6022_p10, %p6021_p4 }
 0x1bf   : > { %p6017_p9 = pneg %p6016_p7 }
 0x1c1   : > { %p6024_p12 = pnand %p6023_p11, %p6017_p9 }
 0x1c3   : > { %6027 = shalt.err (!%p6024_p12)
}
 0x1c4   : > { %5181 = dma.hbm_to_vmem [thread:$0]  (!%p6525_p6), %s7736_s10, 16, %s692_s22, [#allocation18]  }
 0x1c5   : > { %s6028_s24 = scalar_lea.hbm %s7636_s12, 256 }
 0x1c6   : > { %p6029_p1 = scmp.ne.s32.totalorder %s7636_s12, %s6028_s24  ;;  %p6035_p0 = scmp.lt.u32.totalorder %s6028_s24, %s7636_s12 }
 0x1c8   : > { %p6031_p3 = pnand %p6029_p1, %p6541_p8 }
 0x1ca   : > { %p6032_p13 = pneg %p6031_p3 }
 0x1cc   : > { %p6037_p2 = pnand %p6035_p0, %p6032_p13 }
 0x1ce   : > { %6040 = shalt.err (!%p6037_p2)
}
 0x1cf   : > { %s6041_s27 = scalar_lea.vmem %s715_s30, 256  ;;  %p6049_p4 = scmp.lt.s32.totalorder %s715_s30, %s715_s30 }
 0x1d0   : > { %p6042_p5 = scmp.ne.s32.totalorder %s715_s30, %s6041_s27  ;;  %p6050_p10 = scmp.lt.s32.totalorder %s6041_s27, %s6041_s27 }
 0x1d2   : > { %p6044_p7 = pnand %p6042_p5, %p6541_p8  ;;  %p6051_p11 = por %p6050_p10, %p6049_p4 }
 0x1d4   : > { %p6045_p9 = pneg %p6044_p7 }
 0x1d6   : > { %p6052_p12 = pnand %p6051_p11, %p6045_p9 }
 0x1d8   : > { %6055 = shalt.err (!%p6052_p12)
}
 0x1d9   : > { %s7680_s22 = smov 128   ;;  %s7681_s23 = smov 8  }
 0x1da   : > { %5187 = dma.hbm_to_vmem [thread:$0]  (!%p6525_p6), %s7636_s12, 256, %s715_s30, [#allocation21], %s7680_s22, %s7680_s22, %s7681_s23  }
 0x1db   : > { %s6359_s0 = smov [#allocation25]   ;;  %s6360_s24 = smov [#allocation28]  }
 0x1dc   : > { %s738_s20 = sshll.u32 %s6359_s0, 4  ;;  %s762_s5 = sshll.u32 %s6360_s24, 4  ;;  %s739_s20 = int_to_ptr.vmem [resolvable:$true] %s738_s20  ;;  %s763_s5 = int_to_ptr.vmem [resolvable:$true] %s762_s5 }
 0x1dd   : > { %s6056_s1 = scalar_lea.hbm %s7638_s14, 512 }
 0x1de   : > { %p6057_p1 = scmp.ne.s32.totalorder %s7638_s14, %s6056_s1  ;;  %p6063_p0 = scmp.lt.u32.totalorder %s6056_s1, %s7638_s14 }
 0x1e0   : > { %p6059_p3 = pnand %p6057_p1, %p6541_p8 }
 0x1e2   : > { %p6060_p13 = pneg %p6059_p3 }
 0x1e4   : > { %p6065_p2 = pnand %p6063_p0, %p6060_p13 }
 0x1e6   : > { %6068 = shalt.err (!%p6065_p2)
}
 0x1e7   : > { %s6069_s30 = scalar_lea.vmem %s739_s20, 512  ;;  %p6077_p4 = scmp.lt.s32.totalorder %s739_s20, %s739_s20 }
 0x1e8   : > { %p6070_p5 = scmp.ne.s32.totalorder %s739_s20, %s6069_s30  ;;  %p6078_p10 = scmp.lt.s32.totalorder %s6069_s30, %s6069_s30 }
 0x1ea   : > { %p6072_p7 = pnand %p6070_p5, %p6541_p8  ;;  %p6079_p11 = por %p6078_p10, %p6077_p4 }
 0x1ec   : > { %p6073_p9 = pneg %p6072_p7 }
 0x1ee   : > { %p6080_p12 = pnand %p6079_p11, %p6073_p9 }
 0x1f0   : > { %6083 = shalt.err (!%p6080_p12)
}
 0x1f1   : > { %5193 = dma.hbm_to_vmem [thread:$0]  (!%p6525_p6), %s7638_s14, 512, %s739_s20, [#allocation24], %s7734_s3, %s7734_s3, %s7733_s18  }
 0x1f2   : > { %s7737_s29 = sld [smem:[#allocation82_spill]] }
 0x1f8   : > { %s6084_s0 = scalar_lea.hbm %s7737_s29, 512 }
 0x1f9   : > { %p6085_p1 = scmp.ne.s32.totalorder %s7737_s29, %s6084_s0  ;;  %p6091_p0 = scmp.lt.u32.totalorder %s6084_s0, %s7737_s29 }
 0x1fb   : > { %p6087_p3 = pnand %p6085_p1, %p6541_p8 }
 0x1fd   : > { %p6088_p13 = pneg %p6087_p3 }
 0x1ff   : > { %p6093_p2 = pnand %p6091_p0, %p6088_p13 }
 0x201   : > { %6096 = shalt.err (!%p6093_p2)
}
 0x202   : > { %s6097_s27 = scalar_lea.vmem %s763_s5, 512  ;;  %p6105_p4 = scmp.lt.s32.totalorder %s763_s5, %s763_s5 }
 0x203   : > { %p6098_p5 = scmp.ne.s32.totalorder %s763_s5, %s6097_s27  ;;  %p6106_p10 = scmp.lt.s32.totalorder %s6097_s27, %s6097_s27 }
 0x205   : > { %p6100_p7 = pnand %p6098_p5, %p6541_p8  ;;  %p6107_p11 = por %p6106_p10, %p6105_p4 }
 0x207   : > { %p6101_p9 = pneg %p6100_p7 }
 0x209   : > { %p6108_p12 = pnand %p6107_p11, %p6101_p9 }
 0x20b   : > { %6111 = shalt.err (!%p6108_p12)
}
 0x20c   : > { %5199 = dma.hbm_to_vmem [thread:$0]  (!%p6525_p6), %s7737_s29, 512, %s763_s5, [#allocation27], %s7734_s3, %s7734_s3, %s7733_s18  }
 0x20d   : > { %s6361_s8 = smov [#allocation31]   ;;  %s6362_s2 = smov [#allocation34]  }
 0x20e   : > { %s786_s9 = sshll.u32 %s6361_s8, 4  ;;  %s810_s4 = sshll.u32 %s6362_s2, 4  ;;  %s787_s9 = int_to_ptr.vmem [resolvable:$true] %s786_s9  ;;  %s811_s4 = int_to_ptr.vmem [resolvable:$true] %s810_s4 }
 0x20f   : > { %s7738_s16 = sld [smem:[#allocation83_spill]] }
 0x215   : > { %s6112_s25 = scalar_lea.hbm %s7738_s16, 1024 }
 0x216   : > { %p6113_p1 = scmp.ne.s32.totalorder %s7738_s16, %s6112_s25  ;;  %p6119_p0 = scmp.lt.u32.totalorder %s6112_s25, %s7738_s16 }
 0x218   : > { %p6115_p3 = pnand %p6113_p1, %p6541_p8 }
 0x21a   : > { %p6116_p13 = pneg %p6115_p3 }
 0x21c   : > { %p6121_p2 = pnand %p6119_p0, %p6116_p13 }
 0x21e   : > { %6124 = shalt.err (!%p6121_p2)
}
 0x21f   : > { %s6125_s5 = scalar_lea.vmem %s787_s9, 1024  ;;  %p6133_p4 = scmp.lt.s32.totalorder %s787_s9, %s787_s9 }
 0x220   : > { %p6126_p5 = scmp.ne.s32.totalorder %s787_s9, %s6125_s5  ;;  %p6134_p10 = scmp.lt.s32.totalorder %s6125_s5, %s6125_s5 }
 0x222   : > { %p6128_p7 = pnand %p6126_p5, %p6541_p8  ;;  %p6135_p11 = por %p6134_p10, %p6133_p4 }
 0x224   : > { %p6129_p9 = pneg %p6128_p7 }
 0x226   : > { %p6136_p12 = pnand %p6135_p11, %p6129_p9 }
 0x228   : > { %6139 = shalt.err (!%p6136_p12)
}
 0x229   : > { %5205 = dma.hbm_to_vmem [thread:$0]  (!%p6525_p6), %s7738_s16, 1024, %s787_s9, [#allocation30], %s7734_s3, %s7734_s3, %s7733_s18  }
 0x22a   : > { %s7739_s0 = sld [smem:[#allocation84_spill]] }
 0x230   : > { %s6140_s24 = scalar_lea.hbm %s7739_s0, 512 }
 0x231   : > { %p6141_p1 = scmp.ne.s32.totalorder %s7739_s0, %s6140_s24  ;;  %p6147_p0 = scmp.lt.u32.totalorder %s6140_s24, %s7739_s0 }
 0x233   : > { %p6143_p3 = pnand %p6141_p1, %p6541_p8 }
 0x235   : > { %p6144_p13 = pneg %p6143_p3 }
 0x237   : > { %p6149_p2 = pnand %p6147_p0, %p6144_p13 }
 0x239   : > { %6152 = shalt.err (!%p6149_p2)
}
 0x23a   : > { %s6153_s5 = scalar_lea.vmem %s811_s4, 512  ;;  %p6161_p4 = scmp.lt.s32.totalorder %s811_s4, %s811_s4 }
 0x23b   : > { %p6154_p5 = scmp.ne.s32.totalorder %s811_s4, %s6153_s5  ;;  %p6162_p10 = scmp.lt.s32.totalorder %s6153_s5, %s6153_s5 }
 0x23d   : > { %p6156_p7 = pnand %p6154_p5, %p6541_p8  ;;  %p6163_p11 = por %p6162_p10, %p6161_p4 }
 0x23f   : > { %p6157_p9 = pneg %p6156_p7 }
 0x241   : > { %p6164_p12 = pnand %p6163_p11, %p6157_p9 }
 0x243   : > { %6167 = shalt.err (!%p6164_p12)
}
 0x244   : > { %5211 = dma.hbm_to_vmem [thread:$0]  (!%p6525_p6), %s7739_s0, 512, %s811_s4, [#allocation33], %s7734_s3, %s7734_s3, %s7733_s18  }
 0x245   : > { %s6363_s30 = smov [#allocation37]   ;;  %s7740_s25 = sld [smem:[#allocation85_spill]] }
 0x246   : > { %s837_s8 = sshll.u32 %s6363_s30, 4  ;;  %s838_s8 = int_to_ptr.vmem [resolvable:$true] %s837_s8 }
 0x24b   : > { %s7741_s1 = smov %s7740_s25  ;;  %s6168_s27 = scalar_lea.hbm %s7740_s25, 16 }
 0x24c   : > { %p6169_p1 = scmp.ne.s32.totalorder %s7741_s1, %s6168_s27  ;;  %p6175_p0 = scmp.lt.u32.totalorder %s6168_s27, %s7741_s1 }
 0x24e   : > { %p6171_p3 = pnand %p6169_p1, %p6541_p8 }
 0x250   : > { %p6172_p13 = pneg %p6171_p3 }
 0x252   : > { %p6177_p2 = pnand %p6175_p0, %p6172_p13 }
 0x254   : > { %6180 = shalt.err (!%p6177_p2)
}
 0x255   : > { %s6181_s18 = scalar_lea.vmem %s838_s8, 16  ;;  %s6188_s3 = scalar_lea.vmem %s838_s8, 32 }
 0x256   : > { %p6182_p5 = scmp.ne.s32.totalorder %s838_s8, %s6181_s18  ;;  %p6189_p4 = scmp.lt.s32.totalorder %s838_s8, %s838_s8 }
 0x257   : > { %p6190_p10 = scmp.lt.s32.totalorder %s6188_s3, %s6181_s18 }
 0x258   : > { %p6184_p7 = pnand %p6182_p5, %p6541_p8 }
 0x259   : > { %p6191_p11 = por %p6190_p10, %p6189_p4 }
 0x25a   : > { %p6185_p9 = pneg %p6184_p7 }
 0x25c   : > { %p6192_p12 = pnand %p6191_p11, %p6185_p9 }
 0x25e   : > { %6195 = shalt.err (!%p6192_p12)
}
 0x25f   : > { %s7742_s10 = sld [smem:[#allocation55_spill]]  ;;  %s7743_s23 = sld [smem:[#allocation54_spill]] }
 0x260   : > { %s7744_s22 = sld [smem:[#allocation53_spill]]  ;;  %s7745_s6 = sld [smem:[#allocation52_spill]] }
 0x261   : > { %s7746_s30 = sld [smem:[#allocation56_spill]] }
 0x262   : > { %5217 = dma.hbm_to_vmem [thread:$0]  (!%p6525_p6), %s7741_s1, 16, %s838_s8, [#allocation36]  }
 0x265   : > { %s4236_s2 = sadd.s32 4294967294, %s7742_s10   ;;  %s6989_s25 = sadd.s32 1, %s7742_s10  }
 0x266   : > { %s54_s7 = ssub.s32 %s7742_s10, %s6989_s25  ;;  %s57_s24 = sadd.s32 1, %s7743_s23 }
 0x267   : > { %p55_p8 = scmp.eq.s32.totalorder %s54_s7, 0  ;;  %p64_p1 = scmp.ne.s32.totalorder %s7743_s23, %s7744_s22 }
 0x268   : > { %p65_p3 = scmp.eq.s32.totalorder %s7742_s10, 0  ;;  %p70_p13 = scmp.ne.s32.totalorder %s7744_s22, %s7745_s6 }
 0x269   : > { %s7000_s27 = scalar_select %p55_p8, %s7743_s23, %s57_s24  }
 0x26a   : > { %p7002_p0 = por %p65_p3, %p64_p1  ;;  %p7748_p2 = scmp.eq.s32.totalorder %s7746_s30, 0 }
 0x26b   : > { %p556_p5 = scmp.eq.s32.totalorder %s7746_s30, 1  ;;  %p562_p7 = scmp.eq.s32.totalorder %s4236_s2, 1 }
 0x26c   : > { %p7008_p6 = por %p7748_p2, %p70_p13  ;;  %p5248_p9 = scmp.lt.s32.totalorder %s7742_s10, 2 }
 0x26d   : > { %s848_s5 = sand.u32 1, %s7743_s23   ;;  %p7015_p4 = por %p556_p5, %p64_p1 }
 0x26e   : > { %p7019_p10 = por %p562_p7, %p70_p13  ;;  %s4261_s4 = sshll.u32 %s848_s5, 6 }
 0x26f   : > { %s7750_s18 = scalar_select %p7015_p4, 1, 0 }
 0x270   : > { %s7751_s3 = scalar_select %p7019_p10, 1, 0 }
 0x271   : > { %s4497_s9 = sshll.u32 %s7742_s10, 10  ;;  %s7752_s7 = sld [smem:[#allocation71_spill]] }
 0x272   : > { %s852_s23 = scalar_lea.vmem [#allocation2], %s4261_s4  ;;  %p7033_p11 = pnand %p5248_p9, %p7002_p0 }
 0x273   : > { %s859_s30 = sshll.u32 %s852_s23, 4  ;;  %s7037_s10 = scalar_lea.sflag [#allocation3], %s848_s5  ;;  %s7029_s30 = int_to_ptr.vmem [resolvable:$true] %s859_s30 }
 0x274   : > { %p6198_p8 = pneg %p7033_p11 }
 0x277   : > { %s7027_s24 = scalar_lea.hbm %s7752_s7, %s4497_s9  ;;  %s6201_s20 = scalar_lea.hbm %s7752_s7, 2048 }
 0x278   : > { %s6196_s22 = scalar_lea.hbm %s7027_s24, 1024  ;;  %p6202_p13 = scmp.lt.u32.totalorder %s7027_s24, %s7752_s7 }
 0x279   : > { %p6197_p12 = scmp.ne.s32.totalorder %s7027_s24, %s6196_s22  ;;  %p6203_p0 = scmp.lt.u32.totalorder %s6201_s20, %s6196_s22 }
 0x27a   : > { %p6205_p5 = scmp.lt.u32.totalorder %s6196_s22, %s7027_s24 }
 0x27b   : > { %p6199_p1 = pnand %p6198_p8, %p6197_p12  ;;  %p6204_p2 = por %p6203_p0, %p6202_p13 }
 0x27d   : > { %p6200_p3 = pneg %p6199_p1  ;;  %p6206_p7 = por %p6205_p5, %p6204_p2 }
 0x27f   : > { %p6207_p9 = pnand %p6206_p7, %p6200_p3 }
 0x281   : > { %6210 = shalt.err (!%p6207_p9)
}
 0x282   : > { %s6211_s5 = scalar_lea.vmem %s7029_s30, 1024  ;;  %s6364_s4 = smov [#allocation2]  }
 0x283   : > { %p6212_p12 = scmp.ne.s32.totalorder %s7029_s30, %s6211_s5  ;;  %s6216_s9 = sshll.u32 %s6364_s4, 4  ;;  %s6217_s9 = int_to_ptr.vmem [resolvable:$false] %s6216_s9 }
 0x284   : > { %s6218_s6 = scalar_lea.vmem %s6217_s9, 2048  ;;  %p6219_p4 = scmp.lt.s32.totalorder %s7029_s30, %s6217_s9 }
 0x285   : > { %p6214_p1 = pnand %p6212_p12, %p6198_p8  ;;  %p6220_p13 = scmp.lt.s32.totalorder %s6218_s6, %s6211_s5 }
 0x287   : > { %p6215_p10 = pneg %p6214_p1  ;;  %p6221_p0 = por %p6220_p13, %p6219_p4 }
 0x289   : > { %p6222_p2 = pnand %p6221_p0, %p6215_p10 }
 0x28b   : > { %6225 = shalt.err (!%p6222_p2)
}
 0x28c   : > { %s7754_s22 = smov 8   ;;  %s7755_s20 = smov 128  }
 0x28d   : > { %5221 = dma.hbm_to_vmem [thread:$0]  (!%p7033_p11), %s7027_s24, 1024, %s7029_s30, %s7037_s10, %s7755_s20, %s7755_s20, %s7754_s22  }
 0x28e   : > { %s7756_s23 = sld [smem:[#allocation57_spill]] }
 0x294   : > { %p7757_p8 = scmp.ne.s32.totalorder %s7756_s23, 0 }
 0x296   : > { %871 = sbr.rel (%p7757_p8) target bundleno = 2976 (0xba0), region = 112 }
 0x29d   : > { %s7758_s4 = sld [smem:[#allocation53_spill]] }
 0x2a3   : > { %s7071_s0 = sand.u32 1, %s7758_s4  }
 0x2a4   : > { %s4265_s5 = sshll.u32 %s7071_s0, 6  ;;  %s874_s9 = scalar_lea.sflag [#allocation3], %s7071_s0 }
 0x2a5   : > { %s7077_s2 = scalar_lea.vmem [#allocation2], %s4265_s5 }
 0x2a6   : > { %6271 = dma.done.wait (%p7008_p6), %s874_s9, 1024  }
 0x2a7   : > { %6273 = vsyncadd (%p7008_p6), %s874_s9, 4294966272  ;;  %s7759_s24 = sld [smem:[#allocation56_spill]] }
 0x2ad   : > { %p7760_p4 = scmp.eq.s32.totalorder %s7759_s24, 0 }
 0x2af   : > { %6275 = dma.done.wait (%p7760_p4), [#allocation6], 2048   ;;  %p7761_p10 = pmov %p7760_p4 }
 0x2b0   : > { %p7762_p11 = pmov %p7760_p4 }
 0x2b1   : > { %6277 = vsyncadd (%p7761_p10), [#allocation6], 4294965248 }
 0x2b2   : > { %6279 = dma.done.wait (%p7762_p11), [#allocation9], 32   ;;  %p7763_p3 = pmov %p7760_p4 }
 0x2b4   : > { %6281 = vsyncadd (%p7763_p3), [#allocation9], 4294967264  ;;  %p7764_p5 = pmov %p7763_p3 }
 0x2b5   : > { %p7765_p7 = pmov %p7763_p3 }
 0x2b6   : > { %6283 = dma.done.wait (%p7764_p5), [#allocation12], 1024  }
 0x2b7   : > { %6285 = vsyncadd (%p7765_p7), [#allocation12], 4294966272  ;;  %p7766_p6 = pmov %p7763_p3 }
 0x2b8   : > { %p7767_p9 = pmov %p7763_p3 }
 0x2b9   : > { %6287 = dma.done.wait (%p7766_p6), [#allocation15], 528  }
 0x2ba   : > { %6289 = vsyncadd (%p7767_p9), [#allocation15], 4294966768  ;;  %p7768_p12 = pmov %p7763_p3 }
 0x2bb   : > { %p7769_p1 = pmov %p7763_p3 }
 0x2bc   : > { %6291 = dma.done.wait (%p7768_p12), [#allocation18], 32  }
 0x2bd   : > { %6293 = vsyncadd (%p7769_p1), [#allocation18], 4294967264  ;;  %p7770_p13 = pmov %p7769_p1 }
 0x2be   : > { %p7771_p0 = pmov %p7769_p1 }
 0x2bf   : > { %6295 = dma.done.wait (%p7770_p13), [#allocation21], 4864  }
 0x2c0   : > { %6297 = vsyncadd (%p7771_p0), [#allocation21], 4294962432  ;;  %p7772_p2 = pmov %p7771_p0 }
 0x2c1   : > { %p7773_p8 = pmov %p7771_p0 }
 0x2c2   : > { %6299 = dma.done.wait (%p7772_p2), [#allocation24], 528  }
 0x2c3   : > { %6301 = vsyncadd (%p7773_p8), [#allocation24], 4294966768  ;;  %p7774_p4 = pmov %p7771_p0 }
 0x2c4   : > { %p7775_p10 = pmov %p7771_p0 }
 0x2c5   : > { %6303 = dma.done.wait (%p7774_p4), [#allocation27], 528  }
 0x2c6   : > { %6305 = vsyncadd (%p7775_p10), [#allocation27], 4294966768  ;;  %p7776_p11 = pmov %p7771_p0 }
 0x2c7   : > { %p7777_p3 = pmov %p7771_p0 }
 0x2c8   : > { %6307 = dma.done.wait (%p7776_p11), [#allocation30], 1040  }
 0x2c9   : > { %6309 = vsyncadd (%p7777_p3), [#allocation30], 4294966256  ;;  %p7778_p5 = pmov %p7771_p0 }
 0x2ca   : > { %p7779_p7 = pmov %p7771_p0 }
 0x2cb   : > { %6311 = dma.done.wait (%p7778_p5), [#allocation33], 528  }
 0x2cc   : > { %6313 = vsyncadd (%p7779_p7), [#allocation33], 4294966768  ;;  %p7780_p6 = pmov %p7771_p0 }
 0x2cd   : > { %p7781_p9 = pmov %p7771_p0 }
 0x2ce   : > { %6315 = dma.done.wait (%p7780_p6), [#allocation36], 528  }
 0x2cf   : > { %6317 = vsyncadd (%p7781_p9), [#allocation36], 4294966768  ;;  %v5332_v0 = vld [vmem:[#allocation7] sm:$0xff]   ;;  %v5333_v1 = vld [vmem:[#allocation7 + $0x8] sm:$0xff]   ;;  %vm1468_vm0 = vcmask 523264   ;;  %vm1770_vm1 = vcmask 261120  }
 0x2d0   : > { %4703 = vmatprep.subr.bf16.mxu1 %v5332_v0  ;;  %v5334_v2 = vld [vmem:[#allocation7 + $0x10] sm:$0xff]   ;;  %v5335_v3 = vld [vmem:[#allocation7 + $0x18] sm:$0xff]   ;;  %v1029_v4 = vld [vmem:[%s7077_s2] sm:$0xff]  ;;  %s1027_s8 = scalar_lea.vmem [#allocation38], %s4265_s5  ;;  %s4498_s30 = sshll.u32 %s7759_s24, 10 }
 0x2d1   : > { %4704 = vmatpush3.bf16.msra.mxu1 %v5332_v0  ;;  %v1030_v5 = vld [vmem:[%s7077_s2 + $0x8] sm:$0xff]  ;;  %v5336_v7 = vld [vmem:[#allocation7 + $0x20] sm:$0xff]   ;;  %v5342_v10 = vld [vmem:[#allocation5 + $0x10] sm:$0xff]   ;;  %s3954_s10 = sshll.u32 %s1027_s8, 4  ;;  %s7813_s20 = sld [smem:[#allocation86_spill]]  ;;  %s7580_s10 = int_to_ptr.vmem [resolvable:$true] %s3954_s10 }
 0x2d2   : > { %4705 = vmatprep.subr.bf16.mxu1 %v5333_v1  ;;  %v1037_v6 = vpack.c.bf16 %v1030_v5, %v1029_v4  ;;  %v5340_v8 = vld [vmem:[#allocation5] sm:$0xff]   ;;  %v5341_v9 = vld [vmem:[#allocation5 + $0x8] sm:$0xff]   ;;  %v5338_v12 = vld [vmem:[#allocation7 + $0x30] sm:$0xff]   ;;  %s3941_s4 = scalar_lea.sflag [#allocation4], %s7071_s0  ;;  %s6226_s5 = scalar_lea.vmem %s7580_s10, 1024 }
 0x2d3   : > { %4679 = vmatprep.subr.bf16.mxu0 %v5340_v8  ;;  %v5337_v11 = vld [vmem:[#allocation7 + $0x28] sm:$0xff]   ;;  %v5339_v13 = vld [vmem:[#allocation7 + $0x38] sm:$0xff]   ;;  %v1031_v14 = vld [vmem:[%s7077_s2 + $0x10] sm:$0xff]  ;;  %p6227_p12 = scmp.ne.s32.totalorder %s7580_s10, %s6226_s5  ;;  %p7814_p1 = scmp.ne.s32.totalorder %s7750_s18, 0 }
 0x2d4   : > { %4719 = vmatprep.mubr.bf16.mxu1 %v1037_v6  ;;  %4695 = vmatprep.mubr.bf16.mxu0 %v1037_v6  ;;  %v1032_v15 = vld [vmem:[%s7077_s2 + $0x18] sm:$0xff]  ;;  %v1033_v16 = vld [vmem:[%s7077_s2 + $0x20] sm:$0xff]  ;;  %v1034_v17 = vld [vmem:[%s7077_s2 + $0x28] sm:$0xff]  ;;  %s6365_s9 = smov [#allocation38]  }
 0x2d5   : > { %4706 = vmatpush3.bf16.msra.mxu1 %v5333_v1  ;;  %4680 = vmatpush3.bf16.msra.mxu0 %v5340_v8  ;;  %v1038_v18 = vpack.c.bf16 %v1032_v15, %v1031_v14  ;;  %v1039_v19 = vpack.c.bf16 %v1034_v17, %v1033_v16  ;;  %v1035_v20 = vld [vmem:[%s7077_s2 + $0x30] sm:$0xff]  ;;  %v1036_v21 = vld [vmem:[%s7077_s2 + $0x38] sm:$0xff]  ;;  %v5344_v24 = vld [vmem:[#allocation5 + $0x20] sm:$0xff]   ;;  %p6228_p13 = pnand %p6227_p12, %p7814_p1  ;;  %s6230_s2 = sshll.u32 %s6365_s9, 4  ;;  %s6231_s2 = int_to_ptr.vmem [resolvable:$false] %s6230_s2 }
 0x2d6   : > { %4707 = vmatprep.subr.bf16.mxu1 %v5334_v2  ;;  %4681 = vmatprep.subr.bf16.mxu0 %v5341_v9  ;;  %v1040_v22 = vpack.c.bf16 %v1036_v21, %v1035_v20  ;;  %v5343_v23 = vld [vmem:[#allocation5 + $0x18] sm:$0xff]   ;;  %v5345_v25 = vld [vmem:[#allocation5 + $0x28] sm:$0xff]   ;;  %v5346_v26 = vld [vmem:[#allocation5 + $0x30] sm:$0xff]   ;;  %s6232_s24 = scalar_lea.vmem %s6231_s2, 2048  ;;  %p6233_p2 = scmp.lt.s32.totalorder %s7580_s10, %s6231_s2 }
 0x2d7   : > { %v5347_v27 = vld [vmem:[#allocation5 + $0x38] sm:$0xff]   ;;  %v5348_v28 = vld [vmem:[#allocation13] sm:$0xff]   ;;  %v5350_v30 = vld [vmem:[#allocation13 + $0x8] sm:$0xff]   ;;  %s7578_s23 = scalar_lea.hbm %s7813_s20, %s4498_s30  ;;  %p6229_p0 = pneg %p6228_p13 }
 0x2d8   : > { %v5349_v29 = vld [vmem:[#allocation11] sm:$0xff]   ;;  %v5351_v31 = vld [vmem:[#allocation11 + $0x8] sm:$0xff]   ;;  %v5352_v32 = vld [vmem:[#allocation13 + $0x10] sm:$0xff]   ;;  %p6234_p8 = scmp.lt.s32.totalorder %s6232_s24, %s6226_s5 }
 0x2d9   : > { %4708 = vmatpush3.bf16.msra.mxu1 %v5334_v2  ;;  %4682 = vmatpush3.bf16.msra.mxu0 %v5341_v9  ;;  %v5353_v33 = vld [vmem:[#allocation11 + $0x10] sm:$0xff]   ;;  %v5354_v34 = vld [vmem:[#allocation13 + $0x18] sm:$0xff]   ;;  %v7135_v36 = vld [vmem:[#allocation14] sm:$0xff]  }
 0x2da   : > { %4709 = vmatprep.subr.bf16.mxu1 %v5335_v3  ;;  %4683 = vmatprep.subr.bf16.mxu0 %v5342_v10  ;;  %v5355_v35 = vld [vmem:[#allocation11 + $0x18] sm:$0xff]   ;;  %p6235_p4 = por %p6234_p8, %p6233_p2 }
 0x2db   : > { %v4306_v37 = vld [vmem:[#allocation10] ss:$0 sm:$0xff] }
 0x2dc   : > { %p6236_p10 = pnand %p6235_p4, %p6229_p0 }
 0x2dd   : > { %4710 = vmatpush3.bf16.msra.mxu1 %v5335_v3  ;;  %4684 = vmatpush3.bf16.msra.mxu0 %v5342_v10 }
 0x2de   : > { %4711 = vmatprep.subr.bf16.mxu1 %v5336_v7  ;;  %4685 = vmatprep.subr.bf16.mxu0 %v5343_v23 }
 0x2e1   : > { %4712 = vmatpush3.bf16.msra.mxu1 %v5336_v7  ;;  %4686 = vmatpush3.bf16.msra.mxu0 %v5343_v23 }
 0x2e2   : > { %4713 = vmatprep.subr.bf16.mxu1 %v5337_v11  ;;  %4687 = vmatprep.subr.bf16.mxu0 %v5344_v24 }
 0x2e5   : > { %4714 = vmatpush3.bf16.msra.mxu1 %v5337_v11  ;;  %4688 = vmatpush3.bf16.msra.mxu0 %v5344_v24  ;;  %v5357_v24 = vld [vmem:[#allocation14 + $0x8] sm:$0xff]  }
 0x2e6   : > { %4715 = vmatprep.subr.bf16.mxu1 %v5338_v12  ;;  %4689 = vmatprep.subr.bf16.mxu0 %v5345_v25 }
 0x2e9   : > { %4716 = vmatpush3.bf16.msra.mxu1 %v5338_v12  ;;  %4690 = vmatpush3.bf16.msra.mxu0 %v5345_v25 }
 0x2ea   : > { %4717 = vmatprep.subr.bf16.mxu1 %v5339_v13  ;;  %4691 = vmatprep.subr.bf16.mxu0 %v5346_v26 }
 0x2ed   : > { %4718 = vmatpush3.bf16.msra.mxu1 %v5339_v13  ;;  %4692 = vmatpush3.bf16.msra.mxu0 %v5346_v26 }
 0x2ee   : > { %4693 = vmatprep.subr.bf16.mxu0 %v5347_v27  ;;  %4743 = vmatprep.subr.bf16.mxu1 %v5348_v28 }
 0x2f0   : > { %4720 = vmatmul.mubr.bf16.vlgmr.msra.gmra.mrb[0].mxu1 %v1038_v18 }
 0x2f1   : > { %4723 = vmatprep.mubr.bf16.mxu1 %v1039_v19  ;;  %4694 = vmatpush3.bf16.msra.mxu0 %v5347_v27 }
 0x2f2   : > { %4727 = vmatprep.subr.bf16.mxu0 %v5349_v29  ;;  %4744 = vmatpush3.bf16.msra.mxu1 %v5348_v28 }
 0x2f3   : > { %4745 = vmatprep.subr.bf16.mxu1 %v5350_v30 }
 0x2f4   : > { %4696 = vmatmul.mubr.bf16.vlgmr.msra.gmra.mrb[0].mxu0 %v1038_v18 }
 0x2f5   : > { %4728 = vmatpush3.bf16.msra.mxu0 %v5349_v29  ;;  %4699 = vmatprep.mubr.bf16.mxu0 %v1039_v19 }
 0x2f6   : > { %4729 = vmatprep.subr.bf16.mxu0 %v5351_v31  ;;  %4746 = vmatpush3.bf16.msra.mxu1 %v5350_v30  ;;  %v5358_v30 = vld [vmem:[#allocation14 + $0x10] sm:$0xff]  }
 0x2f7   : > { %4747 = vmatprep.subr.bf16.mxu1 %v5352_v32 }
 0x2f8   : > { %4724 = vmatmul.mubr.bf16.gmra.mrb[4].mxu1 %v1040_v22 }
 0x2f9   : > { %4730 = vmatpush3.bf16.msra.mxu0 %v5351_v31 }
 0x2fa   : > { %4731 = vmatprep.subr.bf16.mxu0 %v5353_v33  ;;  %4748 = vmatpush3.bf16.msra.mxu1 %v5352_v32 }
 0x2fb   : > { %4749 = vmatprep.subr.bf16.mxu1 %v5354_v34 }
 0x2fc   : > { %4700 = vmatmul.mubr.bf16.gmra.mrb[4].mxu0 %v1040_v22 }
 0x2fd   : > { %4732 = vmatpush3.bf16.msra.mxu0 %v5353_v33 }
 0x2fe   : > { %4733 = vmatprep.subr.bf16.mxu0 %v5355_v35  ;;  %4750 = vmatpush3.bf16.msra.mxu1 %v5354_v34 }
 0x301   : > { %4734 = vmatpush3.bf16.msra.mxu0 %v5355_v35 }
 0x302   : > { %4759 = vmatprep.subr.bf16.mxu0 %v7135_v36 }
 0x3c3   : > { %v4721_v38 = vpop.f32.mrb[0].mxu1 }
 0x3c4   : > { %v1347_v39 = vadd.f32 %v4721_v38, %v4306_v37  ;;  %v1338_v40 = vpop.f32.mrb[1].mxu1 }
 0x3c5   : > { %v1339_v41 = vadd.f32 %v4306_v37, %v1338_v40  ;;  %v4722_v42 = vpop.f32.mrb[2].mxu1 }
 0x3c6   : > { %v4317_v43 = vmul.f32 -1.442695, %v1347_v39  ;;  %v1350_v44 = vadd.f32 %v4722_v42, %v4306_v37  ;;  %v1341_v45 = vpop.f32.mrb[3].mxu1 }
 0x3c7   : > { %v4315_v46 = vmul.f32 -1.442695, %v1339_v41  ;;  %v1342_v47 = vadd.f32 %v4306_v37, %v1341_v45  ;;  %v4697_v38 = vpop.f32.mrb[0].mxu0 }
 0x3c8   : > { %5420 = vpow2.f32 %v4317_v43  ;;  %v4318_v48 = vmul.f32 -1.442695, %v1350_v44  ;;  %v1146_v40 = vpop.f32.mrb[1].mxu0 }
 0x3c9   : > { %5422 = vpow2.f32 %v4315_v46  ;;  %v4316_v49 = vmul.f32 -1.442695, %v1342_v47  ;;  %v4698_v42 = vpop.f32.mrb[2].mxu0 }
 0x3ca   : > { %5424 = vpow2.f32 %v4318_v48  ;;  %v1149_v45 = vpop.f32.mrb[3].mxu0 }
 0x3cb   : > { %5426 = vpow2.f32 %v4316_v49  ;;  %v4725_v50 = vpop.f32.mrb[4].mxu1 }
 0x3cc   : > { %v7138_v51 = vadd.f32 %v4725_v50, %v4306_v37  ;;  %v1354_v52 = vpop.f32.mrb[5].mxu1 }
 0x3cd   : > { %v1355_v53 = vadd.f32 %v4306_v37, %v1354_v52  ;;  %v4726_v54 = vpop.f32.mrb[6].mxu1 }
 0x3ce   : > { %v4321_v55 = vmul.f32 -1.442695, %v7138_v51  ;;  %v1366_v56 = vadd.f32 %v4726_v54, %v4306_v37  ;;  %v1357_v57 = vpop.f32.mrb[7].mxu1 }
 0x3cf   : > { %v4319_v58 = vmul.f32 -1.442695, %v1355_v53  ;;  %v1358_v59 = vadd.f32 %v4306_v37, %v1357_v57  ;;  %v4289_v37 = vld [vmem:[#allocation8] ss:$0 sm:$0xff]  ;;  %v4701_v50 = vpop.f32.mrb[4].mxu0 }
 0x3d0   : > { %5428 = vpow2.f32 %v4321_v55  ;;  %v4322_v60 = vmul.f32 -1.442695, %v1366_v56  ;;  %v1162_v52 = vpop.f32.mrb[5].mxu0 }
 0x3d1   : > { %5430 = vpow2.f32 %v4319_v58  ;;  %v4320_v61 = vmul.f32 -1.442695, %v1358_v59  ;;  %v4702_v54 = vpop.f32.mrb[6].mxu0 }
 0x3d2   : > { %v5421_v62 = vpop.eup %5420  ;;  %5432 = vpow2.f32 %v4322_v60  ;;  %v1165_v57 = vpop.f32.mrb[7].mxu0 }
 0x3d3   : > { %v5423_v63 = vpop.eup %5422  ;;  %v1395_v0 = vadd.f32 1.0, %v5421_v62  ;;  %5434 = vpow2.f32 %v4320_v61 }
 0x3d4   : > { %v5425_v1 = vpop.eup %5424  ;;  %v1393_v2 = vadd.f32 1.0, %v5423_v63 }
 0x3d5   : > { %v5427_v3 = vpop.eup %5426  ;;  %5436 = vrcp.f32 %v1395_v0  ;;  %v1396_v4 = vadd.f32 1.0, %v5425_v1 }
 0x3d6   : > { %5438 = vrcp.f32 %v1393_v2  ;;  %v1394_v5 = vadd.f32 1.0, %v5427_v3 }
 0x3d7   : > { %5440 = vrcp.f32 %v1396_v4 }
 0x3d8   : > { %5442 = vrcp.f32 %v1394_v5 }
 0x3da   : > { %v5429_v6 = vpop.eup %5428 }
 0x3db   : > { %v5431_v7 = vpop.eup %5430  ;;  %v1399_v8 = vadd.f32 1.0, %v5429_v6 }
 0x3dc   : > { %v5433_v9 = vpop.eup %5432  ;;  %v1397_v10 = vadd.f32 1.0, %v5431_v7 }
 0x3dd   : > { %v5435_v11 = vpop.eup %5434  ;;  %5444 = vrcp.f32 %v1399_v8  ;;  %v1400_v12 = vadd.f32 1.0, %v5433_v9 }
 0x3de   : > { %5446 = vrcp.f32 %v1397_v10  ;;  %v1398_v13 = vadd.f32 1.0, %v5435_v11 }
 0x3df   : > { %v5437_v14 = vpop.eup %5436  ;;  %5448 = vrcp.f32 %v1400_v12 }
 0x3e0   : > { %v5439_v15 = vpop.eup %5438  ;;  %5450 = vrcp.f32 %v1398_v13  ;;  %v7147_v21 = vmul.f32 %v5437_v14, %v1347_v39  ;;  %v1155_v39 = vadd.f32 %v4697_v38, %v4289_v37 }
 0x3e1   : > { %v5441_v16 = vpop.eup %5440  ;;  %v7143_v19 = vmul.f32 %v5439_v15, %v1339_v41  ;;  %v1147_v41 = vadd.f32 %v4289_v37, %v1146_v40 }
 0x3e2   : > { %v5443_v17 = vpop.eup %5442  ;;  %v7141_v18 = vmul.f32 %v5441_v16, %v1350_v44  ;;  %7782 = vst [vmem:[#allocation58_spill] sm:$0xff] %v7147_v21  ;;  %v4300_v43 = vmul.f32 -1.442695, %v1155_v39  ;;  %v1158_v44 = vadd.f32 %v4698_v42, %v4289_v37  ;;  %v5360_v42 = vld [vmem:[#allocation20] sm:$0xff]  }
 0x3e3   : > { %v7145_v20 = vmul.f32 %v5443_v17, %v1342_v47  ;;  %v4298_v46 = vmul.f32 -1.442695, %v1147_v41  ;;  %v1150_v47 = vadd.f32 %v4289_v37, %v1149_v45 }
 0x3e4   : > { %v1426_v23 = vpack.c.bf16 %v7141_v18, %v7147_v21  ;;  %5452 = vpow2.f32 %v4300_v43  ;;  %v4301_v48 = vmul.f32 -1.442695, %v1158_v44  ;;  %v4323_v43 = vld [vmem:[#allocation16] ss:$0 sm:$0xff] }
 0x3e5   : > { %v1425_v22 = vpack.c.bf16 %v7145_v20, %v7143_v19  ;;  %5454 = vpow2.f32 %v4298_v46  ;;  %v4299_v49 = vmul.f32 -1.442695, %v1150_v47  ;;  %v4332_v46 = vld [vmem:[#allocation17] ss:$0 sm:$0xff] }
 0x3e6   : > { %5456 = vpow2.f32 %v4301_v48 }
 0x3e7   : > { %v5445_v25 = vpop.eup %5444  ;;  %4735 = vmatprep.mubr.msk.bf16.mxu0 %vm1468_vm0, %v1425_v22  ;;  %4751 = vmatprep.mubr.msk.bf16.mxu1 %vm1468_vm0, %v1425_v22  ;;  %5458 = vpow2.f32 %v4299_v49 }
 0x3e8   : > { %v5447_v26 = vpop.eup %5446  ;;  %4736 = vmatmul.mubr.msk.bf16.vlgmr.msra.gmra.mrb[8].mxu0 %vm1468_vm0, %v1426_v23  ;;  %4752 = vmatmul.mubr.msk.bf16.vlgmr.msra.gmra.mrb[8].mxu1 %vm1468_vm0, %v1426_v23  ;;  %v7165_v33 = vmul.f32 %v5445_v25, %v7138_v51  ;;  %v1171_v51 = vadd.f32 %v4701_v50, %v4289_v37 }
 0x3e9   : > { %v5449_v27 = vpop.eup %5448  ;;  %4760 = vmatpush3.bf16.msra.mxu0 %v7135_v36  ;;  %v7160_v31 = vmul.f32 %v5447_v26, %v1355_v53  ;;  %v5359_v36 = vld [vmem:[#allocation14 + $0x18] sm:$0xff]   ;;  %v1163_v53 = vadd.f32 %v4289_v37, %v1162_v52 }
 0x3ea   : > { %v5451_v28 = vpop.eup %5450  ;;  %v7158_v29 = vmul.f32 %v5449_v27, %v1366_v56  ;;  %4761 = vmatprep.subr.bf16.mxu0 %v5357_v24  ;;  %7786 = vst [vmem:[#allocation62_spill] sm:$0xff] %v7165_v33  ;;  %v4304_v55 = vmul.f32 -1.442695, %v1171_v51  ;;  %v1174_v56 = vadd.f32 %v4702_v54, %v4289_v37 }
 0x3eb   : > { %7784 = vst [vmem:[#allocation60_spill] sm:$0xff] %v7160_v31  ;;  %v7162_v32 = vmul.f32 %v5451_v28, %v1358_v59  ;;  %v4302_v58 = vmul.f32 -1.442695, %v1163_v53  ;;  %v1166_v59 = vadd.f32 %v4289_v37, %v1165_v57 }
 0x3ec   : > { %7783 = vst [vmem:[#allocation59_spill] sm:$0xff] %v7158_v29  ;;  %v1428_v35 = vpack.c.bf16 %v7158_v29, %v7165_v33  ;;  %5460 = vpow2.f32 %v4304_v55  ;;  %v4305_v60 = vmul.f32 -1.442695, %v1174_v56 }
 0x3ed   : > { %7785 = vst [vmem:[#allocation61_spill] sm:$0xff] %v7162_v32  ;;  %v1427_v34 = vpack.c.bf16 %v7162_v32, %v7160_v31  ;;  %4762 = vmatpush3.bf16.msra.mxu0 %v5357_v24  ;;  %5462 = vpow2.f32 %v4302_v58  ;;  %v4303_v61 = vmul.f32 -1.442695, %v1166_v59 }
 0x3ee   : > { %4763 = vmatprep.subr.bf16.mxu0 %v5358_v30  ;;  %v5453_v62 = vpop.eup %5452  ;;  %5464 = vpow2.f32 %v4305_v60 }
 0x3ef   : > { %4739 = vmatprep.mubr.msk.bf16.mxu0 %vm1468_vm0, %v1427_v34  ;;  %4755 = vmatprep.mubr.msk.bf16.mxu1 %vm1468_vm0, %v1427_v34  ;;  %v5455_v63 = vpop.eup %5454  ;;  %v1203_v0 = vadd.f32 1.0, %v5453_v62  ;;  %5466 = vpow2.f32 %v4303_v61 }
 0x3f0   : > { %4740 = vmatmul.mubr.msk.bf16.gmra.mrb[12].mxu0 %vm1468_vm0, %v1428_v35  ;;  %4756 = vmatmul.mubr.msk.bf16.gmra.mrb[12].mxu1 %vm1468_vm0, %v1428_v35  ;;  %v5457_v1 = vpop.eup %5456  ;;  %v1201_v2 = vadd.f32 1.0, %v5455_v63 }
 0x3f1   : > { %4764 = vmatpush3.bf16.msra.mxu0 %v5358_v30  ;;  %4767 = vmatprep.mubr.msk.bf16.mxu0 %vm1468_vm0, %v1425_v22  ;;  %v5459_v3 = vpop.eup %5458  ;;  %5468 = vrcp.f32 %v1203_v0  ;;  %v1204_v4 = vadd.f32 1.0, %v5457_v1 }
 0x3f2   : > { %4765 = vmatprep.subr.bf16.mxu0 %v5359_v36  ;;  %5470 = vrcp.f32 %v1201_v2  ;;  %v1202_v5 = vadd.f32 1.0, %v5459_v3 }
 0x3f3   : > { %5472 = vrcp.f32 %v1204_v4 }
 0x3f4   : > { %5474 = vrcp.f32 %v1202_v5 }
 0x3f5   : > { %4766 = vmatpush3.bf16.msra.mxu0 %v5359_v36 }
 0x3f6   : > { %v5461_v6 = vpop.eup %5460 }
 0x3f7   : > { %v5463_v7 = vpop.eup %5462  ;;  %v1207_v8 = vadd.f32 1.0, %v5461_v6 }
 0x3f8   : > { %4768 = vmatmul.mubr.msk.bf16.vlgmr.msra.gmra.mrb[16].mxu0 %vm1468_vm0, %v1426_v23  ;;  %v5465_v9 = vpop.eup %5464  ;;  %v1205_v10 = vadd.f32 1.0, %v5463_v7 }
 0x3f9   : > { %4771 = vmatprep.mubr.msk.bf16.mxu0 %vm1468_vm0, %v1427_v34  ;;  %v5467_v11 = vpop.eup %5466  ;;  %5476 = vrcp.f32 %v1207_v8  ;;  %v1208_v12 = vadd.f32 1.0, %v5465_v9 }
 0x3fa   : > { %5478 = vrcp.f32 %v1205_v10  ;;  %v1206_v13 = vadd.f32 1.0, %v5467_v11 }
 0x3fb   : > { %v5469_v14 = vpop.eup %5468  ;;  %5480 = vrcp.f32 %v1208_v12 }
 0x3fc   : > { %v5471_v15 = vpop.eup %5470  ;;  %v7179_v16 = vmul.f32 %v5469_v14, %v1155_v39  ;;  %5482 = vrcp.f32 %v1206_v13 }
 0x3fd   : > { %v5473_v17 = vpop.eup %5472  ;;  %v7181_v22 = vmul.f32 %v5471_v15, %v1147_v41 }
 0x3fe   : > { %7787 = vst [vmem:[#allocation63_spill] sm:$0xff] %v7179_v16  ;;  %v5475_v23 = vpop.eup %5474  ;;  %v7183_v24 = vmul.f32 %v5473_v17, %v1158_v44 }
 0x3ff   : > { %7788 = vst [vmem:[#allocation64_spill] sm:$0xff] %v7181_v22  ;;  %v7185_v25 = vmul.f32 %v5475_v23, %v1150_v47 }
 0x400   : > { %4772 = vmatmul.mubr.msk.bf16.gmra.mrb[20].mxu0 %vm1468_vm0, %v1428_v35  ;;  %7789 = vst [vmem:[#allocation65_spill] sm:$0xff] %v7183_v24 }
 0x401   : > { %7790 = vst [vmem:[#allocation66_spill] sm:$0xff] %v7185_v25  ;;  %4799 = vmatprep.mubr.msk.bf16.mxu0 %vm1468_vm0, %v5360_v42 }
 0x403   : > { %v5477_v28 = vpop.eup %5476 }
 0x404   : > { %v5479_v30 = vpop.eup %5478  ;;  %v7191_v34 = vmul.f32 %v5477_v28, %v1171_v51 }
 0x405   : > { %v5481_v35 = vpop.eup %5480  ;;  %v7193_v36 = vmul.f32 %v5479_v30, %v1163_v53 }
 0x406   : > { %7791 = vst [vmem:[#allocation67_spill] sm:$0xff] %v7191_v34  ;;  %v5483_v37 = vpop.eup %5482  ;;  %v7195_v38 = vmul.f32 %v5481_v35, %v1174_v56 }
 0x407   : > { %7792 = vst [vmem:[#allocation68_spill] sm:$0xff] %v7193_v36  ;;  %v7197_v39 = vmul.f32 %v5483_v37, %v1166_v59 }
 0x408   : > { %7793 = vst [vmem:[#allocation69_spill] sm:$0xff] %v7195_v38 }
 0x409   : > { %7794 = vst [vmem:[#allocation70_spill] sm:$0xff] %v7197_v39 }
 0x4bb   : > { %v4737_v44 = vpop.f32.mrb[8].mxu0  ;;  %v4753_v45 = vpop.f32.mrb[8].mxu1 }
 0x4bc   : > { %v1524_v47 = vadd.f32 %v4737_v44, %v4323_v43  ;;  %v1515_v48 = vpop.f32.mrb[9].mxu0  ;;  %v1619_v49 = vpop.f32.mrb[9].mxu1  ;;  %v1628_v53 = vadd.f32 %v4753_v45, %v4332_v46 }
 0x4bd   : > { %v1516_v50 = vadd.f32 %v4323_v43, %v1515_v48  ;;  %v4738_v51 = vpop.f32.mrb[10].mxu0  ;;  %v4754_v52 = vpop.f32.mrb[10].mxu1  ;;  %v1620_v58 = vadd.f32 %v4332_v46, %v1619_v49 }
 0x4be   : > { %v1527_v54 = vadd.f32 %v4738_v51, %v4323_v43  ;;  %v1631_v55 = vadd.f32 %v4754_v52, %v4332_v46  ;;  %v1518_v56 = vpop.f32.mrb[11].mxu0  ;;  %v1622_v57 = vpop.f32.mrb[11].mxu1  ;;  %v7204_v61 = vmul.f32 0.17677669, %v1524_v47 }
 0x4bf   : > { %v1519_v59 = vadd.f32 %v4323_v43, %v1518_v56  ;;  %v1623_v60 = vadd.f32 %v4332_v46, %v1622_v57  ;;  %v1754_v0 = vmul.f32 0.17677669, %v1516_v50 }
 0x4c0   : > { %v7206_v62 = vmul.f32 0.17677669, %v1527_v54  ;;  %v1767_v63 = vpack.c.bf16 %v1631_v55, %v1628_v53  ;;  %v4341_v53 = vld [vmem:[#allocation19] ss:$0 sm:$0xff] }
 0x4c1   : > { %v1755_v1 = vmul.f32 0.17677669, %v1519_v59  ;;  %v1766_v2 = vpack.c.bf16 %v1623_v60, %v1620_v58 }
 0x4c2   : > { %v1763_v3 = vpack.c.bf16 %v7206_v62, %v7204_v61  ;;  %v1787_v54 = vsel %vm1770_vm1, %v1767_v63, 0  ;;  %v5364_v61 = vld [vmem:[#allocation20 + $0x20] sm:$0xff]  }
 0x4c3   : > { %v1762_v4 = vpack.c.bf16 %v1755_v1, %v1754_v0  ;;  %v4741_v5 = vpop.f32.mrb[12].mxu0  ;;  %v4757_v6 = vpop.f32.mrb[12].mxu1  ;;  %5055 = vmatprep.subr.msk.bf16.mxu1 %vm1770_vm1, %v1766_v2  ;;  %v1784_v7 = vsel %vm1770_vm1, %v1766_v2, 0  ;;  %v5365_v62 = vld [vmem:[#allocation20 + $0x40] sm:$0xff]  }
 0x4c4   : > { %v1540_v8 = vadd.f32 %v4741_v5, %v4323_v43  ;;  %v1531_v9 = vpop.f32.mrb[13].mxu0  ;;  %v1635_v10 = vpop.f32.mrb[13].mxu1  ;;  %4776 = vmatpush3.bf16.xpose.msra.mxu1 %v1784_v7  ;;  %v1644_v14 = vadd.f32 %v4757_v6, %v4332_v46 }
 0x4c5   : > { %v1532_v11 = vadd.f32 %v4323_v43, %v1531_v9  ;;  %v4742_v12 = vpop.f32.mrb[14].mxu0  ;;  %v4758_v13 = vpop.f32.mrb[14].mxu1  ;;  %5056 = vmatprep.subr.msk.bf16.mxu1 %vm1770_vm1, %v1767_v63  ;;  %4783 = vmatprep.mubr.msk.bf16.mxu1 %vm1770_vm1, %v1762_v4  ;;  %v1636_v30 = vadd.f32 %v4332_v46, %v1635_v10 }
 0x4c6   : > { %v1543_v15 = vadd.f32 %v4742_v12, %v4323_v43  ;;  %v1647_v17 = vadd.f32 %v4758_v13, %v4332_v46  ;;  %v1534_v23 = vpop.f32.mrb[15].mxu0  ;;  %v1638_v28 = vpop.f32.mrb[15].mxu1  ;;  %v7214_v42 = vmul.f32 0.17677669, %v1540_v8  ;;  %v5361_v13 = vld [vmem:[#allocation20 + $0x8] sm:$0xff]  }
 0x4c7   : > { %v1535_v35 = vadd.f32 %v4323_v43, %v1534_v23  ;;  %v1639_v37 = vadd.f32 %v4332_v46, %v1638_v28  ;;  %v1758_v47 = vmul.f32 0.17677669, %v1532_v11  ;;  %v5368_v23 = vld [vmem:[#allocation20 + $0x30] sm:$0xff]  }
 0x4c8   : > { %v7216_v44 = vmul.f32 0.17677669, %v1543_v15  ;;  %v1769_v45 = vpack.c.bf16 %v1647_v17, %v1644_v14  ;;  %v5362_v14 = vld [vmem:[#allocation20 + $0x10] sm:$0xff]   ;;  %v5363_v15 = vld [vmem:[#allocation20 + $0x18] sm:$0xff]   ;;  %v5367_v17 = vld [vmem:[#allocation20 + $0x48] sm:$0xff]  }
 0x4c9   : > { %v1759_v48 = vmul.f32 0.17677669, %v1535_v35  ;;  %v1768_v49 = vpack.c.bf16 %v1639_v37, %v1636_v30  ;;  %v5369_v28 = vld [vmem:[#allocation20 + $0x50] sm:$0xff]   ;;  %v5370_v30 = vld [vmem:[#allocation20 + $0x38] sm:$0xff]   ;;  %v5372_v37 = vld [vmem:[#allocation20 + $0x60] sm:$0xff]  }
 0x4ca   : > { %v1765_v50 = vpack.c.bf16 %v7216_v44, %v7214_v42  ;;  %v1793_v12 = vsel %vm1770_vm1, %v1769_v45, 0  ;;  %v5371_v35 = vld [vmem:[#allocation20 + $0x58] sm:$0xff]   ;;  %v5373_v42 = vld [vmem:[#allocation20 + $0x80] sm:$0xff]   ;;  %v5374_v44 = vld [vmem:[#allocation20 + $0x68] sm:$0xff]  }
 0x4cb   : > { %v1764_v51 = vpack.c.bf16 %v1759_v48, %v1758_v47  ;;  %v4769_v52 = vpop.f32.mrb[16].mxu0  ;;  %v1790_v2 = vsel %vm1770_vm1, %v1768_v49, 0  ;;  %v5376_v47 = vld [vmem:[#allocation20 + $0x70] sm:$0xff]  }
 0x4cc   : > { %v1723_v55 = vpop.f32.mrb[17].mxu0  ;;  %4778 = vmatpush3.bf16.xpose.msra.mxu1 %v1787_v54  ;;  %v1732_v46 = vadd.f32 %v4769_v52, %v4341_v53  ;;  %v5377_v48 = vld [vmem:[#allocation20 + $0x90] sm:$0xff]   ;;  %v5381_v52 = vld [vmem:[#allocation20 + $0xc0] sm:$0xff]   ;;  %v5383_v54 = vld [vmem:[#allocation20 + $0xc8] sm:$0xff]  }
 0x4cd   : > { %v4770_v43 = vpop.f32.mrb[18].mxu0  ;;  %5057 = vmatprep.subr.msk.bf16.mxu1 %vm1770_vm1, %v1768_v49  ;;  %v1724_v58 = vadd.f32 %v4341_v53, %v1723_v55  ;;  %v5378_v49 = vld [vmem:[#allocation20 + $0x78] sm:$0xff]   ;;  %v5384_v55 = vld [vmem:[#allocation20 + $0xb0] sm:$0xff]  }
 0x4ce   : > { %v1735_v56 = vadd.f32 %v4770_v43, %v4341_v53  ;;  %v1726_v57 = vpop.f32.mrb[19].mxu0  ;;  %v5385_v43 = vld [vmem:[#allocation20 + $0xb8] sm:$0xff]  }
 0x4cf   : > { %v1727_v59 = vadd.f32 %v4341_v53, %v1726_v57 }
 0x4d0   : > { %v7222_v60 = vpack.c.bf16 %v1735_v56, %v1732_v46  ;;  %v5386_v46 = vld [vmem:[#allocation20 + $0xe0] sm:$0xff]   ;;  %v5387_v56 = vld [vmem:[#allocation20 + $0xe8] sm:$0xff]  }
 0x4d1   : > { %v7224_v0 = vpack.c.bf16 %v1727_v59, %v1724_v58 }
 0x4d3   : > { %v4773_v1 = vpop.f32.mrb[20].mxu0  ;;  %4791 = vmatprep.subr.bf16.mxu0 %v7224_v0 }
 0x4d4   : > { %v1739_v63 = vpop.f32.mrb[21].mxu0  ;;  %4780 = vmatpush3.bf16.xpose.msra.mxu1 %v1790_v2  ;;  %4792 = vmatpush3.bf16.msra.mxu0 %v7224_v0  ;;  %v1748_v5 = vadd.f32 %v4773_v1, %v4341_v53 }
 0x4d5   : > { %v4774_v4 = vpop.f32.mrb[22].mxu0  ;;  %5058 = vmatprep.subr.msk.bf16.mxu1 %vm1770_vm1, %v1769_v45  ;;  %4793 = vmatprep.subr.bf16.mxu0 %v7222_v60  ;;  %v1740_v8 = vadd.f32 %v4341_v53, %v1739_v63  ;;  %v5375_v45 = vld [vmem:[#allocation20 + $0x88] sm:$0xff]  }
 0x4d6   : > { %v1751_v6 = vadd.f32 %v4774_v4, %v4341_v53  ;;  %v1742_v7 = vpop.f32.mrb[23].mxu0 }
 0x4d7   : > { %v1743_v9 = vadd.f32 %v4341_v53, %v1742_v7  ;;  %v5382_v53 = vld [vmem:[#allocation20 + $0xa8] sm:$0xff]  }
 0x4d8   : > { %v7231_v10 = vpack.c.bf16 %v1751_v6, %v1748_v5  ;;  %4794 = vmatpush3.bf16.msra.mxu0 %v7222_v60 }
 0x4d9   : > { %v7234_v11 = vpack.c.bf16 %v1743_v9, %v1740_v8 }
 0x4db   : > { %4795 = vmatprep.subr.bf16.mxu0 %v7234_v11 }
 0x4dc   : > { %4782 = vmatpush3.bf16.xpose.msra.mxu1 %v1793_v12  ;;  %4796 = vmatpush3.bf16.msra.mxu0 %v7234_v11  ;;  %v5388_v12 = vld [vmem:[#allocation20 + $0xd0] sm:$0xff]  }
 0x4dd   : > { %4797 = vmatprep.subr.bf16.mxu0 %v7231_v10  ;;  %4823 = vmatprep.subr.bf16.mxu1 %v7224_v0 }
 0x4e0   : > { %4798 = vmatpush3.bf16.msra.mxu0 %v7231_v10 }
 0x4e1   : > { %4807 = vmatprep.subr.bf16.mxu0 %v7224_v0 }
 0x4e3   : > { %4784 = vmatmul.mubr.msk.bf16.vlgmr.msra.gmra.mrb[16].mxu1 %vm1770_vm1, %v1763_v3  ;;  %4800 = vmatmul.mubr.msk.bf16.vlgmr.msra.gmra.mrb[24].mxu0 %vm1468_vm0, %v5361_v13  ;;  %v5366_v3 = vld [vmem:[#allocation20 + $0x28] sm:$0xff]   ;;  %v5389_v13 = vld [vmem:[#allocation20 + $0xd8] sm:$0xff]  }
 0x4e4   : > { %4787 = vmatprep.mubr.msk.bf16.mxu1 %vm1770_vm1, %v1764_v51  ;;  %4808 = vmatpush3.bf16.msra.mxu0 %v7224_v0  ;;  %v5380_v51 = vld [vmem:[#allocation20 + $0xa0] sm:$0xff]  }
 0x4e5   : > { %4824 = vmatpush3.bf16.msra.mxu1 %v7224_v0  ;;  %4809 = vmatprep.subr.bf16.mxu0 %v7222_v60 }
 0x4e6   : > { %4825 = vmatprep.subr.bf16.mxu1 %v7222_v60  ;;  %4803 = vmatprep.mubr.msk.bf16.mxu0 %vm1468_vm0, %v5362_v14  ;;  %v5390_v14 = vld [vmem:[#allocation20 + $0x100] sm:$0xff]  }
 0x4e8   : > { %4810 = vmatpush3.bf16.msra.mxu0 %v7222_v60 }
 0x4e9   : > { %4826 = vmatpush3.bf16.msra.mxu1 %v7222_v60  ;;  %4811 = vmatprep.subr.bf16.mxu0 %v7234_v11 }
 0x4ea   : > { %4827 = vmatprep.subr.bf16.mxu1 %v7234_v11 }
 0x4eb   : > { %4788 = vmatmul.mubr.msk.bf16.gmra.mrb[20].mxu1 %vm1770_vm1, %v1765_v50  ;;  %4804 = vmatmul.mubr.msk.bf16.gmra.mrb[28].mxu0 %vm1468_vm0, %v5363_v15  ;;  %v5379_v50 = vld [vmem:[#allocation20 + $0x98] sm:$0xff]   ;;  %v5392_v15 = vld [vmem:[#allocation20 + $0xf0] sm:$0xff]  }
 0x4ec   : > { %4812 = vmatpush3.bf16.msra.mxu0 %v7234_v11  ;;  %4815 = vmatprep.mubr.msk.bf16.mxu0 %vm1468_vm0, %v5364_v61  ;;  %v5393_v61 = vld [vmem:[#allocation20 + $0xf8] sm:$0xff]  }
 0x4ed   : > { %4828 = vmatpush3.bf16.msra.mxu1 %v7234_v11  ;;  %4813 = vmatprep.subr.bf16.mxu0 %v7231_v10 }
 0x4ee   : > { %4829 = vmatprep.subr.bf16.mxu1 %v7231_v10  ;;  %4831 = vmatprep.mubr.msk.bf16.mxu1 %vm1468_vm0, %v5365_v62  ;;  %v5391_v62 = vld [vmem:[#allocation20 + $0x108] sm:$0xff]  }
 0x4f0   : > { %4814 = vmatpush3.bf16.msra.mxu0 %v7231_v10 }
 0x4f1   : > { %4830 = vmatpush3.bf16.msra.mxu1 %v7231_v10  ;;  %4839 = vmatprep.subr.bf16.mxu0 %v7224_v0 }
 0x4f2   : > { %4855 = vmatprep.subr.bf16.mxu1 %v7224_v0 }
 0x4f3   : > { %4816 = vmatmul.mubr.msk.bf16.vlgmr.msra.gmra.mrb[32].mxu0 %vm1468_vm0, %v5366_v3  ;;  %v5394_v3 = vld [vmem:[#allocation20 + $0x110] sm:$0xff]  }
 0x4f4   : > { %4832 = vmatmul.mubr.msk.bf16.vlgmr.msra.gmra.mrb[24].mxu1 %vm1468_vm0, %v5367_v17  ;;  %4840 = vmatpush3.bf16.msra.mxu0 %v7224_v0  ;;  %v5395_v17 = vld [vmem:[#allocation20 + $0x118] sm:$0xff]  }
 0x4f5   : > { %4856 = vmatpush3.bf16.msra.mxu1 %v7224_v0  ;;  %4841 = vmatprep.subr.bf16.mxu0 %v7222_v60 }
 0x4f6   : > { %4857 = vmatprep.subr.bf16.mxu1 %v7222_v60  ;;  %4819 = vmatprep.mubr.msk.bf16.mxu0 %vm1468_vm0, %v5368_v23 }
 0x4f7   : > { %4835 = vmatprep.mubr.msk.bf16.mxu1 %vm1468_vm0, %v5369_v28 }
 0x4f8   : > { %4842 = vmatpush3.bf16.msra.mxu0 %v7222_v60 }
 0x4f9   : > { %4858 = vmatpush3.bf16.msra.mxu1 %v7222_v60  ;;  %4843 = vmatprep.subr.bf16.mxu0 %v7234_v11 }
 0x4fa   : > { %4859 = vmatprep.subr.bf16.mxu1 %v7234_v11 }
 0x4fb   : > { %4820 = vmatmul.mubr.msk.bf16.gmra.mrb[36].mxu0 %vm1468_vm0, %v5370_v30 }
 0x4fc   : > { %4836 = vmatmul.mubr.msk.bf16.gmra.mrb[28].mxu1 %vm1468_vm0, %v5371_v35  ;;  %4844 = vmatpush3.bf16.msra.mxu0 %v7234_v11 }
 0x4fd   : > { %4860 = vmatpush3.bf16.msra.mxu1 %v7234_v11  ;;  %4845 = vmatprep.subr.bf16.mxu0 %v7231_v10 }
 0x4fe   : > { %4861 = vmatprep.subr.bf16.mxu1 %v7231_v10  ;;  %4847 = vmatprep.mubr.msk.bf16.mxu0 %vm1468_vm0, %v5372_v37 }
 0x4ff   : > { %4863 = vmatprep.mubr.msk.bf16.mxu1 %vm1468_vm0, %v5373_v42 }
 0x500   : > { %4846 = vmatpush3.bf16.msra.mxu0 %v7231_v10 }
 0x501   : > { %4862 = vmatpush3.bf16.msra.mxu1 %v7231_v10  ;;  %4871 = vmatprep.subr.bf16.mxu0 %v7224_v0 }
 0x502   : > { %4887 = vmatprep.subr.bf16.mxu1 %v7224_v0 }
 0x503   : > { %4848 = vmatmul.mubr.msk.bf16.vlgmr.msra.gmra.mrb[40].mxu0 %vm1468_vm0, %v5374_v44 }
 0x504   : > { %4864 = vmatmul.mubr.msk.bf16.vlgmr.msra.gmra.mrb[32].mxu1 %vm1468_vm0, %v5375_v45  ;;  %4872 = vmatpush3.bf16.msra.mxu0 %v7224_v0 }
 0x505   : > { %4888 = vmatpush3.bf16.msra.mxu1 %v7224_v0  ;;  %4873 = vmatprep.subr.bf16.mxu0 %v7222_v60 }
 0x506   : > { %4889 = vmatprep.subr.bf16.mxu1 %v7222_v60  ;;  %4851 = vmatprep.mubr.msk.bf16.mxu0 %vm1468_vm0, %v5376_v47 }
 0x507   : > { %4867 = vmatprep.mubr.msk.bf16.mxu1 %vm1468_vm0, %v5377_v48 }
 0x508   : > { %4874 = vmatpush3.bf16.msra.mxu0 %v7222_v60 }
 0x509   : > { %4890 = vmatpush3.bf16.msra.mxu1 %v7222_v60  ;;  %4875 = vmatprep.subr.bf16.mxu0 %v7234_v11 }
 0x50a   : > { %4891 = vmatprep.subr.bf16.mxu1 %v7234_v11 }
 0x50b   : > { %4852 = vmatmul.mubr.msk.bf16.gmra.mrb[44].mxu0 %vm1468_vm0, %v5378_v49 }
 0x50c   : > { %4868 = vmatmul.mubr.msk.bf16.gmra.mrb[36].mxu1 %vm1468_vm0, %v5379_v50  ;;  %4876 = vmatpush3.bf16.msra.mxu0 %v7234_v11 }
 0x50d   : > { %4892 = vmatpush3.bf16.msra.mxu1 %v7234_v11  ;;  %4877 = vmatprep.subr.bf16.mxu0 %v7231_v10 }
 0x50e   : > { %4893 = vmatprep.subr.bf16.mxu1 %v7231_v10  ;;  %4879 = vmatprep.mubr.msk.bf16.mxu0 %vm1468_vm0, %v5380_v51 }
 0x50f   : > { %4895 = vmatprep.mubr.msk.bf16.mxu1 %vm1468_vm0, %v5381_v52 }
 0x510   : > { %4878 = vmatpush3.bf16.msra.mxu0 %v7231_v10 }
 0x511   : > { %4894 = vmatpush3.bf16.msra.mxu1 %v7231_v10  ;;  %4903 = vmatprep.subr.bf16.mxu0 %v7224_v0 }
 0x512   : > { %4919 = vmatprep.subr.bf16.mxu1 %v7224_v0 }
 0x513   : > { %4880 = vmatmul.mubr.msk.bf16.vlgmr.msra.gmra.mrb[48].mxu0 %vm1468_vm0, %v5382_v53 }
 0x514   : > { %4896 = vmatmul.mubr.msk.bf16.vlgmr.msra.gmra.mrb[40].mxu1 %vm1468_vm0, %v5383_v54  ;;  %4904 = vmatpush3.bf16.msra.mxu0 %v7224_v0 }
 0x515   : > { %4920 = vmatpush3.bf16.msra.mxu1 %v7224_v0  ;;  %4905 = vmatprep.subr.bf16.mxu0 %v7222_v60 }
 0x516   : > { %4921 = vmatprep.subr.bf16.mxu1 %v7222_v60  ;;  %4883 = vmatprep.mubr.msk.bf16.mxu0 %vm1468_vm0, %v5384_v55 }
 0x517   : > { %4899 = vmatprep.mubr.msk.bf16.mxu1 %vm1468_vm0, %v5388_v12 }
 0x518   : > { %4906 = vmatpush3.bf16.msra.mxu0 %v7222_v60 }
 0x519   : > { %4922 = vmatpush3.bf16.msra.mxu1 %v7222_v60  ;;  %4907 = vmatprep.subr.bf16.mxu0 %v7234_v11 }
 0x51a   : > { %4923 = vmatprep.subr.bf16.mxu1 %v7234_v11 }
 0x51b   : > { %4884 = vmatmul.mubr.msk.bf16.gmra.mrb[52].mxu0 %vm1468_vm0, %v5385_v43 }
 0x51c   : > { %4908 = vmatpush3.bf16.msra.mxu0 %v7234_v11  ;;  %4911 = vmatprep.mubr.msk.bf16.mxu0 %vm1468_vm0, %v5386_v46 }
 0x51d   : > { %4924 = vmatpush3.bf16.msra.mxu1 %v7234_v11  ;;  %4909 = vmatprep.subr.bf16.mxu0 %v7231_v10 }
 0x51e   : > { %4925 = vmatprep.subr.bf16.mxu1 %v7231_v10  ;;  %4900 = vmatmul.mubr.msk.bf16.gmra.mrb[44].mxu1 %vm1468_vm0, %v5389_v13 }
 0x51f   : > { %4927 = vmatprep.mubr.msk.bf16.mxu1 %vm1468_vm0, %v5390_v14 }
 0x520   : > { %4910 = vmatpush3.bf16.msra.mxu0 %v7231_v10 }
 0x521   : > { %4926 = vmatpush3.bf16.msra.mxu1 %v7231_v10  ;;  %4935 = vmatprep.subr.bf16.mxu0 %v7224_v0 }
 0x523   : > { %4912 = vmatmul.mubr.msk.bf16.vlgmr.msra.gmra.mrb[56].mxu0 %vm1468_vm0, %v5387_v56 }
 0x524   : > { %4936 = vmatpush3.bf16.msra.mxu0 %v7224_v0  ;;  %4915 = vmatprep.mubr.msk.bf16.mxu0 %vm1468_vm0, %v5392_v15 }
 0x525   : > { %4937 = vmatprep.subr.bf16.mxu0 %v7222_v60 }
 0x526   : > { %4928 = vmatmul.mubr.msk.bf16.vlgmr.msra.gmra.mrb[48].mxu1 %vm1468_vm0, %v5391_v62  ;;  %v2063_v62 = vlaneseq }
 0x527   : > { %4931 = vmatprep.mubr.msk.bf16.mxu1 %vm1468_vm0, %v5394_v3 }
 0x528   : > { %4938 = vmatpush3.bf16.msra.mxu0 %v7222_v60 }
 0x529   : > { %4939 = vmatprep.subr.bf16.mxu0 %v7234_v11 }
 0x52b   : > { %4916 = vmatmul.mubr.msk.bf16.gmra.mrb[60].mxu0 %vm1468_vm0, %v5393_v61 }
 0x52c   : > { %4940 = vmatpush3.bf16.msra.mxu0 %v7234_v11 }
 0x52d   : > { %4941 = vmatprep.subr.bf16.mxu0 %v7231_v10 }
 0x52e   : > { %4932 = vmatmul.mubr.msk.bf16.gmra.mrb[52].mxu1 %vm1468_vm0, %v5395_v17  ;;  %v5396_v17 = vld [vmem:[#allocation25] sm:$0xff]  }
 0x52f   : > { %4951 = vmatprep.subr.bf16.mxu1 %v5396_v17 }
 0x530   : > { %4942 = vmatpush3.bf16.msra.mxu0 %v7231_v10  ;;  %4952 = vmatpush3.bf16.msra.mxu1 %v5396_v17 }
 0x5b6   : > { %v4785_v57 = vpop.f32.mrb[16].mxu1  ;;  %v4801_v61 = vpop.f32.mrb[24].mxu0 }
 0x5b7   : > { %v1829_v58 = vpop.f32.mrb[17].mxu1  ;;  %v1866_v59 = vsel %vm1468_vm0, %v4785_v57, -inf }
 0x5b8   : > { %1867 = vmax.xlane.f32.xlu1 %v1866_v59  ;;  %v4786_v1 = vpop.f32.mrb[18].mxu1  ;;  %v1860_v0 = vsel %vm1468_vm0, %v1829_v58, -inf }
 0x5b9   : > { %1861 = vmax.xlane.f32.xlu0 %v1860_v0  ;;  %v1832_v2 = vpop.f32.mrb[19].mxu1  ;;  %v1869_v60 = vsel %vm1468_vm0, %v4786_v1, -inf }
 0x5ba   : > { %v1863_v63 = vsel %vm1468_vm0, %v1832_v2, -inf }
 0x5bc   : > { %1870 = vmax.xlane.f32.xlu1 %v1869_v60 }
 0x5bd   : > { %1864 = vmax.xlane.f32.xlu0 %v1863_v63 }
 0x5be   : > { %v4789_v4 = vpop.f32.mrb[20].mxu1 }
 0x5bf   : > { %v1845_v5 = vpop.f32.mrb[21].mxu1  ;;  %v1878_v10 = vsel %vm1468_vm0, %v4789_v4, -inf }
 0x5c0   : > { %v4790_v6 = vpop.f32.mrb[22].mxu1  ;;  %v1872_v7 = vsel %vm1468_vm0, %v1845_v5, -inf }
 0x5c1   : > { %1873 = vmax.xlane.f32.xlu0 %v1872_v7  ;;  %v1848_v8 = vpop.f32.mrb[23].mxu1  ;;  %v1881_v11 = vsel %vm1468_vm0, %v4790_v6, -inf }
 0x5c2   : > { %v1875_v9 = vsel %vm1468_vm0, %v1848_v8, -inf }
 0x5c3   : > { %1876 = vmax.xlane.f32.xlu1 %v1875_v9 }
 0x5c5   : > { %1879 = vmax.xlane.f32.xlu0 %v1878_v10 }
 0x5c7   : > { %1882 = vmax.xlane.f32.xlu1 %v1881_v11  ;;  %v4833_v3 = vpop.f32.mrb[24].mxu1 }
 0x645   : > { %v1868_v23 = vpop.xlane.xlu1 %1867 }
 0x646   : > { %v1886_v28 = vsub.f32 %v4785_v57, %v1868_v23  ;;  %v1862_v30 = vpop.xlane.xlu0 %1861  ;;  %v2032_v23 = vpop.f32.mrb[25].mxu0 }
 0x647   : > { %v1884_v35 = vsub.f32 %v1829_v58, %v1862_v30  ;;  %v5397_v30 = vld [vmem:[#allocation25 + $0x8] sm:$0xff]  }
 0x648   : > { %v1896_v37 = vmul.f32 1.442695, %v1886_v28  ;;  %v2284_v28 = vpop.f32.mrb[25].mxu1  ;;  %4953 = vmatprep.subr.bf16.mxu1 %v5397_v30 }
 0x649   : > { %v1892_v42 = vmul.f32 1.442695, %v1884_v35  ;;  %v1871_v44 = vpop.xlane.xlu1 %1870  ;;  %v7394_v35 = vshrl.u32 %v2063_v62, 7  ;;  %4954 = vmatpush3.bf16.msra.mxu1 %v5397_v30 }
 0x64a   : > { %v1887_v45 = vsub.f32 %v4786_v1, %v1871_v44  ;;  %v1865_v47 = vpop.xlane.xlu0 %1864  ;;  %v7396_v44 = vld [vmem:[#allocation22] sm:$0xff] }
 0x64b   : > { %5484 = vpow2.f32 %v1892_v42  ;;  %v1885_v48 = vsub.f32 %v1832_v2, %v1865_v47  ;;  %v4834_v42 = vpop.f32.mrb[26].mxu1 }
 0x64c   : > { %5486 = vpow2.f32 %v1896_v37  ;;  %v1898_v49 = vmul.f32 1.442695, %v1887_v45  ;;  %v4802_v37 = vpop.f32.mrb[26].mxu0  ;;  %v2287_v47 = vpop.f32.mrb[27].mxu1 }
 0x64d   : > { %v1894_v50 = vmul.f32 1.442695, %v1885_v48  ;;  %v2035_v45 = vpop.f32.mrb[27].mxu0  ;;  %v2065_v48 = vsub.s32 0, %v7394_v35 }
 0x64e   : > { %v1874_v51 = vpop.xlane.xlu0 %1873 }
 0x64f   : > { %5488 = vpow2.f32 %v1894_v50  ;;  %v1888_v52 = vsub.f32 %v1845_v5, %v1874_v51  ;;  %v2191_v50 = vsub.s32 1, %v7394_v35  ;;  %v2317_v51 = vsub.s32 2, %v7394_v35 }
 0x650   : > { %v1877_v53 = vpop.xlane.xlu1 %1876  ;;  %5490 = vpow2.f32 %v1898_v49  ;;  %v4805_v49 = vpop.f32.mrb[28].mxu0 }
 0x651   : > { %v1900_v54 = vmul.f32 1.442695, %v1888_v52  ;;  %v1889_v55 = vsub.f32 %v1848_v8, %v1877_v53  ;;  %v4837_v52 = vpop.f32.mrb[28].mxu1  ;;  %v2443_v53 = vsub.s32 3, %v7394_v35 }
 0x652   : > { %v1880_v43 = vpop.xlane.xlu0 %1879 }
 0x653   : > { %5492 = vpow2.f32 %v1900_v54  ;;  %v1902_v46 = vmul.f32 1.442695, %v1889_v55  ;;  %v1890_v56 = vsub.f32 %v4789_v4, %v1880_v43  ;;  %v2048_v54 = vpop.f32.mrb[29].mxu0  ;;  %v2300_v55 = vpop.f32.mrb[29].mxu1  ;;  %v2569_v43 = vsub.s32 4, %v7394_v35 }
 0x654   : > { %v1883_v57 = vpop.xlane.xlu1 %1882 }
 0x655   : > { %v7362_v58 = vpop.eup %5484  ;;  %5494 = vpow2.f32 %v1902_v46  ;;  %v1904_v59 = vmul.f32 1.442695, %v1890_v56  ;;  %v1891_v1 = vsub.f32 %v4790_v6, %v1883_v57  ;;  %v2695_v46 = vsub.s32 5, %v7394_v35 }
 0x656   : > { %v1908_v0 = vsel %vm1468_vm0, %v7362_v58, 0.0  ;;  %v7366_v2 = vpop.eup %5486  ;;  %v2821_v56 = vsub.s32 6, %v7394_v35  ;;  %v2066_v57 = vrot.slane %v7396_v44, %v2065_v48 }
 0x657   : > { %5496 = vpow2.f32 %v1904_v59  ;;  %v1906_v60 = vmul.f32 1.442695, %v1891_v1  ;;  %1909 = vadd.xlane.f32.xlu0 %v1908_v0  ;;  %v1914_v4 = vsel %vm1468_vm0, %v7366_v2, 0.0  ;;  %v4806_v59 = vpop.f32.mrb[30].mxu0  ;;  %v2192_v1 = vrot.slane %v7396_v44, %v2191_v50 }
 0x658   : > { %v2318_v0 = vrot.slane %v7396_v44, %v2317_v51  ;;  %v7416_v48 = vrot.slane %v7396_v44, %v2695_v46  ;;  %v7419_v50 = vrot.slane %v7396_v44, %v2821_v56  ;;  %v2070_v51 = vmul.f32 %v4802_v37, %v2066_v57 }
 0x659   : > { %v7368_v63 = vpop.eup %5488  ;;  %5498 = vpow2.f32 %v1906_v60  ;;  %v4838_v60 = vpop.f32.mrb[30].mxu1  ;;  %v2073_v26 = vmul.f32 %v4805_v49, %v2066_v57  ;;  %v2071_v27 = vmul.f32 %v2066_v57, %v2048_v54  ;;  %v2074_v24 = vmul.f32 %v4806_v59, %v2066_v57 }
 0x65a   : > { %v1911_v5 = vsel %vm1468_vm0, %v7368_v63, 0.0  ;;  %v7374_v7 = vpop.eup %5490  ;;  %v2321_v30 = vmul.f32 %v4833_v3, %v2318_v0  ;;  %v2322_v34 = vmul.f32 %v4834_v42, %v2318_v0  ;;  %v2320_v49 = vmul.f32 %v2318_v0, %v2287_v47 }
 0x65b   : > { %1915 = vadd.xlane.f32.xlu0 %v1914_v4  ;;  %1912 = vadd.xlane.f32.xlu1 %v1911_v5  ;;  %v1917_v9 = vsel %vm1468_vm0, %v7374_v7, 0.0  ;;  %v2051_v4 = vpop.f32.mrb[31].mxu0  ;;  %v7409_v5 = vrot.slane %v7396_v44, %v2443_v53  ;;  %v2068_v53 = vmul.f32 %v2066_v57, %v2035_v45  ;;  %v2323_v32 = vmul.f32 %v2318_v0, %v2300_v55 }
 0x65c   : > { %v4817_v62 = vpop.f32.mrb[32].mxu0  ;;  %v2072_v22 = vmul.f32 %v2066_v57, %v2051_v4 }
 0x65d   : > { %v7376_v6 = vpop.eup %5492  ;;  %v2158_v40 = vpop.f32.mrb[33].mxu0  ;;  %v2195_v41 = vmul.f32 %v4817_v62, %v2192_v1 }
 0x65e   : > { %v1920_v8 = vsel %vm1468_vm0, %v7376_v6, 0.0  ;;  %v2193_v16 = vmul.f32 %v2192_v1, %v2158_v40  ;;  %v2325_v40 = vmul.f32 %v4837_v52, %v2318_v0 }
 0x65f   : > { %v7382_v10 = vpop.eup %5494  ;;  %1921 = vadd.xlane.f32.xlu0 %v1920_v8  ;;  %1918 = vadd.xlane.f32.xlu1 %v1917_v9  ;;  %v2303_v8 = vpop.f32.mrb[31].mxu1  ;;  %v7412_v9 = vrot.slane %v7396_v44, %v2569_v43 }
 0x660   : > { %v1923_v13 = vsel %vm1468_vm0, %v7382_v10, 0.0  ;;  %v4865_v17 = vpop.f32.mrb[32].mxu1 }
 0x661   : > { %v7384_v11 = vpop.eup %5496  ;;  %v2536_v43 = vpop.f32.mrb[33].mxu1 }
 0x662   : > { %v1926_v12 = vsel %vm1468_vm0, %v7384_v11, 0.0 }
 0x663   : > { %v7390_v14 = vpop.eup %5498  ;;  %1927 = vadd.xlane.f32.xlu0 %v1926_v12  ;;  %1924 = vadd.xlane.f32.xlu1 %v1923_v13  ;;  %v2069_v13 = vmul.f32 %v4801_v61, %v2066_v57  ;;  %v4818_v12 = vpop.f32.mrb[34].mxu0  ;;  %v2319_v61 = vmul.f32 %v2318_v0, %v2284_v28 }
 0x664   : > { %v1929_v15 = vsel %vm1468_vm0, %v7390_v14, 0.0  ;;  %v2196_v25 = vmul.f32 %v4818_v12, %v2192_v1  ;;  %v2161_v46 = vpop.f32.mrb[35].mxu0 }
 0x665   : > { %v2203_v56 = vadd.f32 %v2195_v41, %v2069_v13  ;;  %v2194_v37 = vmul.f32 %v2192_v1, %v2161_v46  ;;  %v4821_v45 = vpop.f32.mrb[36].mxu0  ;;  %v2326_v13 = vmul.f32 %v4838_v60, %v2318_v0 }
 0x666   : > { %v2204_v39 = vadd.f32 %v2196_v25, %v2070_v51  ;;  %v2199_v33 = vmul.f32 %v4821_v45, %v2192_v1  ;;  %v2174_v62 = vpop.f32.mrb[37].mxu0  ;;  %v2324_v45 = vmul.f32 %v2318_v0, %v2303_v8 }
 0x667   : > { %1930 = vadd.xlane.f32.xlu1 %v1929_v15  ;;  %v2067_v15 = vmul.f32 %v2066_v57, %v2032_v23  ;;  %v4866_v23 = vpop.f32.mrb[34].mxu1  ;;  %v2329_v28 = vadd.f32 %v2321_v30, %v2203_v56  ;;  %v2202_v31 = vadd.f32 %v2194_v37, %v2068_v53  ;;  %v2197_v57 = vmul.f32 %v2192_v1, %v2174_v62  ;;  %v4822_v4 = vpop.f32.mrb[38].mxu0 }
 0x668   : > { %v2539_v38 = vpop.f32.mrb[35].mxu1  ;;  %v2207_v42 = vadd.f32 %v2199_v33, %v2073_v26  ;;  %v2330_v29 = vadd.f32 %v2322_v34, %v2204_v39  ;;  %v2200_v41 = vmul.f32 %v4822_v4, %v2192_v1  ;;  %v2573_v30 = vmul.f32 %v4865_v17, %v7412_v9 }
 0x669   : > { %v2201_v36 = vadd.f32 %v2193_v16, %v2067_v15  ;;  %v4869_v54 = vpop.f32.mrb[36].mxu1  ;;  %v2177_v16 = vpop.f32.mrb[39].mxu0  ;;  %v2205_v47 = vadd.f32 %v2197_v57, %v2071_v27  ;;  %v2328_v46 = vadd.f32 %v2320_v49, %v2202_v31  ;;  %v2571_v27 = vmul.f32 %v7412_v9, %v2536_v43 }
 0x66a   : > { %v2552_v3 = vpop.f32.mrb[37].mxu1  ;;  %v2198_v25 = vmul.f32 %v2192_v1, %v2177_v16  ;;  %v4849_v51 = vpop.f32.mrb[40].mxu0  ;;  %v2208_v55 = vadd.f32 %v2200_v41, %v2074_v24  ;;  %v2333_v21 = vadd.f32 %v2325_v40, %v2207_v42  ;;  %v2574_v8 = vmul.f32 %v4866_v23, %v7412_v9 }
 0x66b   : > { %v2327_v59 = vadd.f32 %v2319_v61, %v2201_v36  ;;  %v4870_v12 = vpop.f32.mrb[38].mxu1  ;;  %v2447_v53 = vmul.f32 %v4849_v51, %v7409_v5  ;;  %v2410_v36 = vpop.f32.mrb[41].mxu0  ;;  %v2331_v26 = vadd.f32 %v2323_v32, %v2205_v47  ;;  %v2572_v32 = vmul.f32 %v7412_v9, %v2539_v38 }
 0x66c   : > { %v2555_v15 = vpop.f32.mrb[39].mxu1  ;;  %v2206_v33 = vadd.f32 %v2198_v25, %v2072_v22  ;;  %v2445_v34 = vmul.f32 %v7409_v5, %v2410_v36  ;;  %v4850_v39 = vpop.f32.mrb[42].mxu0  ;;  %v2334_v1 = vadd.f32 %v2326_v13, %v2208_v55  ;;  %v2575_v16 = vmul.f32 %v7412_v9, %v2552_v3 }
 0x66d   : > { %v4897_v52 = vpop.f32.mrb[40].mxu1  ;;  %v2455_v60 = vadd.f32 %v2447_v53, %v2329_v28  ;;  %v2448_v0 = vmul.f32 %v4850_v39, %v7409_v5  ;;  %v2413_v24 = vpop.f32.mrb[43].mxu0  ;;  %v2577_v28 = vmul.f32 %v4869_v54, %v7412_v9  ;;  %v2576_v54 = vmul.f32 %v7412_v9, %v2555_v15 }
 0x66e   : > { %v2788_v61 = vpop.f32.mrb[41].mxu1  ;;  %v2332_v37 = vadd.f32 %v2324_v45, %v2206_v33  ;;  %v2453_v49 = vadd.f32 %v2445_v34, %v2327_v59  ;;  %v2446_v17 = vmul.f32 %v7409_v5, %v2413_v24  ;;  %v4853_v22 = vpop.f32.mrb[44].mxu0 }
 0x66f   : > { %v4898_v31 = vpop.f32.mrb[42].mxu1  ;;  %v2456_v62 = vadd.f32 %v2448_v0, %v2330_v29  ;;  %v2581_v40 = vadd.f32 %v2573_v30, %v2455_v60  ;;  %v2451_v43 = vmul.f32 %v4853_v22, %v7409_v5  ;;  %v2426_v57 = vpop.f32.mrb[45].mxu0  ;;  %v2578_v29 = vmul.f32 %v4870_v12, %v7412_v9 }
 0x670   : > { %v2791_v56 = vpop.f32.mrb[43].mxu1  ;;  %v2454_v4 = vadd.f32 %v2446_v17, %v2328_v46  ;;  %v2579_v42 = vadd.f32 %v2571_v27, %v2453_v49  ;;  %v2449_v41 = vmul.f32 %v7409_v5, %v2426_v57  ;;  %v4854_v23 = vpop.f32.mrb[46].mxu0  ;;  %v2823_v12 = vmul.f32 %v7419_v50, %v2788_v61 }
 0x671   : > { %v2459_v59 = vadd.f32 %v2451_v43, %v2333_v21  ;;  %v2582_v13 = vadd.f32 %v2574_v8, %v2456_v62  ;;  %v2452_v47 = vmul.f32 %v4854_v23, %v7409_v5  ;;  %v2429_v25 = vpop.f32.mrb[47].mxu0  ;;  %v2825_v21 = vmul.f32 %v4897_v52, %v7419_v50 }
 0x672   : > { %v2457_v38 = vadd.f32 %v2449_v41, %v2331_v26  ;;  %v2580_v51 = vadd.f32 %v2572_v32, %v2454_v4  ;;  %v2450_v45 = vmul.f32 %v7409_v5, %v2429_v25  ;;  %v4881_v55 = vpop.f32.mrb[48].mxu0  ;;  %v2826_v9 = vmul.f32 %v4898_v31, %v7419_v50 }
 0x673   : > { %v2460_v46 = vadd.f32 %v2452_v47, %v2334_v1  ;;  %v2585_v53 = vadd.f32 %v2577_v28, %v2459_v59  ;;  %v2699_v36 = vmul.f32 %v4881_v55, %v7416_v48  ;;  %v2662_v30 = vpop.f32.mrb[49].mxu0  ;;  %v2824_v52 = vmul.f32 %v7419_v50, %v2791_v56 }
 0x674   : > { %v2458_v3 = vadd.f32 %v2450_v45, %v2332_v37  ;;  %v2583_v33 = vadd.f32 %v2575_v16, %v2457_v38  ;;  %v2697_v34 = vmul.f32 %v7416_v48, %v2662_v30  ;;  %v4882_v39 = vpop.f32.mrb[50].mxu0  ;;  %v7795_v61 = vsub.s32 7, %v7394_v35 }
 0x675   : > { %v2586_v26 = vadd.f32 %v2578_v29, %v2460_v46  ;;  %v2707_v27 = vadd.f32 %v2699_v36, %v2581_v40  ;;  %v2700_v5 = vmul.f32 %v4882_v39, %v7416_v48  ;;  %v2665_v60 = vpop.f32.mrb[51].mxu0  ;;  %v4901_v46 = vpop.f32.mrb[44].mxu1 }
 0x676   : > { %v2584_v15 = vadd.f32 %v2576_v54, %v2458_v3  ;;  %v2705_v1 = vadd.f32 %v2697_v34, %v2579_v42  ;;  %v2698_v0 = vmul.f32 %v7416_v48, %v2665_v60  ;;  %v4885_v24 = vpop.f32.mrb[52].mxu0  ;;  %v2948_v22 = vrot.slane %v7396_v44, %v7795_v61  ;;  %v2804_v36 = vpop.f32.mrb[45].mxu1 }
 0x677   : > { %v2708_v8 = vadd.f32 %v2700_v5, %v2582_v13  ;;  %v2833_v37 = vadd.f32 %v2825_v21, %v2707_v27  ;;  %v2703_v49 = vmul.f32 %v4885_v24, %v7416_v48  ;;  %v2678_v17 = vpop.f32.mrb[53].mxu0  ;;  %v4902_v21 = vpop.f32.mrb[46].mxu1 }
 0x678   : > { %v2706_v32 = vadd.f32 %v2698_v0, %v2580_v51  ;;  %v2831_v62 = vadd.f32 %v2823_v12, %v2705_v1  ;;  %v2701_v31 = vmul.f32 %v7416_v48, %v2678_v17  ;;  %v4886_v40 = vpop.f32.mrb[54].mxu0  ;;  %v2830_v39 = vmul.f32 %v4902_v21, %v7419_v50  ;;  %v2807_v12 = vpop.f32.mrb[47].mxu1 }
 0x679   : > { %v2711_v43 = vadd.f32 %v2703_v49, %v2585_v53  ;;  %v2834_v57 = vadd.f32 %v2826_v9, %v2708_v8  ;;  %v2704_v28 = vmul.f32 %v4886_v40, %v7416_v48  ;;  %v2681_v4 = vpop.f32.mrb[55].mxu0  ;;  %v2829_v53 = vmul.f32 %v4901_v46, %v7419_v50  ;;  %v4426_v8 = vld [vmem:[#allocation22 + $0x8] ss:$0 sm:$0xff]  ;;  %v4929_v17 = vpop.f32.mrb[48].mxu1 }
 0x67a   : > { %v2709_v56 = vadd.f32 %v2701_v31, %v2583_v33  ;;  %v2832_v42 = vadd.f32 %v2824_v52, %v2706_v32  ;;  %v2702_v41 = vmul.f32 %v7416_v48, %v2681_v4  ;;  %v4913_v23 = vpop.f32.mrb[56].mxu0  ;;  %v2827_v48 = vmul.f32 %v7419_v50, %v2804_v36 }
 0x67b   : > { %v2712_v16 = vadd.f32 %v2704_v28, %v2586_v26  ;;  %v2951_v59 = vmul.f32 %v4913_v23, %v2948_v22  ;;  %v2914_v35 = vpop.f32.mrb[57].mxu0  ;;  %v2837_v34 = vadd.f32 %v2829_v53, %v2711_v43  ;;  %v2828_v60 = vmul.f32 %v7419_v50, %v2807_v12 }
 0x67c   : > { %v2710_v13 = vadd.f32 %v2702_v41, %v2584_v15  ;;  %v2949_v44 = vmul.f32 %v2948_v22, %v2914_v35  ;;  %v4914_v47 = vpop.f32.mrb[58].mxu0  ;;  %v2835_v5 = vadd.f32 %v2827_v48, %v2709_v56  ;;  %v3077_v32 = vmul.f32 %v4929_v17, %v4426_v8 }
 0x67d   : > { %v2959_v25 = vadd.f32 %v2951_v59, %v2833_v37  ;;  %v2952_v29 = vmul.f32 %v4914_v47, %v2948_v22  ;;  %v2917_v38 = vpop.f32.mrb[59].mxu0  ;;  %v2838_v1 = vadd.f32 %v2830_v39, %v2712_v16 }
 0x67e   : > { %v2957_v51 = vadd.f32 %v2949_v44, %v2831_v62  ;;  %v2950_v45 = vmul.f32 %v2948_v22, %v2917_v38  ;;  %v4917_v30 = vpop.f32.mrb[60].mxu0  ;;  %v2836_v52 = vadd.f32 %v2828_v60, %v2710_v13  ;;  %v3040_v62 = vpop.f32.mrb[49].mxu1 }
 0x67f   : > { %v2960_v55 = vadd.f32 %v2952_v29, %v2834_v57  ;;  %v2955_v3 = vmul.f32 %v4917_v30, %v2948_v22  ;;  %v2930_v33 = vpop.f32.mrb[61].mxu0  ;;  %v3075_v31 = vmul.f32 %v4426_v8, %v3040_v62  ;;  %v4930_v40 = vpop.f32.mrb[50].mxu1  ;;  %v7456_v43 = vadd.f32 %v3077_v32, %v2959_v25 }
 0x680   : > { %v2958_v54 = vadd.f32 %v2950_v45, %v2832_v42  ;;  %v2953_v26 = vmul.f32 %v2948_v22, %v2930_v33  ;;  %v4918_v27 = vpop.f32.mrb[62].mxu0  ;;  %v3078_v57 = vmul.f32 %v4930_v40, %v4426_v8  ;;  %v3043_v28 = vpop.f32.mrb[51].mxu1 }
 0x681   : > { %v2956_v9 = vmul.f32 %v4918_v27, %v2948_v22  ;;  %v2933_v15 = vpop.f32.mrb[63].mxu0  ;;  %v2963_v0 = vadd.f32 %v2955_v3, %v2837_v34  ;;  %v7458_v50 = vadd.f32 %v3075_v31, %v2957_v51  ;;  %v3076_v4 = vmul.f32 %v4426_v8, %v3043_v28  ;;  %v4933_v42 = vpop.f32.mrb[52].mxu1 }
 0x682   : > { %v2954_v24 = vmul.f32 %v2948_v22, %v2933_v15  ;;  %v2961_v37 = vadd.f32 %v2953_v26, %v2835_v5  ;;  %v7460_v56 = vadd.f32 %v3078_v57, %v2960_v55  ;;  %v3081_v41 = vmul.f32 %v4933_v42, %v4426_v8  ;;  %v3056_v23 = vpop.f32.mrb[53].mxu1 }
 0x683   : > { %v2964_v49 = vadd.f32 %v2956_v9, %v2838_v1  ;;  %v7462_v22 = vadd.f32 %v3076_v4, %v2958_v54  ;;  %v3079_v16 = vmul.f32 %v4426_v8, %v3056_v23  ;;  %v4934_v59 = vpop.f32.mrb[54].mxu1 }
 0x684   : > { %v2962_v61 = vadd.f32 %v2954_v24, %v2836_v52  ;;  %v7464_v35 = vadd.f32 %v3081_v41, %v2963_v0  ;;  %v3082_v13 = vmul.f32 %v4934_v59, %v4426_v8  ;;  %v3059_v44 = vpop.f32.mrb[55].mxu1  ;;  %v5398_v52 = vld [vmem:[#allocation25 + $0x10] sm:$0xff]  }
 0x685   : > { %v7466_v47 = vadd.f32 %v3079_v16, %v2961_v37  ;;  %v3080_v25 = vmul.f32 %v4426_v8, %v3059_v44  ;;  %4955 = vmatprep.subr.bf16.mxu1 %v5398_v52  ;;  %v5399_v8 = vld [vmem:[#allocation25 + $0x18] sm:$0xff]   ;;  %v5401_v37 = vld [vmem:[#allocation28 + $0x8] sm:$0xff]  }
 0x686   : > { %v7468_v29 = vadd.f32 %v3082_v13, %v2964_v49  ;;  %4956 = vmatpush3.bf16.msra.mxu1 %v5398_v52 }
 0x687   : > { %v7470_v38 = vadd.f32 %v3080_v25, %v2962_v61  ;;  %4957 = vmatprep.subr.bf16.mxu1 %v5399_v8 }
 0x68a   : > { %4958 = vmatpush3.bf16.msra.mxu1 %v5399_v8  ;;  %v7800_v8 = vld [vmem:[#allocation62_spill] sm:$0xff] }
 0x6e4   : > { %v1910_v51 = vpop.xlane.xlu0 %1909 }
 0x6e5   : > { %5500 = vrcp.f32 %v1910_v51 }
 0x6e8   : > { %v1916_v45 = vpop.xlane.xlu0 %1915  ;;  %v1913_v55 = vpop.xlane.xlu1 %1912 }
 0x6e9   : > { %5502 = vrcp.f32 %v1913_v55 }
 0x6ea   : > { %5504 = vrcp.f32 %v1916_v45 }
 0x6ec   : > { %v1922_v54 = vpop.xlane.xlu0 %1921  ;;  %v1919_v46 = vpop.xlane.xlu1 %1918 }
 0x6ed   : > { %5506 = vrcp.f32 %v1919_v46 }
 0x6ee   : > { %5508 = vrcp.f32 %v1922_v54  ;;  %v5403_v54 = vld [vmem:[#allocation28 + $0x18] sm:$0xff]  }
 0x6ef   : > { %v5501_v30 = vpop.eup %5500 }
 0x6f0   : > { %v1928_v53 = vpop.xlane.xlu0 %1927  ;;  %v1925_v36 = vpop.xlane.xlu1 %1924  ;;  %v1940_v3 = vmul.f32 %v5501_v30, %v7362_v58 }
 0x6f1   : > { %5510 = vrcp.f32 %v1925_v36 }
 0x6f2   : > { %5512 = vrcp.f32 %v1928_v53 }
 0x6f3   : > { %v5503_v48 = vpop.eup %5502 }
 0x6f4   : > { %v1931_v21 = vpop.xlane.xlu1 %1930  ;;  %v1941_v33 = vmul.f32 %v5503_v48, %v7368_v63  ;;  %v5505_v34 = vpop.eup %5504 }
 0x6f5   : > { %5514 = vrcp.f32 %v1931_v21  ;;  %v1942_v26 = vmul.f32 %v5505_v34, %v7366_v2 }
 0x6f6   : > { %v1948_v39 = vpack.c.bf16 %v1941_v33, %v1940_v3 }
 0x6f7   : > { %v5507_v12 = vpop.eup %5506 }
 0x6f8   : > { %v1943_v27 = vmul.f32 %v5507_v12, %v7374_v7  ;;  %4943 = vmatprep.mubr.msk.bf16.mxu0 %vm1468_vm0, %v1948_v39  ;;  %v5509_v5 = vpop.eup %5508  ;;  %v7796_v12 = vld [vmem:[#allocation58_spill] sm:$0xff] }
 0x6f9   : > { %v1944_v1 = vmul.f32 %v5509_v5, %v7376_v6  ;;  %v5400_v6 = vld [vmem:[#allocation28] sm:$0xff]  }
 0x6fa   : > { %v1949_v60 = vpack.c.bf16 %v1943_v27, %v1942_v26  ;;  %4967 = vmatprep.subr.bf16.mxu0 %v5400_v6 }
 0x6fb   : > { %v5511_v9 = vpop.eup %5510 }
 0x6fc   : > { %v5513_v15 = vpop.eup %5512  ;;  %4944 = vmatmul.mubr.msk.bf16.vlgmr.msra.gmra.mrb[64].mxu0 %vm1468_vm0, %v1949_v60  ;;  %v1945_v58 = vmul.f32 %v5511_v9, %v7382_v10  ;;  %v4427_v10 = vld [vmem:[#allocation23] ss:$0 sm:$0xff] }
 0x6fd   : > { %v1946_v24 = vmul.f32 %v5513_v15, %v7384_v11  ;;  %4968 = vmatpush3.bf16.msra.mxu0 %v5400_v6  ;;  %v3100_v11 = vadd.f32 %v4427_v10, %v7456_v43  ;;  %v3098_v49 = vadd.f32 %v4427_v10, %v7458_v50  ;;  %v3101_v32 = vadd.f32 %v4427_v10, %v7460_v56 }
 0x6fe   : > { %v1950_v0 = vpack.c.bf16 %v1945_v58, %v1944_v1  ;;  %4969 = vmatprep.subr.bf16.mxu0 %v5401_v37  ;;  %v3099_v40 = vadd.f32 %v4427_v10, %v7462_v22  ;;  %v3104_v23 = vadd.f32 %v4427_v10, %v7464_v35  ;;  %v3102_v43 = vadd.f32 %v4427_v10, %v7466_v47  ;;  %v5402_v47 = vld [vmem:[#allocation28 + $0x10] sm:$0xff]  }
 0x6ff   : > { %v5515_v63 = vpop.eup %5514  ;;  %v3105_v56 = vadd.f32 %v4427_v10, %v7468_v29  ;;  %v3103_v44 = vadd.f32 %v4427_v10, %v7470_v38  ;;  %v4432_v29 = vld [vmem:[#allocation26] ss:$0 sm:$0xff] }
 0x700   : > { %v1947_v2 = vmul.f32 %v5515_v63, %v7390_v14  ;;  %4947 = vmatprep.mubr.msk.bf16.mxu0 %vm1468_vm0, %v1950_v0  ;;  %v7797_v63 = vld [vmem:[#allocation59_spill] sm:$0xff] }
 0x701   : > { %4970 = vmatpush3.bf16.msra.mxu0 %v5401_v37 }
 0x702   : > { %v1951_v7 = vpack.c.bf16 %v1947_v2, %v1946_v24  ;;  %4971 = vmatprep.subr.bf16.mxu0 %v5402_v47  ;;  %v7798_v24 = vld [vmem:[#allocation60_spill] sm:$0xff] }
 0x704   : > { %4948 = vmatmul.mubr.msk.bf16.gmra.mrb[68].mxu0 %vm1468_vm0, %v1951_v7  ;;  %v7799_v7 = vld [vmem:[#allocation61_spill] sm:$0xff] }
 0x705   : > { %4972 = vmatpush3.bf16.msra.mxu0 %v5402_v47 }
 0x706   : > { %4973 = vmatprep.subr.bf16.mxu0 %v5403_v54 }
 0x709   : > { %4974 = vmatpush3.bf16.msra.mxu0 %v5403_v54 }
 0x7cf   : > { %v4945_v14 = vpop.f32.mrb[64].mxu0 }
 0x7d0   : > { %v3161_v17 = vadd.f32 %v4945_v14, %v3100_v11  ;;  %v3152_v61 = vpop.f32.mrb[65].mxu0  ;;  %v5404_v11 = vld [vmem:[#allocation31] sm:$0xff]   ;;  %v5405_v14 = vld [vmem:[#allocation31 + $0x8] sm:$0xff]  }
 0x7d1   : > { %v3153_v62 = vadd.f32 %v3152_v61, %v3098_v49  ;;  %v4946_v31 = vpop.f32.mrb[66].mxu0  ;;  %4983 = vmatprep.subr.bf16.mxu1 %v5404_v11  ;;  %v5406_v49 = vld [vmem:[#allocation31 + $0x10] sm:$0xff]   ;;  %v5408_v61 = vld [vmem:[#allocation31 + $0x20] sm:$0xff]  }
 0x7d2   : > { %v3164_v57 = vadd.f32 %v4946_v31, %v3101_v32  ;;  %v3155_v28 = vpop.f32.mrb[67].mxu0  ;;  %v5409_v32 = vld [vmem:[#allocation31 + $0x28] sm:$0xff]   ;;  %v5411_v31 = vld [vmem:[#allocation31 + $0x38] sm:$0xff]  }
 0x7d3   : > { %v3156_v4 = vadd.f32 %v3155_v28, %v3099_v40  ;;  %v7532_v40 = vld [vmem:[#allocation34] sm:$0xff]   ;;  %v5417_v28 = vld [vmem:[#allocation35 + $0x8] sm:$0xff]  }
 0x7d4   : > { %v3184_v42 = vpack.c.bf16 %v3164_v57, %v3161_v17  ;;  %v5407_v17 = vld [vmem:[#allocation31 + $0x18] sm:$0xff]   ;;  %v5416_v57 = vld [vmem:[#allocation35] sm:$0xff]  }
 0x7d5   : > { %v3183_v41 = vpack.c.bf16 %v3156_v4, %v3153_v62  ;;  %v5410_v62 = vld [vmem:[#allocation31 + $0x30] sm:$0xff]   ;;  %5007 = vmatprep.subr.bf16.mxu0 %v5416_v57  ;;  %v4441_v4 = vld [vmem:[#allocation29] ss:$0 sm:$0xff] }
 0x7d7   : > { %v4949_v16 = vpop.f32.mrb[68].mxu0  ;;  %4959 = vmatprep.mubr.msk.bf16.mxu1 %vm1468_vm0, %v3183_v41 }
 0x7d8   : > { %v3177_v50 = vadd.f32 %v4949_v16, %v3104_v23  ;;  %v3168_v59 = vpop.f32.mrb[69].mxu0  ;;  %4960 = vmatmul.mubr.msk.bf16.vlgmr.msra.gmra.mrb[56].mxu1 %vm1468_vm0, %v3184_v42 }
 0x7d9   : > { %v3169_v13 = vadd.f32 %v3168_v59, %v3102_v43  ;;  %v4950_v22 = vpop.f32.mrb[70].mxu0  ;;  %4984 = vmatpush3.bf16.msra.mxu1 %v5404_v11 }
 0x7da   : > { %v3180_v25 = vadd.f32 %v4950_v22, %v3105_v56  ;;  %v3171_v51 = vpop.f32.mrb[71].mxu0  ;;  %4985 = vmatprep.subr.bf16.mxu1 %v5405_v14 }
 0x7db   : > { %v3172_v45 = vadd.f32 %v3171_v51, %v3103_v44 }
 0x7dc   : > { %v3186_v55 = vpack.c.bf16 %v3180_v25, %v3177_v50 }
 0x7dd   : > { %v3185_v35 = vpack.c.bf16 %v3172_v45, %v3169_v13  ;;  %4986 = vmatpush3.bf16.msra.mxu1 %v5405_v14 }
 0x7de   : > { %4987 = vmatprep.subr.bf16.mxu1 %v5406_v49 }
 0x7df   : > { %4963 = vmatprep.mubr.msk.bf16.mxu1 %vm1468_vm0, %v3185_v35 }
 0x7e0   : > { %4964 = vmatmul.mubr.msk.bf16.gmra.mrb[60].mxu1 %vm1468_vm0, %v3186_v55 }
 0x7e1   : > { %4988 = vmatpush3.bf16.msra.mxu1 %v5406_v49 }
 0x7e2   : > { %4989 = vmatprep.subr.bf16.mxu1 %v5407_v17 }
 0x7e5   : > { %4990 = vmatpush3.bf16.msra.mxu1 %v5407_v17 }
 0x7e6   : > { %4991 = vmatprep.subr.bf16.mxu1 %v5408_v61 }
 0x7e9   : > { %4992 = vmatpush3.bf16.msra.mxu1 %v5408_v61 }
 0x7ea   : > { %4993 = vmatprep.subr.bf16.mxu1 %v5409_v32 }
 0x7ed   : > { %4994 = vmatpush3.bf16.msra.mxu1 %v5409_v32 }
 0x7ee   : > { %4995 = vmatprep.subr.bf16.mxu1 %v5410_v62 }
 0x7f1   : > { %4996 = vmatpush3.bf16.msra.mxu1 %v5410_v62  ;;  %v7535_v62 = vld [vmem:[#allocation34 + $0x8] sm:$0xff]  }
 0x7f2   : > { %4997 = vmatprep.subr.bf16.mxu1 %v5411_v31 }
 0x7f5   : > { %4998 = vmatpush3.bf16.msra.mxu1 %v5411_v31 }
 0x7f6   : > { %5039 = vmatprep.subr.bf16.mxu1 %v7532_v40 }
 0x8ab   : > { %v4961_v46 = vpop.f32.mrb[56].mxu1 }
 0x8ac   : > { %v3272_v53 = vpop.f32.mrb[57].mxu1  ;;  %v3281_v30 = vadd.f32 %v4961_v46, %v4432_v29 }
 0x8ad   : > { %v3273_v36 = vadd.f32 %v4432_v29, %v3272_v53  ;;  %v4962_v38 = vpop.f32.mrb[58].mxu1 }
 0x8ae   : > { %v3284_v48 = vadd.f32 %v4962_v38, %v4432_v29  ;;  %v3275_v21 = vpop.f32.mrb[59].mxu1  ;;  %v7506_v26 = vadd.f32 %v3281_v30, %v7796_v12 }
 0x8af   : > { %v3276_v3 = vadd.f32 %v4432_v29, %v3275_v21  ;;  %v7500_v34 = vadd.f32 %v3273_v36, %v7143_v19 }
 0x8b0   : > { %v7497_v33 = vadd.f32 %v3284_v48, %v7141_v18 }
 0x8b1   : > { %v7503_v39 = vadd.f32 %v3276_v3, %v7145_v20 }
 0x8b2   : > { %v3312_v60 = vpack.c.bf16 %v7497_v33, %v7506_v26 }
 0x8b3   : > { %v3311_v27 = vpack.c.bf16 %v7503_v39, %v7500_v34  ;;  %v4965_v5 = vpop.f32.mrb[60].mxu1 }
 0x8b4   : > { %v3288_v9 = vpop.f32.mrb[61].mxu1  ;;  %v3297_v19 = vadd.f32 %v4965_v5, %v4432_v29 }
 0x8b5   : > { %v3289_v15 = vadd.f32 %v4432_v29, %v3288_v9  ;;  %v4966_v18 = vpop.f32.mrb[62].mxu1  ;;  %4975 = vmatprep.mubr.msk.bf16.mxu0 %vm1468_vm0, %v3311_v27 }
 0x8b6   : > { %v3300_v1 = vadd.f32 %v4966_v18, %v4432_v29  ;;  %v3291_v58 = vpop.f32.mrb[63].mxu1  ;;  %4976 = vmatmul.mubr.msk.bf16.vlgmr.msra.gmra.mrb[72].mxu0 %vm1468_vm0, %v3312_v60  ;;  %v7524_v6 = vadd.f32 %v3297_v19, %v7800_v8 }
 0x8b7   : > { %v3292_v20 = vadd.f32 %v4432_v29, %v3291_v58  ;;  %v7518_v2 = vadd.f32 %v3289_v15, %v7798_v24  ;;  %5008 = vmatpush3.bf16.msra.mxu0 %v5416_v57 }
 0x8b8   : > { %v7515_v0 = vadd.f32 %v3300_v1, %v7797_v63  ;;  %5009 = vmatprep.subr.bf16.mxu0 %v5417_v28 }
 0x8b9   : > { %v7521_v52 = vadd.f32 %v3292_v20, %v7799_v7 }
 0x8ba   : > { %v3314_v10 = vpack.c.bf16 %v7515_v0, %v7524_v6 }
 0x8bb   : > { %v3313_v37 = vpack.c.bf16 %v7521_v52, %v7518_v2  ;;  %5010 = vmatpush3.bf16.msra.mxu0 %v5417_v28 }
 0x8bd   : > { %4979 = vmatprep.mubr.msk.bf16.mxu0 %vm1468_vm0, %v3313_v37 }
 0x8be   : > { %4980 = vmatmul.mubr.msk.bf16.gmra.mrb[76].mxu0 %vm1468_vm0, %v3314_v10 }
 0x989   : > { %v4977_v42 = vpop.f32.mrb[72].mxu0 }
 0x98a   : > { %v3409_v41 = vadd.f32 %v4977_v42, %v4441_v4  ;;  %v3400_v23 = vpop.f32.mrb[73].mxu0 }
 0x98b   : > { %v3401_v16 = vadd.f32 %v4441_v4, %v3400_v23  ;;  %v4978_v43 = vpop.f32.mrb[74].mxu0 }
 0x98c   : > { %v4452_v50 = vmul.f32 -1.442695, %v3409_v41  ;;  %v3412_v59 = vadd.f32 %v4978_v43, %v4441_v4  ;;  %v3403_v56 = vpop.f32.mrb[75].mxu0 }
 0x98d   : > { %v4450_v13 = vmul.f32 -1.442695, %v3401_v16  ;;  %v3404_v22 = vadd.f32 %v4441_v4, %v3403_v56  ;;  %v5415_v56 = vld [vmem:[#allocation34 + $0x18] sm:$0xff]  }
 0x98e   : > { %5516 = vpow2.f32 %v4452_v50  ;;  %v4453_v44 = vmul.f32 -1.442695, %v3412_v59 }
 0x98f   : > { %5518 = vpow2.f32 %v4450_v13  ;;  %v4451_v25 = vmul.f32 -1.442695, %v3404_v22  ;;  %v7801_v13 = vld [vmem:[#allocation70_spill] sm:$0xff] }
 0x990   : > { %5520 = vpow2.f32 %v4453_v44 }
 0x991   : > { %5522 = vpow2.f32 %v4451_v25  ;;  %v4981_v51 = vpop.f32.mrb[76].mxu0  ;;  %v7804_v25 = vld [vmem:[#allocation69_spill] sm:$0xff] }
 0x992   : > { %v3425_v45 = vadd.f32 %v4981_v51, %v4441_v4  ;;  %v3416_v55 = vpop.f32.mrb[77].mxu0  ;;  %v7805_v51 = vld [vmem:[#allocation67_spill] sm:$0xff] }
 0x993   : > { %v3417_v35 = vadd.f32 %v4441_v4, %v3416_v55  ;;  %v4982_v47 = vpop.f32.mrb[78].mxu0  ;;  %v5418_v55 = vld [vmem:[#allocation35 + $0x10] sm:$0xff]  }
 0x994   : > { %v4456_v54 = vmul.f32 -1.442695, %v3425_v45  ;;  %v3428_v29 = vadd.f32 %v4982_v47, %v4441_v4  ;;  %v3419_v46 = vpop.f32.mrb[79].mxu0  ;;  %5011 = vmatprep.subr.bf16.mxu0 %v5418_v55  ;;  %v4458_v47 = vld [vmem:[#allocation32] ss:$0 sm:$0xff] }
 0x995   : > { %v4454_v53 = vmul.f32 -1.442695, %v3417_v35  ;;  %v3420_v36 = vadd.f32 %v4441_v4, %v3419_v46  ;;  %5012 = vmatpush3.bf16.msra.mxu0 %v5418_v55 }
 0x996   : > { %5524 = vpow2.f32 %v4456_v54  ;;  %v4457_v38 = vmul.f32 -1.442695, %v3428_v29 }
 0x997   : > { %5526 = vpow2.f32 %v4454_v53  ;;  %v4455_v30 = vmul.f32 -1.442695, %v3420_v36 }
 0x998   : > { %v5517_v48 = vpop.eup %5516  ;;  %5528 = vpow2.f32 %v4457_v38 }
 0x999   : > { %v5519_v21 = vpop.eup %5518  ;;  %v3457_v3 = vadd.f32 1.0, %v5517_v48  ;;  %5530 = vpow2.f32 %v4455_v30 }
 0x99a   : > { %v5521_v12 = vpop.eup %5520  ;;  %v3455_v27 = vadd.f32 1.0, %v5519_v21 }
 0x99b   : > { %v5523_v5 = vpop.eup %5522  ;;  %5532 = vrcp.f32 %v3457_v3  ;;  %v3458_v60 = vadd.f32 1.0, %v5521_v12 }
 0x99c   : > { %5534 = vrcp.f32 %v3455_v27  ;;  %v3456_v9 = vadd.f32 1.0, %v5523_v5 }
 0x99d   : > { %5536 = vrcp.f32 %v3458_v60 }
 0x99e   : > { %5538 = vrcp.f32 %v3456_v9 }
 0x9a0   : > { %v5525_v15 = vpop.eup %5524 }
 0x9a1   : > { %v5527_v18 = vpop.eup %5526  ;;  %v3461_v19 = vadd.f32 1.0, %v5525_v15 }
 0x9a2   : > { %v5529_v1 = vpop.eup %5528  ;;  %v3459_v58 = vadd.f32 1.0, %v5527_v18 }
 0x9a3   : > { %v5531_v20 = vpop.eup %5530  ;;  %5540 = vrcp.f32 %v3461_v19  ;;  %v3462_v63 = vadd.f32 1.0, %v5529_v1 }
 0x9a4   : > { %5542 = vrcp.f32 %v3459_v58  ;;  %v3460_v24 = vadd.f32 1.0, %v5531_v20 }
 0x9a5   : > { %v5533_v7 = vpop.eup %5532  ;;  %5544 = vrcp.f32 %v3462_v63 }
 0x9a6   : > { %v5535_v8 = vpop.eup %5534  ;;  %5546 = vrcp.f32 %v3460_v24  ;;  %v3481_v11 = vmul.f32 %v5533_v7, %v3409_v41  ;;  %v5414_v41 = vld [vmem:[#allocation34 + $0x10] sm:$0xff]  }
 0x9a7   : > { %v5537_v37 = vpop.eup %5536  ;;  %v3479_v49 = vmul.f32 %v5535_v8, %v3401_v16 }
 0x9a8   : > { %v5539_v10 = vpop.eup %5538  ;;  %v3482_v14 = vmul.f32 %v5537_v37, %v3412_v59 }
 0x9a9   : > { %v3480_v17 = vmul.f32 %v5539_v10, %v3404_v22  ;;  %v7802_v22 = vld [vmem:[#allocation68_spill] sm:$0xff] }
 0x9aa   : > { %v3488_v61 = vpack.c.bf16 %v3482_v14, %v3481_v11  ;;  %v7803_v44 = vpack.c.bf16 %v7801_v13, %v7802_v22  ;;  %v7808_v10 = vld [vmem:[#allocation64_spill] sm:$0xff] }
 0x9ab   : > { %v3487_v32 = vpack.c.bf16 %v3480_v17, %v3479_v49  ;;  %v4483_v17 = vld [vmem:[#allocation37] ss:$0 sm:$0xff] }
 0x9ad   : > { %v5541_v31 = vpop.eup %5540  ;;  %4999 = vmatprep.mubr.bf16.mxu1 %v3487_v32 }
 0x9ae   : > { %v5543_v57 = vpop.eup %5542  ;;  %5000 = vmatmul.mubr.bf16.vlgmr.msra.gmra.mrb[64].mxu1 %v3488_v61  ;;  %v3485_v42 = vmul.f32 %v5541_v31, %v3425_v45  ;;  %v7806_v45 = vpack.c.bf16 %v7804_v25, %v7805_v51 }
 0x9af   : > { %v5545_v28 = vpop.eup %5544  ;;  %5043 = vmatpush3.bf16.msra.mxu1 %v7532_v40  ;;  %v3483_v43 = vmul.f32 %v5543_v57, %v3417_v35  ;;  %v5419_v35 = vld [vmem:[#allocation35 + $0x18] sm:$0xff]  }
 0x9b0   : > { %v5547_v4 = vpop.eup %5546  ;;  %v3486_v23 = vmul.f32 %v5545_v28, %v3428_v29  ;;  %5040 = vmatprep.subr.bf16.mxu1 %v7535_v62  ;;  %5013 = vmatprep.subr.bf16.mxu0 %v5419_v35 }
 0x9b1   : > { %v3484_v16 = vmul.f32 %v5547_v4, %v3420_v36  ;;  %5014 = vmatpush3.bf16.msra.mxu0 %v5419_v35 }
 0x9b2   : > { %v3490_v50 = vpack.c.bf16 %v3486_v23, %v3485_v42  ;;  %5023 = vmatprep.subr.bf16.mxu0 %v7532_v40 }
 0x9b3   : > { %5044 = vmatpush3.bf16.msra.mxu1 %v7535_v62  ;;  %v3489_v59 = vpack.c.bf16 %v3484_v16, %v3483_v43 }
 0x9b4   : > { %5041 = vmatprep.subr.bf16.mxu1 %v5414_v41 }
 0x9b5   : > { %5003 = vmatprep.mubr.bf16.mxu1 %v3489_v59 }
 0x9b6   : > { %5004 = vmatmul.mubr.bf16.gmra.mrb[68].mxu1 %v3490_v50 }
 0x9b7   : > { %5045 = vmatpush3.bf16.msra.mxu1 %v5414_v41  ;;  %5035 = vmatprep.mubr.msk.bf16.mxu1 %vm1468_vm0, %v7803_v44 }
 0x9b8   : > { %5042 = vmatprep.subr.bf16.mxu1 %v5415_v56 }
 0x9bb   : > { %5046 = vmatpush3.bf16.msra.mxu1 %v5415_v56 }
 0x9be   : > { %5036 = vmatmul.mubr.msk.bf16.vlgmr.msra.gmra.mrb[72].mxu1 %vm1468_vm0, %v7806_v45 }
 0xa81   : > { %v5001_v54 = vpop.f32.mrb[64].mxu1 }
 0xa82   : > { %v3605_v29 = vadd.f32 %v5001_v54, %v4458_v47  ;;  %v3596_v46 = vpop.f32.mrb[65].mxu1 }
 0xa83   : > { %v3597_v53 = vadd.f32 %v4458_v47, %v3596_v46  ;;  %v5002_v36 = vpop.f32.mrb[66].mxu1 }
 0xa84   : > { %v3608_v38 = vadd.f32 %v5002_v36, %v4458_v47  ;;  %v3599_v30 = vpop.f32.mrb[67].mxu1  ;;  %v3629_v21 = vadd.f32 %v3605_v29, %v7506_v26 }
 0xa85   : > { %v3600_v48 = vadd.f32 %v4458_v47, %v3599_v30  ;;  %v3627_v12 = vadd.f32 %v3597_v53, %v7500_v34 }
 0xa86   : > { %v3630_v3 = vadd.f32 %v3608_v38, %v7497_v33 }
 0xa87   : > { %v3628_v27 = vadd.f32 %v3600_v48, %v7503_v39 }
 0xa88   : > { %v3648_v5 = vpack.c.bf16 %v3630_v3, %v3629_v21 }
 0xa89   : > { %v3647_v60 = vpack.c.bf16 %v3628_v27, %v3627_v12  ;;  %v5005_v9 = vpop.f32.mrb[68].mxu1 }
 0xa8a   : > { %v3621_v15 = vadd.f32 %v5005_v9, %v4458_v47  ;;  %v3612_v18 = vpop.f32.mrb[69].mxu1 }
 0xa8b   : > { %v3613_v19 = vadd.f32 %v4458_v47, %v3612_v18  ;;  %v5006_v1 = vpop.f32.mrb[70].mxu1  ;;  %5015 = vmatprep.mubr.msk.bf16.mxu0 %vm1468_vm0, %v3647_v60 }
 0xa8c   : > { %v3624_v58 = vadd.f32 %v5006_v1, %v4458_v47  ;;  %v3615_v20 = vpop.f32.mrb[71].mxu1  ;;  %5016 = vmatmul.mubr.msk.bf16.vlgmr.msra.gmra.mrb[80].mxu0 %vm1468_vm0, %v3648_v5  ;;  %v3633_v33 = vadd.f32 %v3621_v15, %v7524_v6 }
 0xa8d   : > { %v3616_v26 = vadd.f32 %v4458_v47, %v3615_v20  ;;  %5024 = vmatpush3.bf16.msra.mxu0 %v7532_v40  ;;  %v3631_v39 = vadd.f32 %v3613_v19, %v7518_v2  ;;  %v7810_v2 = vld [vmem:[#allocation65_spill] sm:$0xff] }
 0xa8e   : > { %v3634_v34 = vadd.f32 %v3624_v58, %v7515_v0  ;;  %5025 = vmatprep.subr.bf16.mxu0 %v7535_v62  ;;  %v7807_v0 = vld [vmem:[#allocation66_spill] sm:$0xff] }
 0xa8f   : > { %v3632_v63 = vadd.f32 %v3616_v26, %v7521_v52  ;;  %v7809_v11 = vpack.c.bf16 %v7807_v0, %v7808_v10  ;;  %v7811_v52 = vld [vmem:[#allocation63_spill] sm:$0xff] }
 0xa90   : > { %v3650_v24 = vpack.c.bf16 %v3634_v34, %v3633_v33  ;;  %v7812_v14 = vpack.c.bf16 %v7810_v2, %v7811_v52 }
 0xa91   : > { %v3649_v7 = vpack.c.bf16 %v3632_v63, %v3631_v39  ;;  %5026 = vmatpush3.bf16.msra.mxu0 %v7535_v62  ;;  %v5037_v8 = vpop.f32.mrb[72].mxu1 }
 0xa92   : > { %v3846_v37 = vpop.f32.mrb[73].mxu1  ;;  %5027 = vmatprep.subr.bf16.mxu0 %v5414_v41 }
 0xa93   : > { %5019 = vmatprep.mubr.msk.bf16.mxu0 %vm1468_vm0, %v3649_v7  ;;  %v5038_v40 = vpop.f32.mrb[74].mxu1 }
 0xa94   : > { %5020 = vmatmul.mubr.msk.bf16.gmra.mrb[84].mxu0 %vm1468_vm0, %v3650_v24  ;;  %v3849_v6 = vpop.f32.mrb[75].mxu1 }
 0xa95   : > { %5028 = vmatpush3.bf16.msra.mxu0 %v5414_v41  ;;  %5031 = vmatprep.mubr.msk.bf16.mxu0 %vm1468_vm0, %v7809_v11 }
 0xa96   : > { %5029 = vmatprep.subr.bf16.mxu0 %v5415_v56 }
 0xa99   : > { %5030 = vmatpush3.bf16.msra.mxu0 %v5415_v56 }
 0xa9c   : > { %5032 = vmatmul.mubr.msk.bf16.vlgmr.msra.gmra.mrb[80].mxu0 %vm1468_vm0, %v7812_v14 }
 0xb67   : > { %v5021_v49 = vpop.f32.mrb[84].mxu0 }
 0xb68   : > { %v3855_v61 = vadd.f32 %v5037_v8, %v5021_v49  ;;  %v3745_v32 = vpop.f32.mrb[85].mxu0 }
 0xb69   : > { %v3847_v62 = vadd.f32 %v3846_v37, %v3745_v32  ;;  %v5022_v31 = vpop.f32.mrb[86].mxu0 }
 0xb6a   : > { %v3874_v57 = vadd.f32 %v4483_v17, %v3855_v61  ;;  %v3858_v28 = vadd.f32 %v5038_v40, %v5022_v31  ;;  %v3748_v4 = vpop.f32.mrb[87].mxu0 }
 0xb6b   : > { %v3872_v42 = vadd.f32 %v4483_v17, %v3847_v62  ;;  %v3850_v23 = vadd.f32 %v3849_v6, %v3748_v4 }
 0xb6c   : > { %v4490_v41 = vmul.f32 -1.442695, %v3874_v57  ;;  %v3875_v43 = vadd.f32 %v4483_v17, %v3858_v28 }
 0xb6d   : > { %v4488_v16 = vmul.f32 -1.442695, %v3872_v42  ;;  %v3873_v50 = vadd.f32 %v4483_v17, %v3850_v23 }
 0xb6e   : > { %5548 = vpow2.f32 %v4490_v41  ;;  %v4491_v59 = vmul.f32 -1.442695, %v3875_v43 }
 0xb6f   : > { %5550 = vpow2.f32 %v4488_v16  ;;  %v4489_v56 = vmul.f32 -1.442695, %v3873_v50  ;;  %v5033_v13 = vpop.f32.mrb[80].mxu0 }
 0xb70   : > { %5552 = vpow2.f32 %v4491_v59  ;;  %v3870_v22 = vadd.f32 %v5033_v13, %v4483_v17  ;;  %v3830_v44 = vpop.f32.mrb[81].mxu0 }
 0xb71   : > { %5554 = vpow2.f32 %v4489_v56  ;;  %v3868_v25 = vadd.f32 %v4483_v17, %v3830_v44  ;;  %v5034_v51 = vpop.f32.mrb[82].mxu0 }
 0xb72   : > { %v4486_v45 = vmul.f32 -1.442695, %v3870_v22  ;;  %v3871_v55 = vadd.f32 %v5034_v51, %v4483_v17  ;;  %v3833_v35 = vpop.f32.mrb[83].mxu0 }
 0xb73   : > { %v4484_v47 = vmul.f32 -1.442695, %v3868_v25  ;;  %v3869_v54 = vadd.f32 %v4483_v17, %v3833_v35 }
 0xb74   : > { %5556 = vpow2.f32 %v4486_v45  ;;  %v4487_v29 = vmul.f32 -1.442695, %v3871_v55 }
 0xb75   : > { %5558 = vpow2.f32 %v4484_v47  ;;  %v4485_v46 = vmul.f32 -1.442695, %v3869_v54 }
 0xb76   : > { %5560 = vpow2.f32 %v4487_v29 }
 0xb77   : > { %5562 = vpow2.f32 %v4485_v46 }
 0xb78   : > { %v5549_v53 = vpop.eup %5548 }
 0xb79   : > { %v5551_v36 = vpop.eup %5550  ;;  %v3906_v38 = vadd.f32 1.0, %v5549_v53 }
 0xb7a   : > { %v5553_v30 = vpop.eup %5552  ;;  %v3904_v48 = vadd.f32 1.0, %v5551_v36 }
 0xb7b   : > { %v5555_v21 = vpop.eup %5554  ;;  %5564 = vrcp.f32 %v3906_v38  ;;  %v3907_v3 = vadd.f32 1.0, %v5553_v30 }
 0xb7c   : > { %5566 = vrcp.f32 %v3904_v48  ;;  %v3905_v12 = vadd.f32 1.0, %v5555_v21 }
 0xb7d   : > { %5568 = vrcp.f32 %v3907_v3 }
 0xb7e   : > { %v5557_v27 = vpop.eup %5556  ;;  %5570 = vrcp.f32 %v3905_v12 }
 0xb7f   : > { %v5559_v5 = vpop.eup %5558  ;;  %v3902_v60 = vadd.f32 1.0, %v5557_v27 }
 0xb80   : > { %v5561_v9 = vpop.eup %5560  ;;  %v3900_v15 = vadd.f32 1.0, %v5559_v5 }
 0xb81   : > { %v5563_v18 = vpop.eup %5562  ;;  %5572 = vrcp.f32 %v3902_v60  ;;  %v3903_v19 = vadd.f32 1.0, %v5561_v9 }
 0xb82   : > { %5574 = vrcp.f32 %v3900_v15  ;;  %v3901_v1 = vadd.f32 1.0, %v5563_v18 }
 0xb83   : > { %5576 = vrcp.f32 %v3903_v19 }
 0xb84   : > { %5578 = vrcp.f32 %v3901_v1 }
 0xb85   : > { %v5565_v58 = vpop.eup %5564 }
 0xb86   : > { %v5567_v20 = vpop.eup %5566  ;;  %v3930_v26 = vmul.f32 %v5565_v58, %v3874_v57 }
 0xb87   : > { %v5569_v33 = vpop.eup %5568  ;;  %v3928_v34 = vmul.f32 %v5567_v20, %v3872_v42 }
 0xb88   : > { %v5571_v39 = vpop.eup %5570  ;;  %3938 = vst [vmem:[%s1027_s8 + $0x30] sm:$0xff] %v3930_v26  ;;  %v3931_v63 = vmul.f32 %v5569_v33, %v3875_v43 }
 0xb89   : > { %3936 = vst [vmem:[%s1027_s8 + $0x20] sm:$0xff] %v3928_v34  ;;  %v3929_v24 = vmul.f32 %v5571_v39, %v3873_v50 }
 0xb8a   : > { %3939 = vst [vmem:[%s1027_s8 + $0x38] sm:$0xff] %v3931_v63 }
 0xb8b   : > { %v5573_v7 = vpop.eup %5572  ;;  %3937 = vst [vmem:[%s1027_s8 + $0x28] sm:$0xff] %v3929_v24 }
 0xb8c   : > { %v5575_v8 = vpop.eup %5574  ;;  %v3926_v37 = vmul.f32 %v5573_v7, %v3870_v22 }
 0xb8d   : > { %v5577_v40 = vpop.eup %5576  ;;  %v3924_v6 = vmul.f32 %v5575_v8, %v3868_v25 }
 0xb8e   : > { %v5579_v0 = vpop.eup %5578  ;;  %3934 = vst [vmem:[%s1027_s8 + $0x10] sm:$0xff] %v3926_v37  ;;  %v3927_v10 = vmul.f32 %v5577_v40, %v3871_v55 }
 0xb8f   : > { %3932 = vst [vmem:[%s1027_s8] sm:$0xff] %v3924_v6  ;;  %v3925_v11 = vmul.f32 %v5579_v0, %v3869_v54 }
 0xb90   : > { %3935 = vst [vmem:[%s1027_s8 + $0x18] sm:$0xff] %v3927_v10 }
 0xb91   : > { %3933 = vst [vmem:[%s1027_s8 + $0x8] sm:$0xff] %v3925_v11 }
 0xb92   : > { %6239 = shalt.err (!%p6236_p10)
}
 0xb93   : > { %s6240_s8 = scalar_lea.hbm %s7578_s23, 1024  ;;  %s6244_s22 = scalar_lea.hbm %s7813_s20, 2048 }
 0xb94   : > { %p6241_p11 = scmp.ne.s32.totalorder %s7578_s23, %s6240_s8  ;;  %p6245_p7 = scmp.lt.u32.totalorder %s7578_s23, %s7813_s20 }
 0xb95   : > { %p6246_p6 = scmp.lt.u32.totalorder %s6244_s22, %s6240_s8  ;;  %p6248_p12 = scmp.lt.u32.totalorder %s6240_s8, %s7578_s23 }
 0xb96   : > { %p6242_p3 = pnand %p6241_p11, %p7814_p1 }
 0xb97   : > { %p6247_p9 = por %p6246_p6, %p6245_p7 }
 0xb98   : > { %p6243_p5 = pneg %p6242_p3 }
 0xb99   : > { %p6249_p13 = por %p6248_p12, %p6247_p9 }
 0xb9b   : > { %p6250_p0 = pnand %p6249_p13, %p6243_p5 }
 0xb9d   : > { %6253 = shalt.err (!%p6250_p0)
}
 0xb9e   : > { %s6366_s5 = smov 128   ;;  %s6367_s24 = smov 8  }
 0xb9f   : > { %5149 = dma.vmem_to_hbm [thread:$0]  (%p7814_p1), %s7580_s10, 1024, %s7578_s23, %s3941_s4, %s6366_s5, %s6366_s5, %s6367_s24  }
 0xba0 PF: > { %s7815_s30 = sld [smem:[#allocation52_spill]]  ;;  %s7816_s6 = sld [smem:[#allocation55_spill]] }
 0xba1   : > { %p7817_p2 = scmp.ne.s32.totalorder %s7751_s3, 0 }
 0xba6   : > { %s3969_s9 = sand.u32 1, %s7815_s30   ;;  %p7818_p8 = scmp.ge.s32.totalorder %s7816_s6, 2 }
 0xba7   : > { %s3970_s8 = scalar_lea.sflag [#allocation4], %s3969_s9 }
 0xba8   : > { %p5223_p4 = pnand %p7818_p8, %p7817_p2 }
 0xbaa   : > { %6319 = dma.done.wait (!%p5223_p4), %s3970_s8, 1024  }
 0xbab   : > { %6321 = vsyncadd (!%p5223_p4), %s3970_s8, 4294966272  ;;  %s7819_s4 = sld [smem:[#allocation53_spill]]  ;;  %s7820_s30 = sld [smem:[#allocation54_spill]] }
 0xbac   : > { %p47_p10 = scmp.ge.s32.totalorder %s6989_s25, 4   ;;  %s7821_s24 = smov %s7000_s27 }
 0xbae   :  { %49 = sbr.rel (!%p47_p10) target bundleno = 33 (0x21), region = 253 }
 0xbb5   :  { %3975 = vsyncpa [#allocation3], 1 }
 0xbb6   :  { %3977 = vsyncpa [#allocation3 + $0x1], 1 }
 0xbb7   :  { %3978 = vsyncpa [#allocation6], 1 }
 0xbb8   :  { %3979 = vsyncpa [#allocation9], 1 }
 0xbb9   :  { %3980 = vsyncpa [#allocation12], 1 }
 0xbba   :  { %3981 = vsyncpa [#allocation15], 1 }
 0xbbb   :  { %3982 = vsyncpa [#allocation18], 1 }
 0xbbc   :  { %3983 = vsyncpa [#allocation21], 1 }
 0xbbd   :  { %3984 = vsyncpa [#allocation24], 1 }
 0xbbe   :  { %3985 = vsyncpa [#allocation27], 1 }
 0xbbf   :  { %3986 = vsyncpa [#allocation30], 1 }
 0xbc0   :  { %3987 = vsyncpa [#allocation33], 1 }
 0xbc1   :  { %3988 = vsyncpa [#allocation36], 1 }
 0xbc2   :  { %3989 = vsyncpa [#allocation4], 1 }
 0xbc3   :  { %3991 = vsyncpa [#allocation4 + $0x1], 1 }

</bundles_post_ra>
